<compile_context>
chip_gen: v7x
topology: tpu7x:2x2x1
jax: 0.10.0
libtpu: 0.0.40
codegen_flags: <defaults>
</compile_context>

<pallas_src>
import functools
import math

import jax
import jax.numpy as jnp
from jax.experimental import pallas as pl
from jax.experimental.pallas import tpu as pltpu


# ----------------------------- model config ---------------------------------
D_IN = 3
D_OUT = 4
D_HIDDEN = 32
N_LAYERS = 8                     # number of hidden layers
SKIP_IN = (4,)
BIAS = 1.0
INSIDE_OUTSIDE = False

DIMS = [D_IN] + [D_HIDDEN] * N_LAYERS + [D_OUT]
NUM_LAYERS = len(DIMS)           # == N_LAYERS + 2
N_LIN = NUM_LAYERS - 1           # 9 linear layers

SKIP_L = SKIP_IN[0]              # layer whose input is concat([x, inputs]) / sqrt(2)
D_SKIP_HID = D_HIDDEN - D_IN     # 29: hidden part of the concatenated input

# layout-friendly padded sizes (sublane dim multiple of 8)
D_IN_PAD = 8
D_OUT_PAD = 8
N_HIDDEN_STACK = N_LIN - 2       # lin1..lin7 -> 7 (32x32) layers

COMPUTE_DTYPE = jnp.bfloat16     # matmul operand dtype (f32 accumulation)


# ------------------------------ parameters -----------------------------------
def init_params(key):
    """Geometric init (weight_norm at init is identity). PyTorch layout:
    weight (out_dim, in_dim), bias (out_dim,)."""
    params = []
    for l in range(N_LIN):
        in_dim = DIMS[l]
        out_dim = DIMS[l + 1] - DIMS[0] if (l + 1) in SKIP_IN else DIMS[l + 1]
        key, kw = jax.random.split(key)
        if l == NUM_LAYERS - 2:
            if not INSIDE_OUTSIDE:
                mean = math.sqrt(math.pi) / math.sqrt(DIMS[l])
                w = mean + 0.0001 * jax.random.normal(kw, (out_dim, in_dim), jnp.float32)
                b = jnp.full((out_dim,), -BIAS, jnp.float32)
            else:
                mean = -math.sqrt(math.pi) / math.sqrt(DIMS[l])
                w = mean + 0.0001 * jax.random.normal(kw, (out_dim, in_dim), jnp.float32)
                b = jnp.full((out_dim,), BIAS, jnp.float32)
        else:
            std = math.sqrt(2.0) / math.sqrt(out_dim)
            w = std * jax.random.normal(kw, (out_dim, in_dim), jnp.float32)
            b = jnp.zeros((out_dim,), jnp.float32)
        params.append((w, b))
    return params


def pack_params(params):
    """Pack / pad weights for the feature-major fused kernel.

    Returns:
      w_in        (64, 8)  bf16 : rows 0..31 = lin0 weight (input cols padded 3->8),
                                  rows 32..63 = skip branch on the raw input,
                                  i.e. lin4.weight[:, 29:] / sqrt(2).
      w_stack     (7,32,32) bf16: lin1..lin7; lin3 output rows padded 29->32;
                                  lin4 = lin4.weight[:, :29]/sqrt(2), cols 29..31 zero.
      w_last      (8, 32)  bf16 : lin8, output rows padded 4->8.
      b100_stack  (8, 32, 1) f32: 100 * bias for lin0..lin7 (lin3 zero-padded).
      b_last      (8, 1)   f32 : lin8 bias, padded 4->8.
    """
    inv_sqrt2 = 1.0 / math.sqrt(2.0)
    ws = [w for (w, _) in params]
    bs = [b for (_, b) in params]

    # lin0: (32, 3) -> (32, 8), zero-padded input columns
    w_first = jnp.zeros((D_HIDDEN, D_IN_PAD), jnp.float32).at[:, :D_IN].set(ws[0])
    # skip branch acting on the raw input: lin4 cols[29:32] * 1/sqrt(2) -> (32, 8)
    w_skip = jnp.zeros((D_HIDDEN, D_IN_PAD), jnp.float32).at[:, :D_IN].set(
        ws[SKIP_L][:, D_SKIP_HID:] * inv_sqrt2)
    w_in = jnp.concatenate([w_first, w_skip], axis=0).astype(COMPUTE_DTYPE)  # (64, 8)

    # lin1..lin7, each shaped (32, 32)
    hidden = []
    for l in range(1, N_LIN - 1):
        w = ws[l]
        if l == SKIP_L - 1:
            # out_dim = 29 -> pad output rows to 32 (bias padded below)
            w = jnp.zeros((D_HIDDEN, D_HIDDEN), jnp.float32).at[:D_SKIP_HID, :].set(w)
        elif l == SKIP_L:
            # split skip-concat matmul: hidden part = cols[:29] * 1/sqrt(2);
            # cols 29..31 stay exactly zero so the padded (post-softplus) rows of x
            # contribute nothing.  (Invariant required by the padding scheme.)
            w = jnp.zeros((D_HIDDEN, D_HIDDEN), jnp.float32).at[:, :D_SKIP_HID].set(
                w[:, :D_SKIP_HID] * inv_sqrt2)
        hidden.append(w)
    w_stack = jnp.stack(hidden).astype(COMPUTE_DTYPE)                 # (7, 32, 32)

    # lin8: (4, 32) -> (8, 32), zero-padded output rows
    w_last = (jnp.zeros((D_OUT_PAD, D_HIDDEN), jnp.float32)
              .at[:D_OUT, :].set(ws[N_LIN - 1]).astype(COMPUTE_DTYPE))

    # biases lin0..lin7, pre-scaled by 100 (softplus beta) -> (8, 32, 1) f32
    b_list = []
    for l in range(N_LIN - 1):
        b = bs[l]
        if b.shape[0] < D_HIDDEN:
            b = jnp.pad(b, (0, D_HIDDEN - b.shape[0]))
        b_list.append((100.0 * b).reshape(D_HIDDEN, 1))
    b100_stack = jnp.stack(b_list)                                    # (8, 32, 1)
    b_last = jnp.zeros((D_OUT_PAD, 1), jnp.float32).at[:D_OUT, 0].set(bs[N_LIN - 1])

    return w_in, w_stack, w_last, b100_stack, b_last


# ------------------------------ Pallas kernel --------------------------------
def _softplus_beta100(y, b100):
    # torch.nn.Softplus(beta=100, threshold=20) applied to (y + b):
    #   bx = 100*(y + b);  out = bx/100 if bx > 20 else log1p(exp(bx))/100
    bx = y * 100.0 + b100
    soft = jnp.log1p(jnp.exp(jnp.minimum(bx, 20.0)))
    return jnp.where(bx > 20.0, bx, soft) * 0.01


def mlp_kernel(x_ref, w_in_ref, w_stack_ref, w_last_ref, b100_ref, b_last_ref, out_ref):
    inp = x_ref[...].astype(COMPUTE_DTYPE)                          # (8, TN), rows 3..7 zero

    # lin0 + skip branch fused into one K=8 matmul: (64, 8) @ (8, TN)
    h0 = jnp.dot(w_in_ref[...], inp, preferred_element_type=jnp.float32)  # (64, TN) f32
    skip_pre = h0[D_HIDDEN:, :]                                     # (32, TN), * 1/sqrt(2) folded
    x = _softplus_beta100(h0[:D_HIDDEN, :], b100_ref[0])            # (32, TN) f32

    # lin1 .. lin7 (skip-concat folded into a split matmul at l == SKIP_L)
    for s in range(N_HIDDEN_STACK):
        l = s + 1
        y = jnp.dot(w_stack_ref[s], x.astype(COMPUTE_DTYPE),
                    preferred_element_type=jnp.float32)
        if l == SKIP_L:
            y = y + skip_pre
        x = _softplus_beta100(y, b100_ref[l])

    # lin8 (no activation)
    out_ref[...] = (jnp.dot(w_last_ref[...], x.astype(COMPUTE_DTYPE),
                            preferred_element_type=jnp.float32)
                    + b_last_ref[...])


# ------------------------------ host wrappers ---------------------------------
def _pick_tile_n(n, max_tile=2048):
    """Multiple of 128, large enough to amortize per-step overhead, but small
    enough that the grid has >= 2 steps (feeds both v7x TensorCores) whenever
    there is enough work."""
    n128 = ((n + 127) // 128) * 128
    tile = min(max_tile, n128)
    if tile == n128 and n128 >= 256:
        tile = ((n128 // 2 + 127) // 128) * 128
    return max(tile, 128)


@functools.partial(jax.jit, static_argnames=("tile_n",))
def _forward(inputs, params, *, tile_n):
    n, d_in = inputs.shape
    assert d_in == D_IN
    w_in, w_stack, w_last, b100_stack, b_last = pack_params(params)

    # feature-major, lane-dense layout: (8, n_pad) with zero-padded rows/tail
    n_pad = ((n + tile_n - 1) // tile_n) * tile_n
    x_t = jnp.zeros((D_IN_PAD, n_pad), jnp.float32).at[:D_IN, :n].set(inputs.T)

    def full(shape):
        return pl.BlockSpec(shape, lambda i, _nd=len(shape): (0,) * _nd)

    cp_kwargs = dict(dimension_semantics=("parallel",))
    if tile_n >= 4096:
        # only needed for very large tiles (v5e scoped-VMEM default is 16 MiB)
        cp_kwargs["vmem_limit_bytes"] = 32 * 1024 * 1024

    out_t = pl.pallas_call(
        mlp_kernel,
        out_shape=jax.ShapeDtypeStruct((D_OUT_PAD, n_pad), jnp.float32),
        grid=(n_pad // tile_n,),
        in_specs=[
            pl.BlockSpec((D_IN_PAD, tile_n), lambda i: (0, i)),   # points (feature-major)
            full(w_in.shape),                                     # (64, 8)   bf16
            full(w_stack.shape),                                  # (7,32,32) bf16
            full(w_last.shape),                                   # (8, 32)   bf16
            full(b100_stack.shape),                               # (8, 32, 1) f32
            full(b_last.shape),                                   # (8, 1)    f32
        ],
        out_specs=pl.BlockSpec((D_OUT_PAD, tile_n), lambda i: (0, i)),
        compiler_params=pltpu.CompilerParams(**cp_kwargs),
    )(x_t, w_in, w_stack, w_last, b100_stack, b_last)

    # TODO(synk): if the surrounding model keeps points feature-major, return
    # out_t directly and skip both transposes.
    return out_t[:D_OUT, :n].T


def canonical_mlp_forward(inputs, params, *, tile_n=None, max_tile=2048):
    """inputs: (N, 3) float32 -> (N, 4) float32."""
    if tile_n is None:
        tile_n = _pick_tile_n(inputs.shape[0], max_tile=max_tile)
    return _forward(inputs, params, tile_n=int(tile_n))


# ----------------------------- references ------------------------------------
def reference_forward(inputs, params):
    """Pure-f32 reference matching the PyTorch module semantics."""
    inv_sqrt2 = 1.0 / math.sqrt(2.0)
    x = inputs
    for l, (w, b) in enumerate(params):
        if l in SKIP_IN:
            x = jnp.concatenate([x, inputs], axis=1) * inv_sqrt2
        x = x @ w.T + b
        if l < N_LIN - 1:
            bx = 100.0 * x
            x = jnp.where(bx > 20.0, x, jnp.log1p(jnp.exp(jnp.minimum(bx, 20.0))) / 100.0)
    return x


def reference_forward_matched(inputs, params):
    """Pure-JAX reference mirroring the kernel numerics exactly: bf16 matmul
    operands / f32 accumulation, skip folded into a split matmul with 1/sqrt(2)
    baked into the (bf16-rounded) weights, biases applied as 100*b inside the
    softplus rescale."""
    inv_sqrt2 = 1.0 / math.sqrt(2.0)
    bf = lambda a: a.astype(COMPUTE_DTYPE)

    def act(y, b):
        bx = y * 100.0 + b * 100.0
        soft = jnp.log1p(jnp.exp(jnp.minimum(bx, 20.0)))
        return jnp.where(bx > 20.0, bx, soft) * 0.01

    inp_b = bf(inputs)
    x = inputs
    for l, (w, b) in enumerate(params):
        if l == SKIP_L:
            wa = bf(w[:, :D_SKIP_HID] * inv_sqrt2)
            wsk = bf(w[:, D_SKIP_HID:] * inv_sqrt2)
            y = (jnp.dot(bf(x), wa.T, preferred_element_type=jnp.float32)
                 + jnp.dot(inp_b, wsk.T, preferred_element_type=jnp.float32))
        else:
            y = jnp.dot(bf(x), bf(w).T, preferred_element_type=jnp.float32)
        if l < N_LIN - 1:
            x = act(y, b)
        else:
            x = y + b
    return x


# ----------------------------------- main ------------------------------------
if __name__ == "__main__":
    key = jax.random.PRNGKey(0)
    k_params, k_x = jax.random.split(key)

    params = init_params(k_params)
    n_points = 1024
    inputs = jax.random.normal(k_x, (n_points, D_IN), jnp.float32)

    out = canonical_mlp_forward(inputs, params)      # auto tile_n=512 -> grid of 2
    out = jax.block_until_ready(out)
    assert out.shape == (n_points, D_OUT)

    # Tight check vs a reference using the same bf16-operand / f32-accumulate recipe.
    matched = reference_forward_matched(inputs, params)
    assert jnp.allclose(out, matched, atol=1e-4, rtol=1e-4), "mismatch vs bf16-matched reference"

    # Loose sanity check vs the pure-f32 module semantics (bf16 operand drift only).
    ref32 = reference_forward(inputs, params)
    max_err = float(jnp.max(jnp.abs(out - ref32)))
    assert max_err < 0.25, f"bf16 drift vs f32 reference too large: {max_err}"

    print("KERNEL_OK")
</pallas_src>

<mosaic_0001>
module attributes {stable_mosaic.version = 11 : i64} {
  func.func @mlp_kernel(%arg0: i32, %arg1: memref<8x512xf32, #tpu.memory_space<vmem>>, %arg2: memref<64x8xbf16, #tpu.memory_space<vmem>>, %arg3: memref<7x32x32xbf16, #tpu.memory_space<vmem>>, %arg4: memref<8x32xbf16, #tpu.memory_space<vmem>>, %arg5: memref<8x32x1xf32, #tpu.memory_space<vmem>>, %arg6: memref<8x1xf32, #tpu.memory_space<vmem>>, %arg7: memref<8x512xf32, #tpu.memory_space<vmem>>) attributes {dimension_semantics = [#tpu.dimension_semantics<parallel>], iteration_bounds = array<i64: 2>, scalar_prefetch = 0 : i64, scratch_operands = 0 : i64, tpu.core_type = #tpu.core_type<tc>, window_params = [{transform_indices = @transform_0, window_bounds = array<i64: 8, 512>}, {pipeline_mode = #tpu.pipeline_mode<synchronous>, transform_indices = @transform_1, window_bounds = array<i64: 64, 8>}, {pipeline_mode = #tpu.pipeline_mode<synchronous>, transform_indices = @transform_2, window_bounds = array<i64: 7, 32, 32>}, {pipeline_mode = #tpu.pipeline_mode<synchronous>, transform_indices = @transform_3, window_bounds = array<i64: 8, 32>}, {pipeline_mode = #tpu.pipeline_mode<synchronous>, transform_indices = @transform_4, window_bounds = array<i64: 8, 32, 1>}, {pipeline_mode = #tpu.pipeline_mode<synchronous>, transform_indices = @transform_5, window_bounds = array<i64: 8, 1>}, {transform_indices = @transform_6, window_bounds = array<i64: 8, 512>}]} {
    %c0 = arith.constant 0 : index
    %c0_0 = arith.constant 0 : index
    %0 = vector.load %arg1[%c0, %c0_0] : memref<8x512xf32, #tpu.memory_space<vmem>>, vector<8x512xf32>
    %1 = arith.truncf %0 : vector<8x512xf32> to vector<8x512xbf16>
    %c0_1 = arith.constant 0 : index
    %c0_2 = arith.constant 0 : index
    %2 = vector.load %arg2[%c0_1, %c0_2] : memref<64x8xbf16, #tpu.memory_space<vmem>>, vector<64x8xbf16>
    %cst = arith.constant dense<0.000000e+00> : vector<64x512xf32>
    %3 = tpu.matmul %2, %1, %cst {dimension_numbers = #tpu.dot_dimension_numbers<[1], [0], [0], [1], [0, 0, 1, 1], [], []>} : vector<64x8xbf16>, vector<8x512xbf16>, vector<64x512xf32> -> vector<64x512xf32>
    %4 = vector.extract_strided_slice %3 {offsets = [32, 0], sizes = [32, 512], strides = [1, 1]} : vector<64x512xf32> to vector<32x512xf32>
    %5 = vector.extract_strided_slice %3 {offsets = [0, 0], sizes = [32, 512], strides = [1, 1]} : vector<64x512xf32> to vector<32x512xf32>
    %c0_3 = arith.constant 0 : index
    %c0_4 = arith.constant 0 : index
    %c0_5 = arith.constant 0 : index
    %6 = vector.load %arg5[%c0_3, %c0_4, %c0_5] : memref<8x32x1xf32, #tpu.memory_space<vmem>>, vector<1x32x1xf32>
    %7 = vector.shape_cast %6 : vector<1x32x1xf32> to vector<32x1xf32>
    %cst_6 = arith.constant 1.000000e+02 : f32
    %8 = vector.broadcast %cst_6 : f32 to vector<32x512xf32>
    %9 = arith.mulf %5, %8 : vector<32x512xf32>
    %10 = vector.broadcast %7 : vector<32x1xf32> to vector<32x512xf32>
    %11 = arith.addf %9, %10 : vector<32x512xf32>
    %cst_7 = arith.constant 2.000000e+01 : f32
    %12 = vector.broadcast %cst_7 : f32 to vector<32x512xf32>
    %13 = arith.minimumf %11, %12 : vector<32x512xf32>
    %14 = math.exp %13 : vector<32x512xf32>
    %15 = math.log1p %14 : vector<32x512xf32>
    %cst_8 = arith.constant 2.000000e+01 : f32
    %16 = vector.broadcast %cst_8 : f32 to vector<32x512xf32>
    %17 = arith.cmpf ogt, %11, %16 : vector<32x512xf32>
    %18 = arith.select %17, %11, %15 : vector<32x512xi1>, vector<32x512xf32>
    %cst_9 = arith.constant 0.00999999977 : f32
    %19 = vector.broadcast %cst_9 : f32 to vector<32x512xf32>
    %20 = arith.mulf %18, %19 : vector<32x512xf32>
    %c0_10 = arith.constant 0 : index
    %c0_11 = arith.constant 0 : index
    %c0_12 = arith.constant 0 : index
    %21 = vector.load %arg3[%c0_10, %c0_11, %c0_12] : memref<7x32x32xbf16, #tpu.memory_space<vmem>>, vector<1x32x32xbf16>
    %22 = vector.shape_cast %21 : vector<1x32x32xbf16> to vector<32x32xbf16>
    %23 = arith.truncf %20 : vector<32x512xf32> to vector<32x512xbf16>
    %cst_13 = arith.constant dense<0.000000e+00> : vector<32x512xf32>
    %24 = tpu.matmul %22, %23, %cst_13 {dimension_numbers = #tpu.dot_dimension_numbers<[1], [0], [0], [1], [0, 0, 1, 1], [], []>} : vector<32x32xbf16>, vector<32x512xbf16>, vector<32x512xf32> -> vector<32x512xf32>
    %c1 = arith.constant 1 : index
    %c0_14 = arith.constant 0 : index
    %c0_15 = arith.constant 0 : index
    %25 = vector.load %arg5[%c1, %c0_14, %c0_15] : memref<8x32x1xf32, #tpu.memory_space<vmem>>, vector<1x32x1xf32>
    %26 = vector.shape_cast %25 : vector<1x32x1xf32> to vector<32x1xf32>
    %cst_16 = arith.constant 1.000000e+02 : f32
    %27 = vector.broadcast %cst_16 : f32 to vector<32x512xf32>
    %28 = arith.mulf %24, %27 : vector<32x512xf32>
    %29 = vector.broadcast %26 : vector<32x1xf32> to vector<32x512xf32>
    %30 = arith.addf %28, %29 : vector<32x512xf32>
    %cst_17 = arith.constant 2.000000e+01 : f32
    %31 = vector.broadcast %cst_17 : f32 to vector<32x512xf32>
    %32 = arith.minimumf %30, %31 : vector<32x512xf32>
    %33 = math.exp %32 : vector<32x512xf32>
    %34 = math.log1p %33 : vector<32x512xf32>
    %cst_18 = arith.constant 2.000000e+01 : f32
    %35 = vector.broadcast %cst_18 : f32 to vector<32x512xf32>
    %36 = arith.cmpf ogt, %30, %35 : vector<32x512xf32>
    %37 = arith.select %36, %30, %34 : vector<32x512xi1>, vector<32x512xf32>
    %cst_19 = arith.constant 0.00999999977 : f32
    %38 = vector.broadcast %cst_19 : f32 to vector<32x512xf32>
    %39 = arith.mulf %37, %38 : vector<32x512xf32>
    %c1_20 = arith.constant 1 : index
    %c0_21 = arith.constant 0 : index
    %c0_22 = arith.constant 0 : index
    %40 = vector.load %arg3[%c1_20, %c0_21, %c0_22] : memref<7x32x32xbf16, #tpu.memory_space<vmem>>, vector<1x32x32xbf16>
    %41 = vector.shape_cast %40 : vector<1x32x32xbf16> to vector<32x32xbf16>
    %42 = arith.truncf %39 : vector<32x512xf32> to vector<32x512xbf16>
    %cst_23 = arith.constant dense<0.000000e+00> : vector<32x512xf32>
    %43 = tpu.matmul %41, %42, %cst_23 {dimension_numbers = #tpu.dot_dimension_numbers<[1], [0], [0], [1], [0, 0, 1, 1], [], []>} : vector<32x32xbf16>, vector<32x512xbf16>, vector<32x512xf32> -> vector<32x512xf32>
    %c2 = arith.constant 2 : index
    %c0_24 = arith.constant 0 : index
    %c0_25 = arith.constant 0 : index
    %44 = vector.load %arg5[%c2, %c0_24, %c0_25] : memref<8x32x1xf32, #tpu.memory_space<vmem>>, vector<1x32x1xf32>
    %45 = vector.shape_cast %44 : vector<1x32x1xf32> to vector<32x1xf32>
    %cst_26 = arith.constant 1.000000e+02 : f32
    %46 = vector.broadcast %cst_26 : f32 to vector<32x512xf32>
    %47 = arith.mulf %43, %46 : vector<32x512xf32>
    %48 = vector.broadcast %45 : vector<32x1xf32> to vector<32x512xf32>
    %49 = arith.addf %47, %48 : vector<32x512xf32>
    %cst_27 = arith.constant 2.000000e+01 : f32
    %50 = vector.broadcast %cst_27 : f32 to vector<32x512xf32>
    %51 = arith.minimumf %49, %50 : vector<32x512xf32>
    %52 = math.exp %51 : vector<32x512xf32>
    %53 = math.log1p %52 : vector<32x512xf32>
    %cst_28 = arith.constant 2.000000e+01 : f32
    %54 = vector.broadcast %cst_28 : f32 to vector<32x512xf32>
    %55 = arith.cmpf ogt, %49, %54 : vector<32x512xf32>
    %56 = arith.select %55, %49, %53 : vector<32x512xi1>, vector<32x512xf32>
    %cst_29 = arith.constant 0.00999999977 : f32
    %57 = vector.broadcast %cst_29 : f32 to vector<32x512xf32>
    %58 = arith.mulf %56, %57 : vector<32x512xf32>
    %c2_30 = arith.constant 2 : index
    %c0_31 = arith.constant 0 : index
    %c0_32 = arith.constant 0 : index
    %59 = vector.load %arg3[%c2_30, %c0_31, %c0_32] : memref<7x32x32xbf16, #tpu.memory_space<vmem>>, vector<1x32x32xbf16>
    %60 = vector.shape_cast %59 : vector<1x32x32xbf16> to vector<32x32xbf16>
    %61 = arith.truncf %58 : vector<32x512xf32> to vector<32x512xbf16>
    %cst_33 = arith.constant dense<0.000000e+00> : vector<32x512xf32>
    %62 = tpu.matmul %60, %61, %cst_33 {dimension_numbers = #tpu.dot_dimension_numbers<[1], [0], [0], [1], [0, 0, 1, 1], [], []>} : vector<32x32xbf16>, vector<32x512xbf16>, vector<32x512xf32> -> vector<32x512xf32>
    %c3 = arith.constant 3 : index
    %c0_34 = arith.constant 0 : index
    %c0_35 = arith.constant 0 : index
    %63 = vector.load %arg5[%c3, %c0_34, %c0_35] : memref<8x32x1xf32, #tpu.memory_space<vmem>>, vector<1x32x1xf32>
    %64 = vector.shape_cast %63 : vector<1x32x1xf32> to vector<32x1xf32>
    %cst_36 = arith.constant 1.000000e+02 : f32
    %65 = vector.broadcast %cst_36 : f32 to vector<32x512xf32>
    %66 = arith.mulf %62, %65 : vector<32x512xf32>
    %67 = vector.broadcast %64 : vector<32x1xf32> to vector<32x512xf32>
    %68 = arith.addf %66, %67 : vector<32x512xf32>
    %cst_37 = arith.constant 2.000000e+01 : f32
    %69 = vector.broadcast %cst_37 : f32 to vector<32x512xf32>
    %70 = arith.minimumf %68, %69 : vector<32x512xf32>
    %71 = math.exp %70 : vector<32x512xf32>
    %72 = math.log1p %71 : vector<32x512xf32>
    %cst_38 = arith.constant 2.000000e+01 : f32
    %73 = vector.broadcast %cst_38 : f32 to vector<32x512xf32>
    %74 = arith.cmpf ogt, %68, %73 : vector<32x512xf32>
    %75 = arith.select %74, %68, %72 : vector<32x512xi1>, vector<32x512xf32>
    %cst_39 = arith.constant 0.00999999977 : f32
    %76 = vector.broadcast %cst_39 : f32 to vector<32x512xf32>
    %77 = arith.mulf %75, %76 : vector<32x512xf32>
    %c3_40 = arith.constant 3 : index
    %c0_41 = arith.constant 0 : index
    %c0_42 = arith.constant 0 : index
    %78 = vector.load %arg3[%c3_40, %c0_41, %c0_42] : memref<7x32x32xbf16, #tpu.memory_space<vmem>>, vector<1x32x32xbf16>
    %79 = vector.shape_cast %78 : vector<1x32x32xbf16> to vector<32x32xbf16>
    %80 = arith.truncf %77 : vector<32x512xf32> to vector<32x512xbf16>
    %cst_43 = arith.constant dense<0.000000e+00> : vector<32x512xf32>
    %81 = tpu.matmul %79, %80, %cst_43 {dimension_numbers = #tpu.dot_dimension_numbers<[1], [0], [0], [1], [0, 0, 1, 1], [], []>} : vector<32x32xbf16>, vector<32x512xbf16>, vector<32x512xf32> -> vector<32x512xf32>
    %82 = arith.addf %81, %4 : vector<32x512xf32>
    %c4 = arith.constant 4 : index
    %c0_44 = arith.constant 0 : index
    %c0_45 = arith.constant 0 : index
    %83 = vector.load %arg5[%c4, %c0_44, %c0_45] : memref<8x32x1xf32, #tpu.memory_space<vmem>>, vector<1x32x1xf32>
    %84 = vector.shape_cast %83 : vector<1x32x1xf32> to vector<32x1xf32>
    %cst_46 = arith.constant 1.000000e+02 : f32
    %85 = vector.broadcast %cst_46 : f32 to vector<32x512xf32>
    %86 = arith.mulf %82, %85 : vector<32x512xf32>
    %87 = vector.broadcast %84 : vector<32x1xf32> to vector<32x512xf32>
    %88 = arith.addf %86, %87 : vector<32x512xf32>
    %cst_47 = arith.constant 2.000000e+01 : f32
    %89 = vector.broadcast %cst_47 : f32 to vector<32x512xf32>
    %90 = arith.minimumf %88, %89 : vector<32x512xf32>
    %91 = math.exp %90 : vector<32x512xf32>
    %92 = math.log1p %91 : vector<32x512xf32>
    %cst_48 = arith.constant 2.000000e+01 : f32
    %93 = vector.broadcast %cst_48 : f32 to vector<32x512xf32>
    %94 = arith.cmpf ogt, %88, %93 : vector<32x512xf32>
    %95 = arith.select %94, %88, %92 : vector<32x512xi1>, vector<32x512xf32>
    %cst_49 = arith.constant 0.00999999977 : f32
    %96 = vector.broadcast %cst_49 : f32 to vector<32x512xf32>
    %97 = arith.mulf %95, %96 : vector<32x512xf32>
    %c4_50 = arith.constant 4 : index
    %c0_51 = arith.constant 0 : index
    %c0_52 = arith.constant 0 : index
    %98 = vector.load %arg3[%c4_50, %c0_51, %c0_52] : memref<7x32x32xbf16, #tpu.memory_space<vmem>>, vector<1x32x32xbf16>
    %99 = vector.shape_cast %98 : vector<1x32x32xbf16> to vector<32x32xbf16>
    %100 = arith.truncf %97 : vector<32x512xf32> to vector<32x512xbf16>
    %cst_53 = arith.constant dense<0.000000e+00> : vector<32x512xf32>
    %101 = tpu.matmul %99, %100, %cst_53 {dimension_numbers = #tpu.dot_dimension_numbers<[1], [0], [0], [1], [0, 0, 1, 1], [], []>} : vector<32x32xbf16>, vector<32x512xbf16>, vector<32x512xf32> -> vector<32x512xf32>
    %c5 = arith.constant 5 : index
    %c0_54 = arith.constant 0 : index
    %c0_55 = arith.constant 0 : index
    %102 = vector.load %arg5[%c5, %c0_54, %c0_55] : memref<8x32x1xf32, #tpu.memory_space<vmem>>, vector<1x32x1xf32>
    %103 = vector.shape_cast %102 : vector<1x32x1xf32> to vector<32x1xf32>
    %cst_56 = arith.constant 1.000000e+02 : f32
    %104 = vector.broadcast %cst_56 : f32 to vector<32x512xf32>
    %105 = arith.mulf %101, %104 : vector<32x512xf32>
    %106 = vector.broadcast %103 : vector<32x1xf32> to vector<32x512xf32>
    %107 = arith.addf %105, %106 : vector<32x512xf32>
    %cst_57 = arith.constant 2.000000e+01 : f32
    %108 = vector.broadcast %cst_57 : f32 to vector<32x512xf32>
    %109 = arith.minimumf %107, %108 : vector<32x512xf32>
    %110 = math.exp %109 : vector<32x512xf32>
    %111 = math.log1p %110 : vector<32x512xf32>
    %cst_58 = arith.constant 2.000000e+01 : f32
    %112 = vector.broadcast %cst_58 : f32 to vector<32x512xf32>
    %113 = arith.cmpf ogt, %107, %112 : vector<32x512xf32>
    %114 = arith.select %113, %107, %111 : vector<32x512xi1>, vector<32x512xf32>
    %cst_59 = arith.constant 0.00999999977 : f32
    %115 = vector.broadcast %cst_59 : f32 to vector<32x512xf32>
    %116 = arith.mulf %114, %115 : vector<32x512xf32>
    %c5_60 = arith.constant 5 : index
    %c0_61 = arith.constant 0 : index
    %c0_62 = arith.constant 0 : index
    %117 = vector.load %arg3[%c5_60, %c0_61, %c0_62] : memref<7x32x32xbf16, #tpu.memory_space<vmem>>, vector<1x32x32xbf16>
    %118 = vector.shape_cast %117 : vector<1x32x32xbf16> to vector<32x32xbf16>
    %119 = arith.truncf %116 : vector<32x512xf32> to vector<32x512xbf16>
    %cst_63 = arith.constant dense<0.000000e+00> : vector<32x512xf32>
    %120 = tpu.matmul %118, %119, %cst_63 {dimension_numbers = #tpu.dot_dimension_numbers<[1], [0], [0], [1], [0, 0, 1, 1], [], []>} : vector<32x32xbf16>, vector<32x512xbf16>, vector<32x512xf32> -> vector<32x512xf32>
    %c6 = arith.constant 6 : index
    %c0_64 = arith.constant 0 : index
    %c0_65 = arith.constant 0 : index
    %121 = vector.load %arg5[%c6, %c0_64, %c0_65] : memref<8x32x1xf32, #tpu.memory_space<vmem>>, vector<1x32x1xf32>
    %122 = vector.shape_cast %121 : vector<1x32x1xf32> to vector<32x1xf32>
    %cst_66 = arith.constant 1.000000e+02 : f32
    %123 = vector.broadcast %cst_66 : f32 to vector<32x512xf32>
    %124 = arith.mulf %120, %123 : vector<32x512xf32>
    %125 = vector.broadcast %122 : vector<32x1xf32> to vector<32x512xf32>
    %126 = arith.addf %124, %125 : vector<32x512xf32>
    %cst_67 = arith.constant 2.000000e+01 : f32
    %127 = vector.broadcast %cst_67 : f32 to vector<32x512xf32>
    %128 = arith.minimumf %126, %127 : vector<32x512xf32>
    %129 = math.exp %128 : vector<32x512xf32>
    %130 = math.log1p %129 : vector<32x512xf32>
    %cst_68 = arith.constant 2.000000e+01 : f32
    %131 = vector.broadcast %cst_68 : f32 to vector<32x512xf32>
    %132 = arith.cmpf ogt, %126, %131 : vector<32x512xf32>
    %133 = arith.select %132, %126, %130 : vector<32x512xi1>, vector<32x512xf32>
    %cst_69 = arith.constant 0.00999999977 : f32
    %134 = vector.broadcast %cst_69 : f32 to vector<32x512xf32>
    %135 = arith.mulf %133, %134 : vector<32x512xf32>
    %c6_70 = arith.constant 6 : index
    %c0_71 = arith.constant 0 : index
    %c0_72 = arith.constant 0 : index
    %136 = vector.load %arg3[%c6_70, %c0_71, %c0_72] : memref<7x32x32xbf16, #tpu.memory_space<vmem>>, vector<1x32x32xbf16>
    %137 = vector.shape_cast %136 : vector<1x32x32xbf16> to vector<32x32xbf16>
    %138 = arith.truncf %135 : vector<32x512xf32> to vector<32x512xbf16>
    %cst_73 = arith.constant dense<0.000000e+00> : vector<32x512xf32>
    %139 = tpu.matmul %137, %138, %cst_73 {dimension_numbers = #tpu.dot_dimension_numbers<[1], [0], [0], [1], [0, 0, 1, 1], [], []>} : vector<32x32xbf16>, vector<32x512xbf16>, vector<32x512xf32> -> vector<32x512xf32>
    %c7 = arith.constant 7 : index
    %c0_74 = arith.constant 0 : index
    %c0_75 = arith.constant 0 : index
    %140 = vector.load %arg5[%c7, %c0_74, %c0_75] : memref<8x32x1xf32, #tpu.memory_space<vmem>>, vector<1x32x1xf32>
    %141 = vector.shape_cast %140 : vector<1x32x1xf32> to vector<32x1xf32>
    %cst_76 = arith.constant 1.000000e+02 : f32
    %142 = vector.broadcast %cst_76 : f32 to vector<32x512xf32>
    %143 = arith.mulf %139, %142 : vector<32x512xf32>
    %144 = vector.broadcast %141 : vector<32x1xf32> to vector<32x512xf32>
    %145 = arith.addf %143, %144 : vector<32x512xf32>
    %cst_77 = arith.constant 2.000000e+01 : f32
    %146 = vector.broadcast %cst_77 : f32 to vector<32x512xf32>
    %147 = arith.minimumf %145, %146 : vector<32x512xf32>
    %148 = math.exp %147 : vector<32x512xf32>
    %149 = math.log1p %148 : vector<32x512xf32>
    %cst_78 = arith.constant 2.000000e+01 : f32
    %150 = vector.broadcast %cst_78 : f32 to vector<32x512xf32>
    %151 = arith.cmpf ogt, %145, %150 : vector<32x512xf32>
    %152 = arith.select %151, %145, %149 : vector<32x512xi1>, vector<32x512xf32>
    %cst_79 = arith.constant 0.00999999977 : f32
    %153 = vector.broadcast %cst_79 : f32 to vector<32x512xf32>
    %154 = arith.mulf %152, %153 : vector<32x512xf32>
    %c0_80 = arith.constant 0 : index
    %c0_81 = arith.constant 0 : index
    %155 = vector.load %arg4[%c0_80, %c0_81] : memref<8x32xbf16, #tpu.memory_space<vmem>>, vector<8x32xbf16>
    %156 = arith.truncf %154 : vector<32x512xf32> to vector<32x512xbf16>
    %cst_82 = arith.constant dense<0.000000e+00> : vector<8x512xf32>
    %157 = tpu.matmul %155, %156, %cst_82 {dimension_numbers = #tpu.dot_dimension_numbers<[1], [0], [0], [1], [0, 0, 1, 1], [], []>} : vector<8x32xbf16>, vector<32x512xbf16>, vector<8x512xf32> -> vector<8x512xf32>
    %c0_83 = arith.constant 0 : index
    %c0_84 = arith.constant 0 : index
    %158 = vector.load %arg6[%c0_83, %c0_84] : memref<8x1xf32, #tpu.memory_space<vmem>>, vector<8x1xf32>
    %159 = vector.broadcast %158 : vector<8x1xf32> to vector<8x512xf32>
    %160 = arith.addf %157, %159 : vector<8x512xf32>
    %c0_85 = arith.constant 0 : index
    %c0_86 = arith.constant 0 : index
    %161 = vector.load %arg7[%c0_85, %c0_86] : memref<8x512xf32, #tpu.memory_space<vmem>>, vector<8x512xf32>
    tpu.vector_store %arg7[%c0_85, %c0_86], %160 {strides = array<i32>} : memref<8x512xf32, #tpu.memory_space<vmem>>, vector<8x512xf32>,
    return
  }
  func.func @transform_0(%arg0: i32) -> (i32, i32) {
    %c0_i32 = arith.constant 0 : i32
    %c0_i32_0 = arith.constant 0 : i32
    return %c0_i32, %arg0 : i32, i32
  }
  func.func @transform_1(%arg0: i32) -> (i32, i32) {
    %c0_i32 = arith.constant 0 : i32
    %c0_i32_0 = arith.constant 0 : i32
    %c0_i32_1 = arith.constant 0 : i32
    return %c0_i32, %c0_i32_0 : i32, i32
  }
  func.func @transform_2(%arg0: i32) -> (i32, i32, i32) {
    %c0_i32 = arith.constant 0 : i32
    %c0_i32_0 = arith.constant 0 : i32
    %c0_i32_1 = arith.constant 0 : i32
    %c0_i32_2 = arith.constant 0 : i32
    return %c0_i32, %c0_i32_0, %c0_i32_1 : i32, i32, i32
  }
  func.func @transform_3(%arg0: i32) -> (i32, i32) {
    %c0_i32 = arith.constant 0 : i32
    %c0_i32_0 = arith.constant 0 : i32
    %c0_i32_1 = arith.constant 0 : i32
    return %c0_i32, %c0_i32_0 : i32, i32
  }
  func.func @transform_4(%arg0: i32) -> (i32, i32, i32) {
    %c0_i32 = arith.constant 0 : i32
    %c0_i32_0 = arith.constant 0 : i32
    %c0_i32_1 = arith.constant 0 : i32
    %c0_i32_2 = arith.constant 0 : i32
    return %c0_i32, %c0_i32_0, %c0_i32_1 : i32, i32, i32
  }
  func.func @transform_5(%arg0: i32) -> (i32, i32) {
    %c0_i32 = arith.constant 0 : i32
    %c0_i32_0 = arith.constant 0 : i32
    %c0_i32_1 = arith.constant 0 : i32
    return %c0_i32, %c0_i32_0 : i32, i32
  }
  func.func @transform_6(%arg0: i32) -> (i32, i32) {
    %c0_i32 = arith.constant 0 : i32
    %c0_i32_0 = arith.constant 0 : i32
    return %c0_i32, %arg0 : i32, i32
  }
}

</mosaic_0001>

<bundles_post_ra>
// kernel: _forward.1
= control target key start
LH: loop header
LB: loop body
LE: loop exit
PB: predicated region body
PF: predicated region fallthrough
CT: control target
= control target key end

     0   :  { %s4666_s21 = smov 0   ;;  %s7225_s0 = inlined_call_operand.vmem [shape: f32[8,1024], index: 0, kind: input, shape index: {}]   ;;  %s7226_s1 = inlined_call_operand.vmem [shape: bf16[64,8], index: 1, kind: input, shape index: {}]   ;;  %s7227_s2 = inlined_call_operand.vmem [shape: bf16[7,32,32], index: 2, kind: input, shape index: {}]   ;;  %s7228_s3 = inlined_call_operand.vmem [shape: bf16[8,32], index: 3, kind: input, shape index: {}]   ;;  %s7229_s4 = inlined_call_operand.vmem [shape: f32[8,32,1], index: 4, kind: input, shape index: {}]   ;;  %s7230_s5 = inlined_call_operand.vmem [shape: f32[8,1], index: 5, kind: input, shape index: {}]   ;;  %s7231_s6 = inlined_call_operand.vmem [shape: f32[8,1024], index: 6, kind: output, shape index: {}]  }
   0x1 LB: > { %s3944_s22 = sadd.s32 4294967295, %s4628_s21   ;;  %p3948_p0 = scmp.ge.s32.totalorder %s4628_s21, 1  ;;  %s4628_s21 = sphi %s4666_s21, %s16_s21  }
   0x2   : > { %p213_p1 = scmp.lt.s32.totalorder %s4628_s21, 3 }
   0x4   : > { %p214_p2 = pnand %p3948_p0, %p213_p1 }
   0x5   : > { %s3949_s23 = sshll.u32 (!%p214_p2), %s3944_s22, 2  ;;  %v4630_v0 = vmov (!%p214_p2), 0   ;;  %v464_v1 = vld [vmem:[%s7229_s4] sm:$0xff] (!%p214_p2)  ;;  %v465_v2 = vld [vmem:[%s7229_s4 + $0x8] sm:$0xff] (!%p214_p2)  ;;  %v466_v3 = vld [vmem:[%s7229_s4 + $0x10] sm:$0xff] (!%p214_p2)  ;;  %vm305_vm0 = vcmask (!%p214_p2), 1043456  }
   0x6   : > { %217 = sbr.rel (%p214_p2) target bundleno = 2567 (0xa07), region = 44  ;;  %p244_p3 = scmp.lt.s32.totalorder (!%p214_p2), %s3949_s23, 7  ;;  %350 = vmatprep.mubr.bf16.mxu0 (!%p214_p2), %v4630_v0  ;;  %423 = vmatprep.mubr.bf16.mxu1 (!%p214_p2), %v4630_v0  ;;  %v467_v4 = vld [vmem:[%s7229_s4 + $0x18] sm:$0xff] (!%p214_p2)  ;;  %v3973_v12 = vld [vmem:[%s7229_s4 + $0x20] sm:$0xff] (!%p214_p2)  ;;  %v3974_v16 = vld [vmem:[%s7229_s4 + $0x28] sm:$0xff] (!%p214_p2)  ;;  %vm292_vm1 = vcmask (!%p214_p2), 64512  }
   0x7   : > { %4090 = vset.pattern.permute.xlu0 (!%p214_p2), %v4630_v0  ;;  %4091 = vset.pattern.permute.xlu1 (!%p214_p2), %v4630_v0  ;;  %v4092_v15 = vld [vmem:[%s7226_s1] sm:$0xff] (!%p214_p2)   ;;  %v3975_v18 = vld [vmem:[%s7229_s4 + $0x30] sm:$0xff] (!%p214_p2)  ;;  %v3976_v19 = vld [vmem:[%s7229_s4 + $0x38] sm:$0xff] (!%p214_p2) }
   0x8   : > { %486 = vperm.xlu0 (!%p214_p2), %4090, %v464_v1   ;;  %496 = vperm.xlu1 (!%p214_p2), %4091, %v466_v3   ;;  %v3987_v20 = vld [vmem:[%s7229_s4 + $0x40] sm:$0xff] (!%p214_p2)  ;;  %v4093_v21 = vld [vmem:[%s7226_s1 + $0x8] sm:$0xff] (!%p214_p2)   ;;  %v3989_v23 = vld [vmem:[%s7229_s4 + $0x50] sm:$0xff] (!%p214_p2) }
   0x9   : > { %v3988_v22 = vld [vmem:[%s7229_s4 + $0x48] sm:$0xff] (!%p214_p2)  ;;  %v3990_v24 = vld [vmem:[%s7229_s4 + $0x58] sm:$0xff] (!%p214_p2)  ;;  %v4001_v25 = vld [vmem:[%s7229_s4 + $0x60] sm:$0xff] (!%p214_p2) }
   0xa   : > { %v4002_v26 = vld [vmem:[%s7229_s4 + $0x68] sm:$0xff] (!%p214_p2)  ;;  %v4003_v27 = vld [vmem:[%s7229_s4 + $0x70] sm:$0xff] (!%p214_p2)  ;;  %v4004_v28 = vld [vmem:[%s7229_s4 + $0x78] sm:$0xff] (!%p214_p2) }
   0xb   : > { %v4015_v29 = vld [vmem:[%s7229_s4 + $0x80] sm:$0xff] (!%p214_p2)  ;;  %v4016_v30 = vld [vmem:[%s7229_s4 + $0x88] sm:$0xff] (!%p214_p2)  ;;  %v4017_v31 = vld [vmem:[%s7229_s4 + $0x90] sm:$0xff] (!%p214_p2) }
   0xc   : > { %491 = vperm.xlu0 (!%p214_p2), %4090, %v465_v2   ;;  %501 = vperm.xlu1 (!%p214_p2), %4091, %v467_v4   ;;  %v4018_v32 = vld [vmem:[%s7229_s4 + $0x98] sm:$0xff] (!%p214_p2)  ;;  %v4029_v33 = vld [vmem:[%s7229_s4 + $0xa0] sm:$0xff] (!%p214_p2)  ;;  %v4030_v34 = vld [vmem:[%s7229_s4 + $0xa8] sm:$0xff] (!%p214_p2) }
   0xd   : > { %s7413_s23 = smov (!%p244_p3, %s3949_s23), 7  ;;  %v4031_v35 = vld [vmem:[%s7229_s4 + $0xb0] sm:$0xff]  ;;  %v4032_v36 = vld [vmem:[%s7229_s4 + $0xb8] sm:$0xff]  ;;  %v4043_v37 = vld [vmem:[%s7229_s4 + $0xc0] sm:$0xff] }
   0xe   : > { %s3950_s30 = sshll.u32 %s7413_s23, 3  ;;  %v4044_v38 = vld [vmem:[%s7229_s4 + $0xc8] sm:$0xff]  ;;  %v4045_v39 = vld [vmem:[%s7229_s4 + $0xd0] sm:$0xff]  ;;  %v4046_v40 = vld [vmem:[%s7229_s4 + $0xd8] sm:$0xff] }
   0xf   : > { %s247_s9 = scalar_lea.vmem %s7225_s0, %s3950_s30  ;;  %v4057_v41 = vld [vmem:[%s7229_s4 + $0xe0] sm:$0xff]  ;;  %v4058_v42 = vld [vmem:[%s7229_s4 + $0xe8] sm:$0xff]  ;;  %v4059_v43 = vld [vmem:[%s7229_s4 + $0xf0] sm:$0xff]  ;;  %s253_s28 = scalar_lea.vmem %s7231_s6, %s3950_s30 }
  0x10   : > { %v257_v5 = vld [vmem:[%s247_s9 + $0x8] sm:$0xff]  ;;  %v259_v6 = vld [vmem:[%s247_s9 + $0x18] sm:$0xff]  ;;  %v256_v7 = vld [vmem:[%s247_s9] sm:$0xff]  ;;  %918 = vperm.xlu0 %4090, %v3973_v12   ;;  %923 = vperm.xlu1 %4091, %v3974_v16  }
  0x11   : > { %v261_v8 = vpack.c.bf16 %v257_v5, %v257_v5  ;;  %v263_v9 = vpack.c.bf16 %v259_v6, %v259_v6  ;;  %v260_v10 = vpack.c.bf16 %v256_v7, %v256_v7  ;;  %v258_v11 = vld [vmem:[%s247_s9 + $0x10] sm:$0xff]  ;;  %v4060_v44 = vld [vmem:[%s7229_s4 + $0xf8] sm:$0xff]  ;;  %v3793_v45 = vld [vmem:[%s7230_s5] sm:$0xff] }
  0x12   : > { %v262_v13 = vpack.c.bf16 %v258_v11, %v258_v11  ;;  %v4094_v46 = vld [vmem:[%s7226_s1 + $0x10] sm:$0xff]   ;;  %v4095_v47 = vld [vmem:[%s7226_s1 + $0x18] sm:$0xff]  }
  0x13   : > { %3957 = vmatprep.subr.msk.bf16.mxu0 %vm305_vm0, %v261_v8  ;;  %3962 = vmatprep.subr.msk.bf16.mxu1 %vm305_vm0, %v263_v9  ;;  %v307_v14 = vsel %vm305_vm0, %v260_v10, 0 }
  0x14   : > { %319 = vmatpush1.bf16.msra.mxu0 %v307_v14  ;;  %v313_v17 = vsel %vm305_vm0, %v262_v13, 0  ;;  %928 = vperm.xlu0 %4090, %v3975_v18  }
  0x15   : > { %392 = vmatpush1.bf16.msra.mxu1 %v313_v17  ;;  %933 = vperm.xlu1 %4091, %v3976_v19  }
  0x17   : > { %3958 = vmatmul.mubr.msk.bf16.vlgmr.msra.gmra.mrb[0].mxu0 %vm292_vm1, %v4092_v15 }
  0x18   : > { %3963 = vmatmul.mubr.msk.bf16.vlgmr.msra.gmra.mrb[0].mxu1 %vm292_vm1, %v4092_v15  ;;  %360 = vmatprep.mubr.bf16.mxu0 %v4630_v0 }
  0x19   : > { %433 = vmatprep.mubr.bf16.mxu1 %v4630_v0  ;;  %1350 = vperm.xlu0 %4090, %v3987_v20  }
  0x1a   : > { %1355 = vperm.xlu1 %4091, %v3988_v22  }
  0x1d   : > { %1360 = vperm.xlu0 %4090, %v3989_v23  }
  0x1e   : > { %1365 = vperm.xlu1 %4091, %v3990_v24  }
  0x1f   : > { %3959 = vmatmul.mubr.msk.bf16.gmra.mrb[4].mxu0 %vm292_vm1, %v4093_v21 }
  0x20   : > { %3964 = vmatmul.mubr.msk.bf16.gmra.mrb[4].mxu1 %vm292_vm1, %v4093_v21  ;;  %370 = vmatprep.mubr.bf16.mxu0 %v4630_v0 }
  0x21   : > { %443 = vmatprep.mubr.bf16.mxu1 %v4630_v0  ;;  %1782 = vperm.xlu0 %4090, %v4001_v25  }
  0x22   : > { %1787 = vperm.xlu1 %4091, %v4002_v26  }
  0x25   : > { %1792 = vperm.xlu0 %4090, %v4003_v27  }
  0x26   : > { %1797 = vperm.xlu1 %4091, %v4004_v28  }
  0x27   : > { %3960 = vmatmul.mubr.msk.bf16.gmra.mrb[8].mxu0 %vm292_vm1, %v4094_v46 }
  0x28   : > { %3965 = vmatmul.mubr.msk.bf16.gmra.mrb[8].mxu1 %vm292_vm1, %v4094_v46  ;;  %380 = vmatprep.mubr.bf16.mxu0 %v4630_v0 }
  0x29   : > { %2214 = vperm.xlu0 %4090, %v4015_v29   ;;  %453 = vmatprep.mubr.bf16.mxu1 %v4630_v0 }
  0x2a   : > { %2219 = vperm.xlu1 %4091, %v4016_v30  }
  0x2d   : > { %2224 = vperm.xlu0 %4090, %v4017_v31  }
  0x2e   : > { %2229 = vperm.xlu1 %4091, %v4018_v32  }
  0x2f   : > { %3961 = vmatmul.mubr.msk.bf16.gmra.mrb[12].mxu0 %vm292_vm1, %v4095_v47 }
  0x30   : > { %3966 = vmatmul.mubr.msk.bf16.gmra.mrb[12].mxu1 %vm292_vm1, %v4095_v47  ;;  %821 = vmatprep.mubr.bf16.mxu0 %v4630_v0 }
  0x31   : > { %2646 = vperm.xlu0 %4090, %v4029_v33   ;;  %874 = vmatprep.mubr.bf16.mxu1 %v4630_v0 }
  0x32   : > { %2651 = vperm.xlu1 %4091, %v4030_v34  }
  0x35   : > { %2656 = vperm.xlu0 %4090, %v4031_v35  }
  0x36   : > { %2661 = vperm.xlu1 %4091, %v4032_v36  }
  0x39   : > { %3078 = vperm.xlu0 %4090, %v4043_v37  }
  0x3a   : > { %3083 = vperm.xlu1 %4091, %v4044_v38  }
  0x3d   : > { %3088 = vperm.xlu0 %4090, %v4045_v39  }
  0x3e   : > { %3093 = vperm.xlu1 %4091, %v4046_v40  }
  0x41   : > { %3510 = vperm.xlu0 %4090, %v4057_v41  }
  0x42   : > { %3515 = vperm.xlu1 %4091, %v4058_v42  }
  0x45   : > { %3520 = vperm.xlu0 %4090, %v4059_v43  }
  0x46   : > { %3525 = vperm.xlu1 %4091, %v4060_v44  }
  0x49   : > { %3796 = vperm.xlu0 %4090, %v3793_v45  }
  0x87   : > { %v487_v48 = vpop.permute.xlu0 %486  ;;  %v497_v27 = vpop.permute.xlu1 %496 }
  0x8b   : > { %v492_v62 = vpop.permute.xlu0 %491 }
  0xea   : > { %v352_v49 = vpop.f32.mrb[0].mxu0 }
  0xeb   : > { %v468_v50 = vmul.f32 100.0, %v352_v49  ;;  %v425_v51 = vpop.f32.mrb[0].mxu1  ;;  %v354_v52 = vpop.f32.mrb[1].mxu0 }
  0xec   : > { %v470_v53 = vmul.f32 100.0, %v425_v51  ;;  %v469_v54 = vmul.f32 100.0, %v354_v52  ;;  %v427_v55 = vpop.f32.mrb[1].mxu1  ;;  %v356_v56 = vpop.f32.mrb[2].mxu0 }
  0xed   : > { %v4817_v57 = vadd.f32 %v487_v48, %v468_v50  ;;  %v471_v58 = vmul.f32 100.0, %v427_v55  ;;  %v472_v59 = vmul.f32 100.0, %v356_v56  ;;  %v429_v60 = vpop.f32.mrb[2].mxu1  ;;  %v358_v61 = vpop.f32.mrb[3].mxu0 }
  0xee   : > { %v4819_v63 = vadd.f32 %v487_v48, %v470_v53  ;;  %v4821_v1 = vadd.f32 %v487_v48, %v469_v54  ;;  %v474_v2 = vmul.f32 100.0, %v429_v60  ;;  %v431_v3 = vpop.f32.mrb[3].mxu1  ;;  %v473_v6 = vmul.f32 100.0, %v358_v61  ;;  %v4852_v53 = vpop.permute.xlu1 %501 }
  0xef   : > { %v520_v4 = vmin.f32 %v4817_v57, 20.0  ;;  %v4824_v5 = vadd.f32 %v492_v62, %v472_v59  ;;  %v4827_v8 = vadd.f32 %v487_v48, %v471_v58  ;;  %v475_v21 = vmul.f32 100.0, %v431_v3 }
  0xf0   : > { %v522_v7 = vmin.f32 %v4819_v63, 20.0  ;;  %v521_v12 = vmin.f32 %v4821_v1, 20.0  ;;  %v4831_v13 = vadd.f32 %v492_v62, %v474_v2  ;;  %v4833_v16 = vadd.f32 %v492_v62, %v473_v6 }
  0xf1   : > { %v536_v9 = vmul.f32 1.442695, %v520_v4  ;;  %v524_v10 = vmin.f32 %v4824_v5, 20.0  ;;  %v523_v19 = vmin.f32 %v4827_v8, 20.0  ;;  %v4837_v30 = vadd.f32 %v492_v62, %v475_v21 }
  0xf2   : > { %v540_v11 = vmul.f32 1.442695, %v522_v7  ;;  %v362_v14 = vpop.f32.mrb[4].mxu0  ;;  %v526_v20 = vmin.f32 %v4831_v13, 20.0  ;;  %v538_v28 = vmul.f32 1.442695, %v521_v12 }
  0xf3   : > { %4110 = vpow2.f32 %v536_v9  ;;  %v544_v15 = vmul.f32 1.442695, %v524_v10  ;;  %v435_v17 = vpop.f32.mrb[4].mxu1  ;;  %v364_v18 = vpop.f32.mrb[5].mxu0  ;;  %v476_v24 = vmul.f32 100.0, %v362_v14  ;;  %v525_v33 = vmin.f32 %v4833_v16, 20.0 }
  0xf4   : > { %4112 = vpow2.f32 %v540_v11  ;;  %v437_v22 = vpop.f32.mrb[5].mxu1  ;;  %v366_v23 = vpop.f32.mrb[6].mxu0  ;;  %v548_v29 = vmul.f32 1.442695, %v526_v20  ;;  %v478_v31 = vmul.f32 100.0, %v435_v17  ;;  %v477_v35 = vmul.f32 100.0, %v364_v18 }
  0xf5   : > { %v439_v25 = vpop.f32.mrb[6].mxu1  ;;  %v368_v26 = vpop.f32.mrb[7].mxu0  ;;  %4114 = vpow2.f32 %v544_v15  ;;  %v4842_v34 = vadd.f32 %v497_v27, %v476_v24  ;;  %v542_v36 = vmul.f32 1.442695, %v523_v19  ;;  %v527_v39 = vmin.f32 %v4837_v30, 20.0 }
  0xf6   : > { %v4839_v32 = vpop.f32.mrb[7].mxu1  ;;  %4116 = vpow2.f32 %v548_v29  ;;  %v4844_v37 = vadd.f32 %v497_v27, %v478_v31  ;;  %v4849_v41 = vadd.f32 %v497_v27, %v477_v35  ;;  %v546_v42 = vmul.f32 1.442695, %v525_v33 }
  0xf7   : > { %v528_v38 = vmin.f32 %v4842_v34, 20.0  ;;  %4118 = vpow2.f32 %v538_v28  ;;  %v480_v46 = vmul.f32 100.0, %v366_v23  ;;  %v550_v49 = vmul.f32 1.442695, %v527_v39 }
  0xf8   : > { %v530_v40 = vmin.f32 %v4844_v37, 20.0  ;;  %4120 = vpow2.f32 %v542_v36  ;;  %v529_v50 = vmin.f32 %v4849_v41, 20.0  ;;  %v479_v52 = vmul.f32 100.0, %v437_v22 }
  0xf9   : > { %v552_v43 = vmul.f32 1.442695, %v528_v38  ;;  %v4857_v56 = vadd.f32 %v4852_v53, %v480_v46  ;;  %v482_v61 = vmul.f32 100.0, %v439_v25  ;;  %v481_v11 = vmul.f32 100.0, %v368_v26 }
  0xfa   : > { %v556_v44 = vmul.f32 1.442695, %v530_v40  ;;  %v554_v60 = vmul.f32 1.442695, %v529_v50  ;;  %v4863_v4 = vadd.f32 %v497_v27, %v479_v52  ;;  %vm712_vm4 = vcmp.gt.f32.partialorder %v4817_v57, 20.0 }
  0xfb   : > { %4122 = vpow2.f32 %v552_v43  ;;  %v532_v10 = vmin.f32 %v4857_v56, 20.0  ;;  %v4871_v14 = vadd.f32 %v4852_v53, %v482_v61  ;;  %v4894_v31 = vadd.f32 %v4852_v53, %v481_v11 }
  0xfc   : > { %4124 = vpow2.f32 %v556_v44  ;;  %v531_v20 = vmin.f32 %v4863_v4, 20.0  ;;  %v483_v38 = vmul.f32 100.0, %v4839_v32  ;;  %vm714_vm5 = vcmp.gt.f32.partialorder %v4819_v63, 20.0 }
  0xfd   : > { %v4111_v45 = vpop.eup %4110  ;;  %4126 = vpow2.f32 %v546_v42  ;;  %v560_v21 = vmul.f32 1.442695, %v532_v10  ;;  %v534_v26 = vmin.f32 %v4871_v14, 20.0  ;;  %vm716_vm6 = vcmp.gt.f32.partialorder %v4824_v5, 20.0 }
  0xfe   : > { %v4113_v47 = vpop.eup %4112  ;;  %v568_v48 = vadd.f32 1.0, %v4111_v45  ;;  %v571_v54 = vmul.f32 -0.5, %v4111_v45  ;;  %v574_v62 = vand.u32 2147483647, %v4111_v45  ;;  %vm718_vm7 = vcmp.gt.f32.partialorder %v4831_v13, 20.0 }
  0xff   : > { %v586_v51 = vadd.f32 1.0, %v4113_v47  ;;  %v4854_v55 = vpop.eup %4114  ;;  %v589_v2 = vmul.f32 -0.5, %v4113_v47  ;;  %v592_v7 = vand.u32 2147483647, %v4113_v47  ;;  %v564_v36 = vmul.f32 1.442695, %v534_v26 }
 0x100   : > { %4128 = vlog2.f32 %v568_v48  ;;  %v4859_v58 = vpop.eup %4116  ;;  %v604_v59 = vadd.f32 1.0, %v4854_v55  ;;  %v572_v6 = vadd.f32 1.0, %v571_v54  ;;  %vm4875_vm2 = vcmp.lt.f32.partialorder %v574_v62, 0.0004427343 }
 0x101   : > { %4130 = vlog2.f32 %v586_v51  ;;  %v622_v3 = vadd.f32 1.0, %v4859_v58  ;;  %v4865_v9 = vpop.eup %4118  ;;  %v590_v18 = vadd.f32 1.0, %v589_v2  ;;  %v607_v19 = vmul.f32 -0.5, %v4854_v55 }
 0x102   : > { %4132 = vpow2.f32 %v550_v49  ;;  %v4868_v12 = vpop.eup %4120  ;;  %v573_v23 = vmul.f32 %v4111_v45, %v572_v6  ;;  %vm4883_vm3 = vcmp.lt.f32.partialorder %v592_v7, 0.0004427343  ;;  %v625_v28 = vmul.f32 -0.5, %v4859_v58 }
 0x103   : > { %4134 = vlog2.f32 %v604_v59  ;;  %v610_v35 = vand.u32 2147483647, %v4854_v55  ;;  %v591_v40 = vmul.f32 %v4113_v47, %v590_v18  ;;  %v608_v42 = vadd.f32 1.0, %v607_v19 }
 0x104   : > { %4136 = vlog2.f32 %v622_v3  ;;  %v628_v46 = vand.u32 2147483647, %v4859_v58  ;;  %v626_v32 = vadd.f32 1.0, %v625_v28  ;;  %v558_v47 = vmul.f32 1.442695, %v531_v20 }
 0x105   : > { %4138 = vpow2.f32 %v554_v60  ;;  %v4873_v15 = vpop.eup %4122  ;;  %v533_v50 = vmin.f32 %v4894_v31, 20.0  ;;  %vm4908_vm8 = vcmp.lt.f32.partialorder %v610_v35, 0.0004427343  ;;  %v4914_v59 = vadd.f32 %v4852_v53, %v483_v38 }
 0x106   : > { %v4881_v22 = vpop.eup %4124  ;;  %v640_v25 = vadd.f32 1.0, %v4873_v15  ;;  %4140 = vpow2.f32 %v560_v21  ;;  %v643_v43 = vmul.f32 -0.5, %v4873_v15  ;;  %v646_v54 = vand.u32 2147483647, %v4873_v15 }
 0x107   : > { %v4889_v27 = vpop.eup %4126  ;;  %v658_v29 = vadd.f32 1.0, %v4881_v22  ;;  %v661_v48 = vmul.f32 -0.5, %v4881_v22  ;;  %v577_v60 = vadd.f32 1.0, %v4865_v9  ;;  %v609_v2 = vmul.f32 %v4854_v55, %v608_v42 }
 0x108   : > { %4142 = vlog2.f32 %v640_v25  ;;  %v644_v3 = vadd.f32 1.0, %v643_v43  ;;  %v664_v6 = vand.u32 2147483647, %v4881_v22  ;;  %v562_v19 = vmul.f32 1.442695, %v533_v50 }
 0x109   : > { %4144 = vlog2.f32 %v658_v29  ;;  %v662_v18 = vadd.f32 1.0, %v661_v48  ;;  %v627_v20 = vmul.f32 %v4859_v58, %v626_v32  ;;  %vm4926_vm9 = vcmp.lt.f32.partialorder %v628_v46, 0.0004427343 }
 0x10a   : > { %v4129_v33 = vpop.eup %4128  ;;  %4146 = vpow2.f32 %v564_v36  ;;  %vm4932_vm10 = vcmp.lt.f32.partialorder %v646_v54, 0.0004427343  ;;  %vm720_vm11 = vcmp.gt.f32.partialorder %v4842_v34, 20.0  ;;  %v535_v17 = vmin.f32 %v4914_v59, 20.0 }
 0x10b   : > { %v4131_v39 = vpop.eup %4130  ;;  %v570_v45 = vmul.f32 0.6931472, %v4129_v33  ;;  %4148 = vpow2.f32 %v558_v47  ;;  %v645_v26 = vmul.f32 %v4873_v15, %v644_v3  ;;  %vm4946_vm12 = vcmp.lt.f32.partialorder %v664_v6, 0.0004427343 }
 0x10c   : > { %v4901_v44 = vpop.eup %4132  ;;  %v588_v49 = vmul.f32 0.6931472, %v4131_v39  ;;  %4150 = vlog2.f32 %v577_v60  ;;  %v580_v29 = vmul.f32 -0.5, %v4865_v9  ;;  %v663_v36 = vmul.f32 %v4881_v22, %v662_v18 }
 0x10d   : > { %v4135_v51 = vpop.eup %4134  ;;  %v576_v10 = vsel %vm4875_vm2, %v573_v23, %v570_v45  ;;  %4152 = vpow2.f32 %v562_v19  ;;  %v613_v42 = vadd.f32 1.0, %v4889_v27  ;;  %vm722_vm13 = vcmp.gt.f32.partialorder %v4844_v37, 20.0 }
 0x10e   : > { %v4137_v61 = vpop.eup %4136  ;;  %v606_v62 = vmul.f32 0.6931472, %v4135_v51  ;;  %v594_v53 = vsel %vm4883_vm3, %v591_v40, %v588_v49  ;;  %v728_v58 = vsel %vm712_vm4, %v4817_v57, %v576_v10  ;;  %v583_v40 = vand.u32 2147483647, %v4865_v9 }
 0x10f   : > { %v4919_v7 = vpop.eup %4138  ;;  %v624_v11 = vmul.f32 0.6931472, %v4137_v61  ;;  %v730_v35 = vsel %vm714_vm5, %v4819_v63, %v594_v53  ;;  %v4961_v45 = vmul.f32 0.01, %v728_v58  ;;  %v566_v22 = vmul.f32 1.442695, %v535_v17 }
 0x110   : > { %v612_v55 = vsel %vm4908_vm8, %v609_v2, %v606_v62  ;;  %v4938_v23 = vpop.eup %4140  ;;  %v4967_v46 = vmul.f32 0.01, %v730_v35  ;;  %v581_v49 = vadd.f32 1.0, %v580_v29  ;;  %vm4976_vm14 = vcmp.lt.f32.partialorder %v583_v40, 0.0004427343 }
 0x111   : > { %v630_v24 = vsel %vm4926_vm9, %v627_v20, %v624_v11  ;;  %v676_v57 = vadd.f32 1.0, %v4938_v23  ;;  %v732_v15 = vsel %vm716_vm6, %v4824_v5, %v612_v55  ;;  %v679_v5 = vmul.f32 -0.5, %v4938_v23 }
 0x112   : > { %v4143_v33 = vpop.eup %4142  ;;  %v734_v63 = vsel %vm718_vm7, %v4831_v13, %v630_v24  ;;  %v4970_v32 = vmul.f32 0.01, %v732_v15  ;;  %vm713_vm15 = vcmp.gt.f32.partialorder %v4821_v1, 20.0  ;;  %v682_v54 = vand.u32 2147483647, %v4938_v23 }
 0x113   : > { %v4145_v38 = vpop.eup %4144  ;;  %v642_v39 = vmul.f32 0.6931472, %v4143_v33  ;;  %4154 = vlog2.f32 %v676_v57  ;;  %v4974_v51 = vmul.f32 0.01, %v734_v63  ;;  %v616_v60 = vmul.f32 -0.5, %v4889_v27 }
 0x114   : > { %v4147_v43 = vpop.eup %4146  ;;  %v660_v50 = vmul.f32 0.6931472, %v4145_v38  ;;  %4156 = vlog2.f32 %v613_v42  ;;  %v595_v61 = vadd.f32 1.0, %v4868_v12  ;;  %v680_v3 = vadd.f32 1.0, %v679_v5 }
 0x115   : > { %v694_v48 = vadd.f32 1.0, %v4147_v43  ;;  %v648_v47 = vsel %vm4932_vm10, %v645_v26, %v642_v39  ;;  %v697_v13 = vmul.f32 -0.5, %v4147_v43  ;;  %v4984_v62 = vpop.eup %4148  ;;  %v700_v6 = vand.u32 2147483647, %v4147_v43 }
 0x116   : > { %v736_v2 = vsel %vm720_vm11, %v4842_v34, %v648_v47  ;;  %v582_v10 = vmul.f32 %v4865_v9, %v581_v49  ;;  %v4151_v11 = vpop.eup %4150  ;;  %v666_v18 = vsel %vm4946_vm12, %v663_v36, %v660_v50  ;;  %vm724_vm0 = vcmp.gt.f32.partialorder %v4857_v56, 20.0 }
 0x117   : > { %4158 = vlog2.f32 %v694_v48  ;;  %v598_v19 = vmul.f32 -0.5, %v4868_v12  ;;  %v631_v53 = vadd.f32 1.0, %v4901_v44  ;;  %vm717_vm1 = vcmp.gt.f32.partialorder %v4833_v16, 20.0  ;;  %v4999_v55 = vpop.eup %4152 }
 0x118   : > { %4160 = vpow2.f32 %v566_v22  ;;  %v698_v20 = vadd.f32 1.0, %v697_v13  ;;  %v579_v21 = vmul.f32 0.6931472, %v4151_v11  ;;  %v634_v34 = vmul.f32 -0.5, %v4901_v44 }
 0x119   : > { %4162 = vlog2.f32 %v595_v61  ;;  %v764_v9 = vpack.c.bf16 %v4970_v32, %v4961_v45  ;;  %vm5001_vm2 = vcmp.lt.f32.partialorder %v682_v54, 0.0004427343  ;;  %vm726_vm3 = vcmp.gt.f32.partialorder %v4871_v14, 20.0 }
 0x11a   : > { %v617_v17 = vadd.f32 1.0, %v616_v60  ;;  %v619_v58 = vand.u32 2147483647, %v4889_v27  ;;  %4164 = vlog2.f32 %v631_v53  ;;  %v5007_v24 = vmul.f32 0.01, %v736_v2 }
 0x11b   : > { %v738_v26 = vsel %vm722_vm13, %v4844_v37, %v666_v18  ;;  %v681_v28 = vmul.f32 %v4938_v23, %v680_v3  ;;  %v766_v29 = vpack.c.bf16 %v4974_v51, %v4967_v46  ;;  %v585_v35 = vsel %vm4976_vm14, %v582_v10, %v579_v21 }
 0x11c   : > { %v599_v36 = vadd.f32 1.0, %v598_v19  ;;  %v601_v57 = vand.u32 2147483647, %v4868_v12  ;;  %v649_v38 = vadd.f32 1.0, %v4919_v7  ;;  %vm715_vm4 = vcmp.gt.f32.partialorder %v4827_v8, 20.0 }
 0x11d   : > { %v4155_v33 = vpop.eup %4154  ;;  %v699_v39 = vmul.f32 %v4147_v43, %v698_v20  ;;  %vm5020_vm5 = vcmp.lt.f32.partialorder %v700_v6, 0.0004427343  ;;  %v635_v23 = vadd.f32 1.0, %v634_v34  ;;  %v618_v42 = vmul.f32 %v4889_v27, %v617_v17 }
 0x11e   : > { %v678_v15 = vmul.f32 0.6931472, %v4155_v33  ;;  %v4157_v40 = vpop.eup %4156  ;;  %vm5025_vm6 = vcmp.lt.f32.partialorder %v619_v58, 0.0004427343  ;;  %4166 = vlog2.f32 %v649_v38  ;;  %v685_v22 = vadd.f32 1.0, %v4999_v55 }
 0x11f   : > { %vm719_vm7 = vcmp.gt.f32.partialorder %v4837_v30, 20.0  ;;  %v615_v48 = vmul.f32 0.6931472, %v4157_v40  ;;  %v729_v49 = vsel %vm713_vm15, %v4821_v1, %v585_v35  ;;  %v652_v27 = vmul.f32 -0.5, %v4919_v7 }
 0x120   : > { %v684_v43 = vsel %vm5001_vm2, %v681_v28, %v678_v15  ;;  %v600_v13 = vmul.f32 %v4868_v12, %v599_v36  ;;  %vm5040_vm8 = vcmp.lt.f32.partialorder %v601_v57, 0.0004427343  ;;  %v637_v54 = vand.u32 2147483647, %v4901_v44 }
 0x121   : > { %v4159_v5 = vpop.eup %4158  ;;  %v740_v60 = vsel %vm724_vm0, %v4857_v56, %v684_v43  ;;  %v621_v1 = vsel %vm5025_vm6, %v618_v42, %v615_v48  ;;  %v636_v61 = vmul.f32 %v4901_v44, %v635_v23  ;;  %4168 = vlog2.f32 %v685_v22 }
 0x122   : > { %v5037_v47 = vpop.eup %4160  ;;  %v696_v50 = vmul.f32 0.6931472, %v4159_v5  ;;  %v733_v3 = vsel %vm717_vm1, %v4833_v16, %v621_v1  ;;  %v745_v6 = vmul.f32 0.01, %v729_v49  ;;  %v667_v10 = vadd.f32 1.0, %v4984_v62 }
 0x123   : > { %v4163_v2 = vpop.eup %4162  ;;  %v749_v11 = vmul.f32 0.01, %v733_v3  ;;  %v653_v19 = vadd.f32 1.0, %v652_v27  ;;  %v5060_v53 = vmul.f32 0.01, %v740_v60  ;;  %v688_v21 = vmul.f32 -0.5, %v4999_v55 }
 0x124   : > { %v702_v12 = vsel %vm5020_vm5, %v699_v39, %v696_v50  ;;  %v597_v18 = vmul.f32 0.6931472, %v4163_v2  ;;  %v4165_v44 = vpop.eup %4164  ;;  %4170 = vlog2.f32 %v667_v10  ;;  %v703_v17 = vadd.f32 1.0, %v5037_v47 }
 0x125   : > { %v742_v56 = vsel %vm726_vm3, %v4871_v14, %v702_v12  ;;  %v765_v34 = vpack.c.bf16 %v749_v11, %v745_v6  ;;  %v633_v25 = vmul.f32 0.6931472, %v4165_v44  ;;  %v5068_v58 = vmul.f32 0.01, %v738_v26  ;;  %v919_v6 = vpop.permute.xlu0 %918 }
 0x126   : > { %v5062_v20 = vmul.f32 0.01, %v742_v56  ;;  %v603_v16 = vsel %vm5040_vm8, %v600_v13, %v597_v18  ;;  %vm638_vm9 = vcmp.lt.f32.partialorder %v637_v54, 0.0004427343  ;;  %v655_v28 = vand.u32 2147483647, %v4919_v7 }
 0x127   : > { %v731_v14 = vsel %vm715_vm4, %v4827_v8, %v603_v16  ;;  %789 = vmatprep.subr.bf16.mxu0 %v765_v34  ;;  %v639_v33 = vsel %vm638_vm9, %v636_v61, %v633_v25  ;;  %v691_v35 = vand.u32 2147483647, %v4999_v55  ;;  %v670_v36 = vmul.f32 -0.5, %v4984_v62 }
 0x128   : > { %4172 = vlog2.f32 %v703_v17  ;;  %v4167_v57 = vpop.eup %4166  ;;  %v735_v26 = vsel %vm719_vm7, %v4837_v30, %v639_v33  ;;  %790 = vmatpush1.bf16.msra.mxu0 %v764_v9  ;;  %v654_v8 = vmul.f32 %v4919_v7, %v653_v19  ;;  %v689_v38 = vadd.f32 1.0, %v688_v21  ;;  %v924_v19 = vpop.permute.xlu1 %923 }
 0x129   : > { %v768_v15 = vpack.c.bf16 %v5060_v53, %v5007_v24  ;;  %v747_v39 = vmul.f32 0.01, %v731_v14  ;;  %v751_v37 = vmul.f32 0.01, %v735_v26  ;;  %v651_v23 = vmul.f32 0.6931472, %v4167_v57 }
 0x12a   : > { %v770_v40 = vpack.c.bf16 %v5062_v20, %v5068_v58  ;;  %vm656_vm10 = vcmp.lt.f32.partialorder %v655_v28, 0.0004427343  ;;  %v706_v42 = vmul.f32 -0.5, %v5037_v47  ;;  %v671_v45 = vadd.f32 1.0, %v670_v36 }
 0x12b   : > { %v4169_v30 = vpop.eup %4168  ;;  %v767_v63 = vpack.c.bf16 %v751_v37, %v747_v39  ;;  %v657_v22 = vsel %vm656_vm10, %v654_v8, %v651_v23  ;;  %vm721_vm11 = vcmp.gt.f32.partialorder %v4849_v41, 20.0  ;;  %v690_v32 = vmul.f32 %v4999_v55, %v689_v38 }
 0x12c   : > { %v687_v7 = vmul.f32 0.6931472, %v4169_v30  ;;  %v673_v9 = vand.u32 2147483647, %v4984_v62  ;;  %vm692_vm12 = vcmp.lt.f32.partialorder %v691_v35, 0.0004427343  ;;  %v737_v24 = vsel %vm721_vm11, %v4849_v41, %v657_v22 }
 0x12d   : > { %842 = vmatprep.subr.bf16.mxu1 %v767_v63  ;;  %vm725_vm13 = vcmp.gt.f32.partialorder %v4894_v31, 20.0  ;;  %v707_v48 = vadd.f32 1.0, %v706_v42  ;;  %v672_v55 = vmul.f32 %v4984_v62, %v671_v45  ;;  %v709_v50 = vand.u32 2147483647, %v5037_v47  ;;  %v4096_v62 = vld [vmem:[%s7227_s2] sm:$0xff]  }
 0x12e   : > { %v4171_v5 = vpop.eup %4170  ;;  %843 = vmatpush1.bf16.msra.mxu1 %v766_v29  ;;  %v693_v43 = vsel %vm692_vm12, %v690_v32, %v687_v7  ;;  %v753_v13 = vmul.f32 0.01, %v737_v24  ;;  %vm674_vm14 = vcmp.lt.f32.partialorder %v673_v9, 0.0004427343  ;;  %vm723_vm15 = vcmp.gt.f32.partialorder %v4863_v4, 20.0  ;;  %v929_v7 = vpop.permute.xlu0 %928 }
 0x12f   : > { %v741_v49 = vsel %vm725_vm13, %v4894_v31, %v693_v43  ;;  %v669_v27 = vmul.f32 0.6931472, %v4171_v5  ;;  %v708_v46 = vmul.f32 %v5037_v47, %v707_v48  ;;  %vm710_vm0 = vcmp.lt.f32.partialorder %v709_v50, 0.0004427343 }
 0x130   : > { %v757_v52 = vmul.f32 0.01, %v741_v49  ;;  %vm727_vm1 = vcmp.gt.f32.partialorder %v4914_v59, 20.0  ;;  %vm782_vm2 = vcmask 261120  }
 0x131   : > { %v675_v54 = vsel %vm674_vm14, %v672_v55, %v669_v27 }
 0x132   : > { %v4173_v41 = vpop.eup %4172  ;;  %v769_v60 = vpack.c.bf16 %v757_v52, %v753_v13  ;;  %v739_v51 = vsel %vm723_vm15, %v4863_v4, %v675_v54  ;;  %v4097_v4 = vld [vmem:[%s7227_s2 + $0x8] sm:$0xff]  }
 0x133   : > { %v705_v1 = vmul.f32 0.6931472, %v4173_v41  ;;  %v755_v61 = vmul.f32 0.01, %v739_v51 }
 0x134   : > { %791 = vmatprep.subr.bf16.mxu0 %v769_v60 }
 0x135   : > { %v711_v31 = vsel %vm710_vm0, %v708_v46, %v705_v1  ;;  %792 = vmatpush1.bf16.msra.mxu0 %v768_v15 }
 0x136   : > { %v743_v29 = vsel %vm727_vm1, %v4914_v59, %v711_v31 }
 0x137   : > { %v759_v2 = vmul.f32 0.01, %v743_v29 }
 0x138   : > { %3969 = vmatmul.mubr.msk.bf16.vlgmr.msra.gmra.mrb[16].mxu0 %vm782_vm2, %v4096_v62 }
 0x139   : > { %v771_v12 = vpack.c.bf16 %v759_v2, %v755_v61  ;;  %831 = vmatprep.mubr.bf16.mxu0 %v4630_v0 }
 0x13b   : > { %844 = vmatprep.subr.bf16.mxu1 %v771_v12 }
 0x13c   : > { %845 = vmatpush1.bf16.msra.mxu1 %v770_v40 }
 0x13f   : > { %3971 = vmatmul.mubr.msk.bf16.vlgmr.msra.gmra.mrb[16].mxu1 %vm782_vm2, %v4096_v62 }
 0x140   : > { %884 = vmatprep.mubr.bf16.mxu1 %v4630_v0  ;;  %3970 = vmatmul.mubr.msk.bf16.gmra.mrb[20].mxu0 %vm782_vm2, %v4097_v4 }
 0x141   : > { %1253 = vmatprep.mubr.bf16.mxu0 %v4630_v0 }
 0x147   : > { %3972 = vmatmul.mubr.msk.bf16.gmra.mrb[20].mxu1 %vm782_vm2, %v4097_v4 }
 0x148   : > { %1306 = vmatprep.mubr.bf16.mxu1 %v4630_v0 }
 0x20b   : > { %v823_v59 = vpop.f32.mrb[16].mxu0 }
 0x20c   : > { %v900_v47 = vmul.f32 100.0, %v823_v59  ;;  %v825_v3 = vpop.f32.mrb[17].mxu0 }
 0x20d   : > { %v827_v10 = vpop.f32.mrb[18].mxu0  ;;  %v901_v44 = vmul.f32 100.0, %v825_v3 }
 0x20e   : > { %v5118_v56 = vadd.f32 %v919_v6, %v900_v47  ;;  %v904_v11 = vmul.f32 100.0, %v827_v10  ;;  %v829_v18 = vpop.f32.mrb[19].mxu0 }
 0x20f   : > { %v5124_v58 = vadd.f32 %v919_v6, %v901_v44  ;;  %v905_v28 = vmul.f32 100.0, %v829_v18 }
 0x210   : > { %v952_v53 = vmin.f32 %v5118_v56, 20.0  ;;  %v5121_v20 = vadd.f32 %v924_v19, %v904_v11  ;;  %v5161_v11 = vpop.permute.xlu1 %933  ;;  %vm1144_vm3 = vcmp.gt.f32.partialorder %v5118_v56, 20.0 }
 0x211   : > { %v953_v40 = vmin.f32 %v5124_v58, 20.0  ;;  %v5132_v42 = vadd.f32 %v924_v19, %v905_v28  ;;  %vm1145_vm15 = vcmp.gt.f32.partialorder %v5124_v58, 20.0 }
 0x212   : > { %v876_v21 = vpop.f32.mrb[16].mxu1  ;;  %v968_v34 = vmul.f32 1.442695, %v952_v53  ;;  %v956_v17 = vmin.f32 %v5121_v20, 20.0  ;;  %vm1148_vm4 = vcmp.gt.f32.partialorder %v5121_v20, 20.0 }
 0x213   : > { %v902_v16 = vmul.f32 100.0, %v876_v21  ;;  %v878_v25 = vpop.f32.mrb[17].mxu1  ;;  %v833_v26 = vpop.f32.mrb[20].mxu0  ;;  %v970_v55 = vmul.f32 1.442695, %v953_v40  ;;  %v957_v50 = vmin.f32 %v5132_v42, 20.0 }
 0x214   : > { %v880_v14 = vpop.f32.mrb[18].mxu1  ;;  %4174 = vpow2.f32 %v968_v34  ;;  %v976_v35 = vmul.f32 1.442695, %v956_v17  ;;  %v903_v8 = vmul.f32 100.0, %v878_v25  ;;  %v835_v15 = vpop.f32.mrb[21].mxu0  ;;  %v908_v45 = vmul.f32 100.0, %v833_v26 }
 0x215   : > { %v5126_v33 = vadd.f32 %v919_v6, %v902_v16  ;;  %v906_v36 = vmul.f32 100.0, %v880_v14  ;;  %v882_v57 = vpop.f32.mrb[19].mxu1  ;;  %v837_v23 = vpop.f32.mrb[22].mxu0  ;;  %v909_v5 = vmul.f32 100.0, %v835_v15  ;;  %v978_v59 = vmul.f32 1.442695, %v957_v50 }
 0x216   : > { %v907_v38 = vmul.f32 100.0, %v882_v57  ;;  %4176 = vpow2.f32 %v976_v35  ;;  %v839_v30 = vpop.f32.mrb[23].mxu0  ;;  %v5135_v32 = vadd.f32 %v919_v6, %v903_v8  ;;  %v5139_v48 = vadd.f32 %v929_v7, %v908_v45 }
 0x217   : > { %v954_v39 = vmin.f32 %v5126_v33, 20.0  ;;  %v5129_v37 = vadd.f32 %v924_v19, %v906_v36  ;;  %v5145_v60 = vadd.f32 %v929_v7, %v909_v5  ;;  %v912_v12 = vmul.f32 100.0, %v837_v23 }
 0x218   : > { %v5137_v9 = vadd.f32 %v924_v19, %v907_v38  ;;  %v960_v41 = vmin.f32 %v5139_v48, 20.0  ;;  %v955_v46 = vmin.f32 %v5135_v32, 20.0  ;;  %v913_v36 = vmul.f32 100.0, %v839_v30 }
 0x219   : > { %v972_v63 = vmul.f32 1.442695, %v954_v39  ;;  %v958_v22 = vmin.f32 %v5129_v37, 20.0  ;;  %v961_v3 = vmin.f32 %v5145_v60, 20.0  ;;  %v5165_v44 = vadd.f32 %v5161_v11, %v912_v12 }
 0x21a   : > { %v886_v24 = vpop.f32.mrb[20].mxu1  ;;  %v959_v31 = vmin.f32 %v5137_v9, 20.0  ;;  %v984_v62 = vmul.f32 1.442695, %v960_v41  ;;  %v974_v6 = vmul.f32 1.442695, %v955_v46 }
 0x21b   : > { %4178 = vpow2.f32 %v972_v63  ;;  %v980_v43 = vmul.f32 1.442695, %v958_v22  ;;  %v910_v49 = vmul.f32 100.0, %v886_v24  ;;  %v888_v27 = vpop.f32.mrb[21].mxu1  ;;  %v986_v34 = vmul.f32 1.442695, %v961_v3 }
 0x21c   : > { %v911_v13 = vmul.f32 100.0, %v888_v27  ;;  %v890_v52 = vpop.f32.mrb[22].mxu1  ;;  %v982_v18 = vmul.f32 1.442695, %v959_v31  ;;  %v964_v28 = vmin.f32 %v5165_v44, 20.0  ;;  %vm1146_vm8 = vcmp.gt.f32.partialorder %v5126_v33, 20.0 }
 0x21d   : > { %4180 = vpow2.f32 %v980_v43  ;;  %v5143_v54 = vadd.f32 %v929_v7, %v910_v49  ;;  %v5147_v1 = vpop.f32.mrb[23].mxu1  ;;  %v914_v53 = vmul.f32 100.0, %v890_v52  ;;  %vm1150_vm9 = vcmp.gt.f32.partialorder %v5129_v37, 20.0 }
 0x21e   : > { %v5150_v51 = vpop.eup %4174  ;;  %4182 = vpow2.f32 %v970_v55  ;;  %v5155_v2 = vadd.f32 %v929_v7, %v911_v13  ;;  %v992_v38 = vmul.f32 1.442695, %v964_v28  ;;  %v5188_v7 = vadd.f32 %v5161_v11, %v913_v36 }
 0x21f   : > { %v962_v29 = vmin.f32 %v5143_v54, 20.0  ;;  %v1000_v61 = vadd.f32 1.0, %v5150_v51  ;;  %4184 = vpow2.f32 %v984_v62  ;;  %v1003_v16 = vmul.f32 -0.5, %v5150_v51 }
 0x220   : > { %v5157_v4 = vpop.eup %4176  ;;  %v963_v19 = vmin.f32 %v5155_v2, 20.0  ;;  %v5176_v35 = vadd.f32 %v5161_v11, %v914_v53  ;;  %v1006_v57 = vand.u32 2147483647, %v5150_v51  ;;  %vm1152_vm12 = vcmp.gt.f32.partialorder %v5139_v48, 20.0 }
 0x221   : > { %v988_v47 = vmul.f32 1.442695, %v962_v29  ;;  %4186 = vlog2.f32 %v1000_v61  ;;  %v1036_v10 = vadd.f32 1.0, %v5157_v4  ;;  %v1039_v17 = vmul.f32 -0.5, %v5157_v4 }
 0x222   : > { %v990_v8 = vmul.f32 1.442695, %v963_v19  ;;  %v966_v15 = vmin.f32 %v5176_v35, 20.0  ;;  %v1004_v23 = vadd.f32 1.0, %v1003_v16  ;;  %v1042_v63 = vand.u32 2147483647, %v5157_v4 }
 0x223   : > { %4188 = vpow2.f32 %v988_v47  ;;  %v1040_v40 = vadd.f32 1.0, %v1039_v17  ;;  %vm5190_vm5 = vcmp.lt.f32.partialorder %v1006_v57, 0.0004427343  ;;  %v915_v17 = vmul.f32 100.0, %v5147_v1 }
 0x224   : > { %4190 = vlog2.f32 %v1036_v10  ;;  %v996_v45 = vmul.f32 1.442695, %v966_v15  ;;  %v1005_v41 = vmul.f32 %v5150_v51, %v1004_v23  ;;  %vm5199_vm6 = vcmp.lt.f32.partialorder %v1042_v63, 0.0004427343 }
 0x225   : > { %v5167_v21 = vpop.eup %4178  ;;  %4192 = vpow2.f32 %v978_v59  ;;  %v1041_v12 = vmul.f32 %v5157_v4, %v1040_v40  ;;  %v965_v59 = vmin.f32 %v5188_v7, 20.0  ;;  %v5241_v1 = vadd.f32 %v5161_v11, %v915_v17 }
 0x226   : > { %v1018_v25 = vadd.f32 1.0, %v5167_v21  ;;  %4194 = vpow2.f32 %v974_v6  ;;  %v1021_v22 = vmul.f32 -0.5, %v5167_v21  ;;  %v1024_v43 = vand.u32 2147483647, %v5167_v21 }
 0x227   : > { %v5172_v14 = vpop.eup %4180  ;;  %4196 = vpow2.f32 %v982_v18  ;;  %vm1154_vm14 = vcmp.gt.f32.partialorder %v5143_v54, 20.0  ;;  %vm1156_vm1 = vcmp.gt.f32.partialorder %v5165_v44, 20.0 }
 0x228   : > { %4198 = vlog2.f32 %v1018_v25  ;;  %v1054_v26 = vadd.f32 1.0, %v5172_v14  ;;  %v5181_v39 = vpop.eup %4182  ;;  %v1057_v50 = vmul.f32 -0.5, %v5172_v14  ;;  %v1022_v29 = vadd.f32 1.0, %v1021_v22 }
 0x229   : > { %4200 = vpow2.f32 %v986_v34  ;;  %v4185_v30 = vpop.eup %4184  ;;  %vm5212_vm7 = vcmp.lt.f32.partialorder %v1024_v43, 0.0004427343  ;;  %v1060_v6 = vand.u32 2147483647, %v5172_v14  ;;  %v1009_v28 = vadd.f32 1.0, %v5181_v39 }
 0x22a   : > { %4202 = vlog2.f32 %v1054_v26  ;;  %v1072_v49 = vadd.f32 1.0, %v4185_v30  ;;  %v1075_v13 = vmul.f32 -0.5, %v4185_v30  ;;  %v1058_v18 = vadd.f32 1.0, %v1057_v50 }
 0x22b   : > { %4204 = vpow2.f32 %v992_v38  ;;  %v4187_v24 = vpop.eup %4186  ;;  %v1078_v53 = vand.u32 2147483647, %v4185_v30  ;;  %v994_v38 = vmul.f32 1.442695, %v965_v59  ;;  %vm5236_vm10 = vcmp.lt.f32.partialorder %v1060_v6, 0.0004427343 }
 0x22c   : > { %4206 = vpow2.f32 %v990_v8  ;;  %v1002_v55 = vmul.f32 0.6931472, %v4187_v24  ;;  %v1076_v19 = vadd.f32 1.0, %v1075_v13  ;;  %v1023_v8 = vmul.f32 %v5167_v21, %v1022_v29 }
 0x22d   : > { %v5195_v27 = vpop.eup %4188  ;;  %4208 = vpow2.f32 %v996_v45  ;;  %vm5244_vm11 = vcmp.lt.f32.partialorder %v1078_v53, 0.0004427343  ;;  %v1015_v6 = vand.u32 2147483647, %v5181_v39 }
 0x22e   : > { %v4191_v52 = vpop.eup %4190  ;;  %4210 = vlog2.f32 %v1072_v49  ;;  %v1090_v31 = vadd.f32 1.0, %v5195_v27  ;;  %v1008_v51 = vsel %vm5190_vm5, %v1005_v41, %v1002_v55  ;;  %v1093_v16 = vmul.f32 -0.5, %v5195_v27 }
 0x22f   : > { %v5204_v62 = vpop.eup %4192  ;;  %v1038_v61 = vmul.f32 0.6931472, %v4191_v52  ;;  %v1096_v25 = vand.u32 2147483647, %v5195_v27  ;;  %v1160_v57 = vsel %vm1144_vm3, %v5118_v56, %v1008_v51  ;;  %v1059_v56 = vmul.f32 %v5172_v14, %v1058_v18 }
 0x230   : > { %v5208_v47 = vpop.eup %4194  ;;  %4212 = vlog2.f32 %v1090_v31  ;;  %v1077_v45 = vmul.f32 %v4185_v30, %v1076_v19  ;;  %v1094_v5 = vadd.f32 1.0, %v1093_v16  ;;  %v967_v55 = vmin.f32 %v5241_v1, 20.0 }
 0x231   : > { %v5217_v10 = vpop.eup %4196  ;;  %v1044_v4 = vsel %vm5199_vm6, %v1041_v12, %v1038_v61  ;;  %4214 = vlog2.f32 %v1009_v28  ;;  %vm5253_vm13 = vcmp.lt.f32.partialorder %v1096_v25, 0.0004427343  ;;  %v1012_v41 = vmul.f32 -0.5, %v5181_v39 }
 0x232   : > { %v4199_v34 = vpop.eup %4198  ;;  %v1164_v23 = vsel %vm1148_vm4, %v5121_v20, %v1044_v4  ;;  %v5250_v20 = vmul.f32 0.01, %v1160_v57  ;;  %4216 = vpow2.f32 %v994_v38  ;;  %v1045_v61 = vadd.f32 1.0, %v5204_v62 }
 0x233   : > { %v5227_v36 = vpop.eup %4200  ;;  %v1020_v26 = vmul.f32 0.6931472, %v4199_v34  ;;  %v5259_v30 = vmul.f32 0.01, %v1164_v23  ;;  %v1095_v51 = vmul.f32 %v5195_v27, %v1094_v5  ;;  %v998_v19 = vmul.f32 1.442695, %v967_v55 }
 0x234   : > { %v4203_v15 = vpop.eup %4202  ;;  %v1063_v23 = vadd.f32 1.0, %v5217_v10  ;;  %vm1158_vm4 = vcmp.gt.f32.partialorder %v5176_v35, 20.0  ;;  %vm5306_vm5 = vcmp.lt.f32.partialorder %v1015_v6, 0.0004427343  ;;  %vm1149_vm6 = vcmp.gt.f32.partialorder %v5132_v42, 20.0 }
 0x235   : > { %v4205_v63 = vpop.eup %4204  ;;  %v1056_v22 = vmul.f32 0.6931472, %v4203_v15  ;;  %v1026_v14 = vsel %vm5212_vm7, %v1023_v8, %v1020_v26  ;;  %v1027_v8 = vadd.f32 1.0, %v5208_v47  ;;  %vm1147_vm7 = vcmp.gt.f32.partialorder %v5135_v32, 20.0 }
 0x236   : > { %v5248_v24 = vpop.eup %4206  ;;  %v1108_v43 = vadd.f32 1.0, %v4205_v63  ;;  %v1111_v52 = vmul.f32 -0.5, %v4205_v63  ;;  %v1114_v31 = vand.u32 2147483647, %v4205_v63  ;;  %v1162_v59 = vsel %vm1146_vm8, %v5126_v33, %v1026_v14 }
 0x237   : > { %v4209_v49 = vpop.eup %4208  ;;  %v1062_v13 = vsel %vm5236_vm10, %v1059_v56, %v1056_v22  ;;  %v1013_v33 = vadd.f32 1.0, %v1012_v41  ;;  %v5278_v25 = vmul.f32 0.01, %v1162_v59  ;;  %v1197_v14 = vpack.c.bf16 %v5259_v30, %v5250_v20 }
 0x238   : > { %v4211_v50 = vpop.eup %4210  ;;  %4218 = vlog2.f32 %v1108_v43  ;;  %v1126_v29 = vadd.f32 1.0, %v4209_v49  ;;  %v1129_v3 = vmul.f32 -0.5, %v4209_v49  ;;  %v1166_v4 = vsel %vm1150_vm9, %v5129_v37, %v1062_v13 }
 0x239   : > { %v1074_v46 = vmul.f32 0.6931472, %v4211_v50  ;;  %v1112_v34 = vadd.f32 1.0, %v1111_v52  ;;  %v1132_v16 = vand.u32 2147483647, %v4209_v49  ;;  %v1048_v37 = vmul.f32 -0.5, %v5204_v62 }
 0x23a   : > { %v4213_v12 = vpop.eup %4212  ;;  %4220 = vlog2.f32 %v1126_v29  ;;  %vm5280_vm0 = vcmp.lt.f32.partialorder %v1114_v31, 0.0004427343  ;;  %v5285_v28 = vmul.f32 0.01, %v1166_v4  ;;  %v1130_v26 = vadd.f32 1.0, %v1129_v3 }
 0x23b   : > { %v1092_v18 = vmul.f32 0.6931472, %v4213_v12  ;;  %v1080_v53 = vsel %vm5244_vm11, %v1077_v45, %v1074_v46  ;;  %4222 = vlog2.f32 %v1045_v61  ;;  %v4215_v17 = vpop.eup %4214  ;;  %v1113_v40 = vmul.f32 %v4205_v63, %v1112_v34 }
 0x23c   : > { %v1168_v38 = vsel %vm1152_vm12, %v5139_v48, %v1080_v53  ;;  %4224 = vpow2.f32 %v998_v19  ;;  %v1011_v15 = vmul.f32 0.6931472, %v4215_v17  ;;  %vm5295_vm3 = vcmp.lt.f32.partialorder %v1132_v16, 0.0004427343  ;;  %v5301_v45 = vpop.eup %4216 }
 0x23d   : > { %v1098_v57 = vsel %vm5253_vm13, %v1095_v51, %v1092_v18  ;;  %v1014_v56 = vmul.f32 %v5181_v39, %v1013_v33  ;;  %4226 = vlog2.f32 %v1027_v8  ;;  %v1049_v63 = vadd.f32 1.0, %v1048_v37 }
 0x23e   : > { %v1170_v48 = vsel %vm1154_vm14, %v5143_v54, %v1098_v57  ;;  %4228 = vlog2.f32 %v1063_v23  ;;  %v5311_v11 = vmul.f32 0.01, %v1168_v38  ;;  %v1030_v43 = vmul.f32 -0.5, %v5208_v47 }
 0x23f   : > { %v1017_v39 = vsel %vm5306_vm5, %v1014_v56, %v1011_v15  ;;  %v1131_v55 = vmul.f32 %v4209_v49, %v1130_v26  ;;  %v1051_v50 = vand.u32 2147483647, %v5204_v62  ;;  %v1033_v13 = vand.u32 2147483647, %v5208_v47 }
 0x240   : > { %v5320_v52 = vmul.f32 0.01, %v1170_v48  ;;  %v1066_v41 = vmul.f32 -0.5, %v5217_v10  ;;  %v1199_v46 = vpack.c.bf16 %v5285_v28, %v5278_v25  ;;  %v1081_v31 = vadd.f32 1.0, %v5227_v36 }
 0x241   : > { %v1050_v49 = vmul.f32 %v5204_v62, %v1049_v63  ;;  %v1161_v12 = vsel %vm1145_vm15, %v5124_v58, %v1017_v39  ;;  %v1117_v59 = vadd.f32 1.0, %v5301_v45  ;;  %vm1151_vm8 = vcmp.gt.f32.partialorder %v5137_v9, 20.0 }
 0x242   : > { %v4219_v5 = vpop.eup %4218  ;;  %v1031_v3 = vadd.f32 1.0, %v1030_v43  ;;  %v1069_v6 = vand.u32 2147483647, %v5217_v10  ;;  %4230 = vlog2.f32 %v1081_v31  ;;  %vm5339_vm9 = vcmp.lt.f32.partialorder %v1051_v50, 0.0004427343 }
 0x243   : > { %v1110_v54 = vmul.f32 0.6931472, %v4219_v5  ;;  %vm5343_vm10 = vcmp.lt.f32.partialorder %v1033_v13, 0.0004427343  ;;  %4232 = vlog2.f32 %v1117_v59  ;;  %v1177_v34 = vmul.f32 0.01, %v1161_v12 }
 0x244   : > { %v4221_v29 = vpop.eup %4220  ;;  %v1067_v16 = vadd.f32 1.0, %v1066_v41  ;;  %v1084_v27 = vmul.f32 -0.5, %v5227_v36  ;;  %v1120_v37 = vmul.f32 -0.5, %v5301_v45  ;;  %v1099_v17 = vadd.f32 1.0, %v5248_v24 }
 0x245   : > { %v1116_v61 = vsel %vm5280_vm0, %v1113_v40, %v1110_v54  ;;  %v1128_v51 = vmul.f32 0.6931472, %v4221_v29  ;;  %v4223_v4 = vpop.eup %4222  ;;  %v1032_v38 = vmul.f32 %v5208_v47, %v1031_v3  ;;  %vm5362_vm11 = vcmp.lt.f32.partialorder %v1069_v6, 0.0004427343 }
 0x246   : > { %v1172_v18 = vsel %vm1156_vm1, %v5165_v44, %v1116_v61  ;;  %v1047_v53 = vmul.f32 0.6931472, %v4223_v4  ;;  %v5349_v33 = vpop.eup %4224  ;;  %4234 = vlog2.f32 %v1099_v17  ;;  %v1068_v21 = vmul.f32 %v5217_v10, %v1067_v16  ;;  %v4099_v17 = vld [vmem:[%s7227_s2 + $0x18] sm:$0xff]  }
 0x247   : > { %v1134_v19 = vsel %vm5295_vm3, %v1131_v55, %v1128_v51  ;;  %v4227_v57 = vpop.eup %4226  ;;  %v5357_v26 = vmul.f32 0.01, %v1172_v18  ;;  %v1135_v63 = vadd.f32 1.0, %v5349_v33  ;;  %v1085_v5 = vadd.f32 1.0, %v1084_v27 }
 0x248   : > { %v1174_v44 = vsel %vm1158_vm4, %v5176_v35, %v1134_v19  ;;  %v1053_v8 = vsel %vm5339_vm9, %v1050_v49, %v1047_v53  ;;  %v4229_v23 = vpop.eup %4228  ;;  %v1029_v22 = vmul.f32 0.6931472, %v4227_v57  ;;  %v1087_v39 = vand.u32 2147483647, %v5227_v36 }
 0x249   : > { %v5366_v35 = vmul.f32 0.01, %v1174_v44  ;;  %v1165_v40 = vsel %vm1149_vm6, %v5132_v42, %v1053_v8  ;;  %v1065_v48 = vmul.f32 0.6931472, %v4229_v23  ;;  %v1121_v43 = vadd.f32 1.0, %v1120_v37 }
 0x24a   : > { %v1181_v56 = vmul.f32 0.01, %v1165_v40  ;;  %v1035_v47 = vsel %vm5343_vm10, %v1032_v38, %v1029_v22  ;;  %v1102_v50 = vmul.f32 -0.5, %v5248_v24  ;;  %v1123_v13 = vand.u32 2147483647, %v5301_v45 }
 0x24b   : > { %v1071_v55 = vsel %vm5362_vm11, %v1068_v21, %v1065_v48  ;;  %v1163_v42 = vsel %vm1147_vm7, %v5135_v32, %v1035_v47  ;;  %4236 = vlog2.f32 %v1135_v63  ;;  %v1201_v61 = vpack.c.bf16 %v5357_v26, %v5311_v11 }
 0x24c   : > { %v1198_v54 = vpack.c.bf16 %v1181_v56, %v1177_v34  ;;  %v1167_v10 = vsel %vm1151_vm8, %v5137_v9, %v1071_v55  ;;  %v4231_v41 = vpop.eup %4230  ;;  %v1179_v31 = vmul.f32 0.01, %v1163_v42  ;;  %v1203_v49 = vpack.c.bf16 %v5366_v35, %v5320_v52  ;;  %v1356_v35 = vpop.permute.xlu1 %1355 }
 0x24d   : > { %v1183_v29 = vmul.f32 0.01, %v1167_v10  ;;  %v4233_v32 = vpop.eup %4232  ;;  %v1083_v12 = vmul.f32 0.6931472, %v4231_v41  ;;  %v1086_v9 = vmul.f32 %v5227_v36, %v1085_v5  ;;  %vm1088_vm12 = vcmp.lt.f32.partialorder %v1087_v39, 0.0004427343 }
 0x24e   : > { %1221 = vmatprep.subr.bf16.mxu0 %v1198_v54  ;;  %v1138_v59 = vmul.f32 -0.5, %v5349_v33  ;;  %v1119_v3 = vmul.f32 0.6931472, %v4233_v32  ;;  %v1122_v6 = vmul.f32 %v5301_v45, %v1121_v43  ;;  %v1103_v4 = vadd.f32 1.0, %v1102_v50 }
 0x24f   : > { %1222 = vmatpush1.bf16.msra.mxu0 %v1197_v14  ;;  %v1200_v51 = vpack.c.bf16 %v1183_v29, %v1179_v31  ;;  %vm1153_vm13 = vcmp.gt.f32.partialorder %v5145_v60, 20.0  ;;  %v1089_v11 = vsel %vm1088_vm12, %v1086_v9, %v1083_v12  ;;  %vm1124_vm14 = vcmp.lt.f32.partialorder %v1123_v13, 0.0004427343 }
 0x250   : > { %v1105_v52 = vand.u32 2147483647, %v5248_v24  ;;  %vm1157_vm15 = vcmp.gt.f32.partialorder %v5188_v7, 20.0  ;;  %v1125_v20 = vsel %vm1124_vm14, %v1122_v6, %v1119_v3  ;;  %v1169_v36 = vsel %vm1153_vm13, %v5145_v60, %v1089_v11  ;;  %v4235_v30 = vpop.eup %4234 }
 0x251   : > { %1274 = vmatprep.subr.bf16.mxu1 %v1200_v51  ;;  %v1173_v45 = vsel %vm1157_vm15, %v5188_v7, %v1125_v20  ;;  %v1139_v14 = vadd.f32 1.0, %v1138_v59  ;;  %v1185_v18 = vmul.f32 0.01, %v1169_v36  ;;  %v1101_v58 = vmul.f32 0.6931472, %v4235_v30  ;;  %v4098_v7 = vld [vmem:[%s7227_s2 + $0x10] sm:$0xff]  }
 0x252   : > { %1275 = vmatpush1.bf16.msra.mxu1 %v1199_v46  ;;  %v1189_v62 = vmul.f32 0.01, %v1173_v45  ;;  %v1104_v19 = vmul.f32 %v5248_v24, %v1103_v4  ;;  %vm1106_vm0 = vcmp.lt.f32.partialorder %v1105_v52, 0.0004427343  ;;  %v1141_v53 = vand.u32 2147483647, %v5349_v33 }
 0x253   : > { %vm1155_vm1 = vcmp.gt.f32.partialorder %v5155_v2, 20.0  ;;  %v1140_v25 = vmul.f32 %v5349_v33, %v1139_v14  ;;  %vm1159_vm4 = vcmp.gt.f32.partialorder %v5241_v1, 20.0 }
 0x254   : > { %v1202_v34 = vpack.c.bf16 %v1189_v62, %v1185_v18  ;;  %v1107_v16 = vsel %vm1106_vm0, %v1104_v19, %v1101_v58  ;;  %vm1142_vm3 = vcmp.lt.f32.partialorder %v1141_v53, 0.0004427343 }
 0x255   : > { %v4237_v44 = vpop.eup %4236  ;;  %v1171_v28 = vsel %vm1155_vm1, %v5155_v2, %v1107_v16 }
 0x256   : > { %1223 = vmatprep.subr.bf16.mxu0 %v1202_v34  ;;  %v1137_v60 = vmul.f32 0.6931472, %v4237_v44  ;;  %v1187_v27 = vmul.f32 0.01, %v1171_v28 }
 0x257   : > { %1224 = vmatpush1.bf16.msra.mxu0 %v1201_v61 }
 0x258   : > { %v1143_v24 = vsel %vm1142_vm3, %v1140_v25, %v1137_v60 }
 0x259   : > { %v1175_v46 = vsel %vm1159_vm4, %v5241_v1, %v1143_v24  ;;  %v1351_v1 = vpop.permute.xlu0 %1350 }
 0x25a   : > { %v1191_v37 = vmul.f32 0.01, %v1175_v46  ;;  %3983 = vmatmul.mubr.msk.bf16.vlgmr.msra.gmra.mrb[24].mxu0 %vm782_vm2, %v4098_v7 }
 0x25b   : > { %1263 = vmatprep.mubr.bf16.mxu0 %v4630_v0 }
 0x25c   : > { %v1204_v33 = vpack.c.bf16 %v1191_v37, %v1187_v27 }
 0x25d   : > { %v5430_v48 = vpop.permute.xlu0 %1360 }
 0x25e   : > { %1276 = vmatprep.subr.bf16.mxu1 %v1204_v33 }
 0x25f   : > { %1277 = vmatpush1.bf16.msra.mxu1 %v1203_v49 }
 0x262   : > { %3985 = vmatmul.mubr.msk.bf16.vlgmr.msra.gmra.mrb[24].mxu1 %vm782_vm2, %v4098_v7  ;;  %3984 = vmatmul.mubr.msk.bf16.gmra.mrb[28].mxu0 %vm782_vm2, %v4099_v17 }
 0x263   : > { %1316 = vmatprep.mubr.bf16.mxu1 %v4630_v0  ;;  %1685 = vmatprep.mubr.bf16.mxu0 %v4630_v0 }
 0x26a   : > { %3986 = vmatmul.mubr.msk.bf16.gmra.mrb[28].mxu1 %vm782_vm2, %v4099_v17 }
 0x26b   : > { %1738 = vmatprep.mubr.bf16.mxu1 %v4630_v0 }
 0x32d   : > { %v1255_v2 = vpop.f32.mrb[24].mxu0 }
 0x32e   : > { %v1332_v57 = vmul.f32 100.0, %v1255_v2  ;;  %v1257_v26 = vpop.f32.mrb[25].mxu0 }
 0x32f   : > { %v1259_v8 = vpop.f32.mrb[26].mxu0  ;;  %v1333_v40 = vmul.f32 100.0, %v1257_v26 }
 0x330   : > { %v5425_v38 = vadd.f32 %v1351_v1, %v1332_v57  ;;  %v1336_v15 = vmul.f32 100.0, %v1259_v8  ;;  %v1261_v23 = vpop.f32.mrb[27].mxu0 }
 0x331   : > { %v5433_v5 = vadd.f32 %v1351_v1, %v1333_v40  ;;  %v1337_v41 = vmul.f32 100.0, %v1261_v23 }
 0x332   : > { %v1384_v22 = vmin.f32 %v5425_v38, 20.0  ;;  %v5428_v56 = vadd.f32 %v1356_v35, %v1336_v15  ;;  %v5473_v15 = vpop.permute.xlu1 %1365  ;;  %vm1576_vm6 = vcmp.gt.f32.partialorder %v5425_v38, 20.0 }
 0x333   : > { %v1385_v9 = vmin.f32 %v5433_v5, 20.0  ;;  %v5447_v11 = vadd.f32 %v1356_v35, %v1337_v41  ;;  %vm1577_vm15 = vcmp.gt.f32.partialorder %v5433_v5, 20.0 }
 0x334   : > { %v1400_v21 = vmul.f32 1.442695, %v1384_v22  ;;  %v1388_v63 = vmin.f32 %v5428_v56, 20.0  ;;  %vm1580_vm8 = vcmp.gt.f32.partialorder %v5428_v56, 20.0 }
 0x335   : > { %v1308_v47 = vpop.f32.mrb[24].mxu1  ;;  %v1265_v39 = vpop.f32.mrb[28].mxu0  ;;  %v1402_v30 = vmul.f32 1.442695, %v1385_v9  ;;  %v1389_v34 = vmin.f32 %v5447_v11, 20.0 }
 0x336   : > { %4238 = vpow2.f32 %v1400_v21  ;;  %v1334_v43 = vmul.f32 100.0, %v1308_v47  ;;  %v1310_v54 = vpop.f32.mrb[25].mxu1  ;;  %v1408_v55 = vmul.f32 1.442695, %v1388_v63  ;;  %v1340_v42 = vmul.f32 100.0, %v1265_v39  ;;  %v1267_v50 = vpop.f32.mrb[29].mxu0 }
 0x337   : > { %v1335_v10 = vmul.f32 100.0, %v1310_v54  ;;  %v1312_v13 = vpop.f32.mrb[26].mxu1  ;;  %v1269_v31 = vpop.f32.mrb[30].mxu0  ;;  %v1341_v51 = vmul.f32 100.0, %v1267_v50 }
 0x338   : > { %v5435_v29 = vadd.f32 %v1351_v1, %v1334_v43  ;;  %4240 = vpow2.f32 %v1408_v55  ;;  %v1338_v61 = vmul.f32 100.0, %v1312_v13  ;;  %v1314_v49 = vpop.f32.mrb[27].mxu1  ;;  %v5438_v32 = vadd.f32 %v5430_v48, %v1340_v42  ;;  %v5440_v12 = vpop.f32.mrb[31].mxu0 }
 0x339   : > { %v1339_v59 = vmul.f32 100.0, %v1314_v49  ;;  %v5449_v20 = vadd.f32 %v1351_v1, %v1335_v10  ;;  %v5455_v18 = vadd.f32 %v5430_v48, %v1341_v51  ;;  %v1344_v17 = vmul.f32 100.0, %v1269_v31 }
 0x33a   : > { %v1386_v3 = vmin.f32 %v5435_v29, 20.0  ;;  %v5444_v6 = vadd.f32 %v1356_v35, %v1338_v61  ;;  %v1392_v4 = vmin.f32 %v5438_v32, 20.0  ;;  %v1410_v1 = vmul.f32 1.442695, %v1389_v34 }
 0x33b   : > { %v5452_v45 = vadd.f32 %v1356_v35, %v1339_v59  ;;  %v1387_v60 = vmin.f32 %v5449_v20, 20.0  ;;  %v1393_v46 = vmin.f32 %v5455_v18, 20.0  ;;  %v5479_v22 = vadd.f32 %v5473_v15, %v1344_v17 }
 0x33c   : > { %v1404_v52 = vmul.f32 1.442695, %v1386_v3  ;;  %v1390_v36 = vmin.f32 %v5444_v6, 20.0  ;;  %v1416_v58 = vmul.f32 1.442695, %v1392_v4  ;;  %v1345_v61 = vmul.f32 100.0, %v5440_v12 }
 0x33d   : > { %v1318_v14 = vpop.f32.mrb[28].mxu1  ;;  %v1391_v24 = vmin.f32 %v5452_v45, 20.0  ;;  %v1406_v26 = vmul.f32 1.442695, %v1387_v60  ;;  %v1418_v35 = vmul.f32 1.442695, %v1393_v46 }
 0x33e   : > { %4242 = vpow2.f32 %v1404_v52  ;;  %v1412_v62 = vmul.f32 1.442695, %v1390_v36  ;;  %v1342_v19 = vmul.f32 100.0, %v1318_v14  ;;  %v1320_v53 = vpop.f32.mrb[29].mxu1  ;;  %v1396_v54 = vmin.f32 %v5479_v22, 20.0 }
 0x33f   : > { %v1322_v16 = vpop.f32.mrb[30].mxu1  ;;  %v1343_v33 = vmul.f32 100.0, %v1320_v53  ;;  %v1414_v23 = vmul.f32 1.442695, %v1391_v24  ;;  %v5509_v53 = vadd.f32 %v5473_v15, %v1345_v61  ;;  %vm1578_vm10 = vcmp.gt.f32.partialorder %v5435_v29, 20.0 }
 0x340   : > { %v5458_v44 = vpop.eup %4238  ;;  %4244 = vpow2.f32 %v1412_v62  ;;  %v5462_v25 = vadd.f32 %v5430_v48, %v1342_v19  ;;  %v5464_v7 = vpop.f32.mrb[31].mxu1  ;;  %v1346_v57 = vmul.f32 100.0, %v1322_v16  ;;  %v1424_v50 = vmul.f32 1.442695, %v1396_v54 }
 0x341   : > { %v1432_v28 = vadd.f32 1.0, %v5458_v44  ;;  %4246 = vpow2.f32 %v1402_v30  ;;  %v5476_v40 = vadd.f32 %v5430_v48, %v1343_v33  ;;  %v1435_v21 = vmul.f32 -0.5, %v5458_v44 }
 0x342   : > { %v5469_v27 = vpop.eup %4240  ;;  %4248 = vpow2.f32 %v1416_v58  ;;  %v1394_v37 = vmin.f32 %v5462_v25, 20.0  ;;  %v5483_v63 = vadd.f32 %v5473_v15, %v1346_v57  ;;  %v1438_v39 = vand.u32 2147483647, %v5458_v44 }
 0x343   : > { %4250 = vlog2.f32 %v1432_v28  ;;  %v1468_v2 = vadd.f32 1.0, %v5469_v27  ;;  %v1471_v43 = vmul.f32 -0.5, %v5469_v27  ;;  %v1395_v42 = vmin.f32 %v5476_v40, 20.0 }
 0x344   : > { %v1420_v8 = vmul.f32 1.442695, %v1394_v37  ;;  %v1398_v10 = vmin.f32 %v5483_v63, 20.0  ;;  %v1436_v41 = vadd.f32 1.0, %v1435_v21  ;;  %vm5499_vm5 = vcmp.lt.f32.partialorder %v1438_v39, 0.0004427343 }
 0x345   : > { %4252 = vlog2.f32 %v1468_v2  ;;  %v1472_v59 = vadd.f32 1.0, %v1471_v43  ;;  %v1474_v52 = vand.u32 2147483647, %v5469_v27  ;;  %v1422_v14 = vmul.f32 1.442695, %v1395_v42 }
 0x346   : > { %4254 = vpow2.f32 %v1420_v8  ;;  %v1428_v51 = vmul.f32 1.442695, %v1398_v10  ;;  %v1437_v19 = vmul.f32 %v5458_v44, %v1436_v41  ;;  %v1347_v28 = vmul.f32 100.0, %v5464_v7 }
 0x347   : > { %4256 = vpow2.f32 %v1410_v1  ;;  %v1473_v60 = vmul.f32 %v5469_v27, %v1472_v59  ;;  %vm5527_vm7 = vcmp.lt.f32.partialorder %v1474_v52, 0.0004427343  ;;  %vm1582_vm12 = vcmp.gt.f32.partialorder %v5444_v6, 20.0 }
 0x348   : > { %v5485_v47 = vpop.eup %4242  ;;  %4258 = vpow2.f32 %v1406_v26  ;;  %v5538_v39 = vadd.f32 %v5473_v15, %v1347_v28  ;;  %vm1584_vm14 = vcmp.gt.f32.partialorder %v5438_v32, 20.0  ;;  %vm1586_vm1 = vcmp.gt.f32.partialorder %v5462_v25, 20.0 }
 0x349   : > { %v1450_v48 = vadd.f32 1.0, %v5485_v47  ;;  %4260 = vpow2.f32 %v1414_v23  ;;  %v1453_v4 = vmul.f32 -0.5, %v5485_v47  ;;  %v1456_v33 = vand.u32 2147483647, %v5485_v47 }
 0x34a   : > { %v5491_v55 = vpop.eup %4244  ;;  %4262 = vpow2.f32 %v1418_v35  ;;  %v1397_v23 = vmin.f32 %v5509_v53, 20.0 }
 0x34b   : > { %v5495_v13 = vpop.eup %4246  ;;  %4264 = vlog2.f32 %v1450_v48  ;;  %v1486_v31 = vadd.f32 1.0, %v5491_v55  ;;  %v1489_v30 = vmul.f32 -0.5, %v5491_v55  ;;  %v1454_v37 = vadd.f32 1.0, %v1453_v4 }
 0x34c   : > { %v4249_v49 = vpop.eup %4248  ;;  %4266 = vpow2.f32 %v1424_v50  ;;  %v1441_v24 = vadd.f32 1.0, %v5495_v13  ;;  %v1492_v44 = vand.u32 2147483647, %v5491_v55  ;;  %vm5541_vm9 = vcmp.lt.f32.partialorder %v1456_v33, 0.0004427343 }
 0x34d   : > { %v4251_v3 = vpop.eup %4250  ;;  %4268 = vlog2.f32 %v1486_v31  ;;  %v1504_v36 = vadd.f32 1.0, %v4249_v49  ;;  %v1507_v12 = vmul.f32 -0.5, %v4249_v49  ;;  %v1490_v1 = vadd.f32 1.0, %v1489_v30 }
 0x34e   : > { %4270 = vpow2.f32 %v1428_v51  ;;  %v1434_v58 = vmul.f32 0.6931472, %v4251_v3  ;;  %v1510_v26 = vand.u32 2147483647, %v4249_v49  ;;  %v1455_v54 = vmul.f32 %v5485_v47, %v1454_v37 }
 0x34f   : > { %v4253_v62 = vpop.eup %4252  ;;  %4272 = vlog2.f32 %v1504_v36  ;;  %v1508_v57 = vadd.f32 1.0, %v1507_v12  ;;  %vm5546_vm11 = vcmp.lt.f32.partialorder %v1492_v44, 0.0004427343  ;;  %v1491_v47 = vmul.f32 %v5491_v55, %v1490_v1 }
 0x350   : > { %v5511_v34 = vpop.eup %4254  ;;  %v1470_v16 = vmul.f32 0.6931472, %v4253_v62  ;;  %4274 = vpow2.f32 %v1422_v14  ;;  %v1440_v7 = vsel %vm5499_vm5, %v1437_v19, %v1434_v58  ;;  %vm5556_vm13 = vcmp.lt.f32.partialorder %v1510_v26, 0.0004427343 }
 0x351   : > { %v5516_v46 = vpop.eup %4256  ;;  %v1522_v17 = vadd.f32 1.0, %v5511_v34  ;;  %v1525_v50 = vmul.f32 -0.5, %v5511_v34  ;;  %v1592_v10 = vsel %vm1576_vm6, %v5425_v38, %v1440_v7  ;;  %v1509_v41 = vmul.f32 %v4249_v49, %v1508_v57 }
 0x352   : > { %v5521_v2 = vpop.eup %4258  ;;  %v1476_v21 = vsel %vm5527_vm7, %v1473_v60, %v1470_v16  ;;  %v1426_v3 = vmul.f32 1.442695, %v1397_v23  ;;  %v1528_v38 = vand.u32 2147483647, %v5511_v34  ;;  %v1399_v55 = vmin.f32 %v5538_v39, 20.0 }
 0x353   : > { %v5523_v27 = vpop.eup %4260  ;;  %4276 = vlog2.f32 %v1522_v17  ;;  %v1596_v59 = vsel %vm1580_vm8, %v5428_v56, %v1476_v21  ;;  %v1444_v49 = vmul.f32 -0.5, %v5495_v13  ;;  %v1526_v30 = vadd.f32 1.0, %v1525_v50 }
 0x354   : > { %v5532_v35 = vpop.eup %4262  ;;  %4278 = vlog2.f32 %v1441_v24  ;;  %v1447_v14 = vand.u32 2147483647, %v5495_v13  ;;  %v5570_v56 = vmul.f32 0.01, %v1592_v10  ;;  %v5572_v62 = vmul.f32 0.01, %v1596_v59 }
 0x355   : > { %v4265_v43 = vpop.eup %4264  ;;  %v1477_v19 = vadd.f32 1.0, %v5516_v46  ;;  %v1430_v33 = vmul.f32 1.442695, %v1399_v55  ;;  %v1445_v44 = vadd.f32 1.0, %v1444_v49  ;;  %v1527_v1 = vmul.f32 %v5511_v34, %v1526_v30 }
 0x356   : > { %v4267_v15 = vpop.eup %4266  ;;  %v1452_v9 = vmul.f32 0.6931472, %v4265_v43  ;;  %vm5584_vm0 = vcmp.lt.f32.partialorder %v1528_v38, 0.0004427343  ;;  %vm5589_vm3 = vcmp.lt.f32.partialorder %v1447_v14, 0.0004427343  ;;  %v1629_v49 = vpack.c.bf16 %v5572_v62, %v5570_v56 }
 0x357   : > { %v4269_v61 = vpop.eup %4268  ;;  %v1540_v51 = vadd.f32 1.0, %v4267_v15  ;;  %v1543_v12 = vmul.f32 -0.5, %v4267_v15  ;;  %v1546_v37 = vand.u32 2147483647, %v4267_v15  ;;  %v1459_v42 = vadd.f32 1.0, %v5521_v2 }
 0x358   : > { %v5563_v4 = vpop.eup %4270  ;;  %v1488_v52 = vmul.f32 0.6931472, %v4269_v61  ;;  %v1458_v16 = vsel %vm5541_vm9, %v1455_v54, %v1452_v9  ;;  %vm1588_vm5 = vcmp.gt.f32.partialorder %v5479_v22, 20.0  ;;  %vm1590_vm6 = vcmp.gt.f32.partialorder %v5483_v63, 20.0 }
 0x359   : > { %v4273_v36 = vpop.eup %4272  ;;  %4280 = vlog2.f32 %v1540_v51  ;;  %v1558_v58 = vadd.f32 1.0, %v5563_v4  ;;  %v1544_v26 = vadd.f32 1.0, %v1543_v12  ;;  %v1594_v23 = vsel %vm1578_vm10, %v5435_v29, %v1458_v16 }
 0x35a   : > { %v1494_v60 = vsel %vm5546_vm11, %v1491_v47, %v1488_v52  ;;  %v1506_v28 = vmul.f32 0.6931472, %v4273_v36  ;;  %4282 = vpow2.f32 %v1426_v3  ;;  %v5580_v24 = vpop.eup %4274  ;;  %v1561_v21 = vmul.f32 -0.5, %v5563_v4 }
 0x35b   : > { %4284 = vlog2.f32 %v1558_v58  ;;  %v1598_v34 = vsel %vm1582_vm12, %v5444_v6, %v1494_v60  ;;  %vm5603_vm4 = vcmp.lt.f32.partialorder %v1546_v37, 0.0004427343  ;;  %v1446_v29 = vmul.f32 %v5495_v13, %v1445_v44 }
 0x35c   : > { %4286 = vlog2.f32 %v1477_v19  ;;  %v1512_v43 = vsel %vm5556_vm13, %v1509_v41, %v1506_v28  ;;  %v1480_v6 = vmul.f32 -0.5, %v5516_v46  ;;  %v5610_v10 = vmul.f32 0.01, %v1594_v23 }
 0x35d   : > { %v4277_v17 = vpop.eup %4276  ;;  %4288 = vpow2.f32 %v1430_v33  ;;  %v5612_v47 = vmul.f32 0.01, %v1598_v34  ;;  %v1545_v41 = vmul.f32 %v4267_v15, %v1544_v26  ;;  %v1600_v31 = vsel %vm1584_vm14, %v5438_v32, %v1512_v43 }
 0x35e   : > { %v4279_v8 = vpop.eup %4278  ;;  %v1524_v54 = vmul.f32 0.6931472, %v4277_v17  ;;  %4290 = vlog2.f32 %v1459_v42  ;;  %v1562_v61 = vadd.f32 1.0, %v1561_v21  ;;  %v1564_v9 = vand.u32 2147483647, %v5563_v4 }
 0x35f   : > { %v1443_v48 = vmul.f32 0.6931472, %v4279_v8  ;;  %vm1581_vm7 = vcmp.gt.f32.partialorder %v5447_v11, 20.0  ;;  %v1483_v15 = vand.u32 2147483647, %v5516_v46  ;;  %v1462_v3 = vmul.f32 -0.5, %v5521_v2 }
 0x360   : > { %v1530_v51 = vsel %vm5584_vm0, %v1527_v1, %v1524_v54  ;;  %v1495_v52 = vadd.f32 1.0, %v5523_v27  ;;  %v1481_v32 = vadd.f32 1.0, %v1480_v6  ;;  %v1465_v55 = vand.u32 2147483647, %v5521_v2 }
 0x361   : > { %v1449_v13 = vsel %vm5589_vm3, %v1446_v29, %v1443_v48  ;;  %v1631_v12 = vpack.c.bf16 %v5612_v47, %v5610_v10  ;;  %v1513_v14 = vadd.f32 1.0, %v5532_v35  ;;  %v1602_v19 = vsel %vm1586_vm1, %v5462_v25, %v1530_v51  ;;  %v4100_v10 = vld [vmem:[%s7227_s2 + $0x20] sm:$0xff]  }
 0x362   : > { %v1593_v30 = vsel %vm1577_vm15, %v5433_v5, %v1449_v13  ;;  %4292 = vlog2.f32 %v1495_v52  ;;  %v1563_v60 = vmul.f32 %v5563_v4, %v1562_v61  ;;  %vm5644_vm8 = vcmp.lt.f32.partialorder %v1564_v9, 0.0004427343 }
 0x363   : > { %v4281_v59 = vpop.eup %4280  ;;  %v1463_v37 = vadd.f32 1.0, %v1462_v3  ;;  %v1498_v33 = vmul.f32 -0.5, %v5523_v27  ;;  %4294 = vlog2.f32 %v1513_v14  ;;  %vm1579_vm9 = vcmp.gt.f32.partialorder %v5449_v20, 20.0 }
 0x364   : > { %v1542_v38 = vmul.f32 0.6931472, %v4281_v59  ;;  %v5630_v36 = vpop.eup %4282  ;;  %v1482_v17 = vmul.f32 %v5516_v46, %v1481_v32  ;;  %vm5651_vm10 = vcmp.lt.f32.partialorder %v1483_v15, 0.0004427343  ;;  %v1609_v1 = vmul.f32 0.01, %v1593_v30 }
 0x365   : > { %v4285_v58 = vpop.eup %4284  ;;  %v1549_v4 = vadd.f32 1.0, %v5630_v36  ;;  %vm5661_vm11 = vcmp.lt.f32.partialorder %v1465_v55, 0.0004427343  ;;  %vm1583_vm12 = vcmp.gt.f32.partialorder %v5452_v45, 20.0  ;;  %v1516_v34 = vmul.f32 -0.5, %v5532_v35 }
 0x366   : > { %v1548_v16 = vsel %vm5603_vm4, %v1545_v41, %v1542_v38  ;;  %v1560_v5 = vmul.f32 0.6931472, %v4285_v58  ;;  %v4287_v44 = vpop.eup %4286  ;;  %v1464_v54 = vmul.f32 %v5521_v2, %v1463_v37  ;;  %v1499_v48 = vadd.f32 1.0, %v1498_v33 }
 0x367   : > { %v1604_v57 = vsel %vm1588_vm5, %v5479_v22, %v1548_v16  ;;  %v1479_v7 = vmul.f32 0.6931472, %v4287_v44  ;;  %v5665_v46 = vpop.eup %4288  ;;  %4296 = vlog2.f32 %v1549_v4  ;;  %v1531_v22 = vadd.f32 1.0, %v5580_v24 }
 0x368   : > { %v1566_v26 = vsel %vm5644_vm8, %v1563_v60, %v1560_v5  ;;  %v4291_v21 = vpop.eup %4290  ;;  %v1501_v42 = vand.u32 2147483647, %v5523_v27  ;;  %v5677_v50 = vmul.f32 0.01, %v1604_v57  ;;  %v1552_v61 = vmul.f32 -0.5, %v5630_v36 }
 0x369   : > { %v1606_v23 = vsel %vm1590_vm6, %v5483_v63, %v1566_v26  ;;  %v1485_v43 = vsel %vm5651_vm10, %v1482_v17, %v1479_v7  ;;  %v1461_v29 = vmul.f32 0.6931472, %v4291_v21  ;;  %4298 = vlog2.f32 %v1531_v22 }
 0x36a   : > { %v1597_v63 = vsel %vm1581_vm7, %v5447_v11, %v1485_v43  ;;  %v5682_v6 = vmul.f32 0.01, %v1606_v23  ;;  %v1567_v9 = vadd.f32 1.0, %v5665_v46  ;;  %v5686_v13 = vmul.f32 0.01, %v1600_v31 }
 0x36b   : > { %v1613_v41 = vmul.f32 0.01, %v1597_v63  ;;  %v5688_v2 = vmul.f32 0.01, %v1602_v19  ;;  %v1467_v59 = vsel %vm5661_vm11, %v1464_v54, %v1461_v29  ;;  %v1517_v51 = vadd.f32 1.0, %v1516_v34 }
 0x36c   : > { %v4293_v15 = vpop.eup %4292  ;;  %v1519_v11 = vand.u32 2147483647, %v5532_v35  ;;  %v1534_v52 = vmul.f32 -0.5, %v5580_v24  ;;  %4300 = vlog2.f32 %v1567_v9  ;;  %v1500_v32 = vmul.f32 %v5523_v27, %v1499_v48  ;;  %v1788_v9 = vpop.permute.xlu1 %1787 }
 0x36d   : > { %v1630_v3 = vpack.c.bf16 %v1613_v41, %v1609_v1  ;;  %v1497_v38 = vmul.f32 0.6931472, %v4293_v15  ;;  %vm1502_vm13 = vcmp.lt.f32.partialorder %v1501_v42, 0.0004427343  ;;  %v1555_v31 = vand.u32 2147483647, %v5630_v36  ;;  %v4295_v55 = vpop.eup %4294 }
 0x36e   : > { %v1595_v30 = vsel %vm1579_vm9, %v5449_v20, %v1467_v59  ;;  %v1553_v14 = vadd.f32 1.0, %v1552_v61  ;;  %v1633_v58 = vpack.c.bf16 %v5677_v50, %v5686_v13  ;;  %v1635_v19 = vpack.c.bf16 %v5682_v6, %v5688_v2  ;;  %v1783_v50 = vpop.permute.xlu0 %1782 }
 0x36f   : > { %1653 = vmatprep.subr.bf16.mxu0 %v1630_v3  ;;  %v1503_v16 = vsel %vm1502_vm13, %v1500_v32, %v1497_v38  ;;  %v1515_v27 = vmul.f32 0.6931472, %v4295_v55  ;;  %v1518_v60 = vmul.f32 %v5532_v35, %v1517_v51  ;;  %v1570_v28 = vmul.f32 -0.5, %v5665_v46 }
 0x370   : > { %1654 = vmatpush1.bf16.msra.mxu0 %v1629_v49  ;;  %v1599_v20 = vsel %vm1583_vm12, %v5452_v45, %v1503_v16  ;;  %vm1520_vm14 = vcmp.lt.f32.partialorder %v1519_v11, 0.0004427343  ;;  %v1535_v5 = vadd.f32 1.0, %v1534_v52  ;;  %v1611_v33 = vmul.f32 0.01, %v1595_v30 }
 0x371   : > { %v4297_v37 = vpop.eup %4296  ;;  %v1615_v44 = vmul.f32 0.01, %v1599_v20  ;;  %v1521_v17 = vsel %vm1520_vm14, %v1518_v60, %v1515_v27  ;;  %v1537_v25 = vand.u32 2147483647, %v5580_v24  ;;  %vm1585_vm15 = vcmp.gt.f32.partialorder %v5455_v18, 20.0 }
 0x372   : > { %vm1589_vm0 = vcmp.gt.f32.partialorder %v5509_v53, 20.0  ;;  %v1551_v56 = vmul.f32 0.6931472, %v4297_v37  ;;  %v1554_v35 = vmul.f32 %v5630_v36, %v1553_v14  ;;  %vm1556_vm1 = vcmp.lt.f32.partialorder %v1555_v31, 0.0004427343 }
 0x373   : > { %v4299_v62 = vpop.eup %4298  ;;  %v1632_v49 = vpack.c.bf16 %v1615_v44, %v1611_v33  ;;  %v1601_v45 = vsel %vm1585_vm15, %v5455_v18, %v1521_v17  ;;  %v1571_v1 = vadd.f32 1.0, %v1570_v28  ;;  %v1536_v26 = vmul.f32 %v5580_v24, %v1535_v5 }
 0x374   : > { %v1557_v4 = vsel %vm1556_vm1, %v1554_v35, %v1551_v56  ;;  %v1533_v57 = vmul.f32 0.6931472, %v4299_v62  ;;  %v1573_v7 = vand.u32 2147483647, %v5665_v46  ;;  %vm1538_vm3 = vcmp.lt.f32.partialorder %v1537_v25, 0.0004427343  ;;  %v1793_v62 = vpop.permute.xlu0 %1792 }
 0x375   : > { %1706 = vmatprep.subr.bf16.mxu1 %v1632_v49  ;;  %v1605_v8 = vsel %vm1589_vm0, %v5509_v53, %v1557_v4  ;;  %v1617_v36 = vmul.f32 0.01, %v1601_v45  ;;  %vm1587_vm4 = vcmp.gt.f32.partialorder %v5476_v40, 20.0  ;;  %v1572_v21 = vmul.f32 %v5665_v46, %v1571_v1 }
 0x376   : > { %v4301_v23 = vpop.eup %4300  ;;  %1707 = vmatpush1.bf16.msra.mxu1 %v1631_v12  ;;  %v1621_v34 = vmul.f32 0.01, %v1605_v8  ;;  %v1539_v22 = vsel %vm1538_vm3, %v1536_v26, %v1533_v57  ;;  %vm1574_vm5 = vcmp.lt.f32.partialorder %v1573_v7, 0.0004427343  ;;  %vm1591_vm6 = vcmp.gt.f32.partialorder %v5538_v39, 20.0 }
 0x377   : > { %v1569_v18 = vmul.f32 0.6931472, %v4301_v23  ;;  %v1603_v43 = vsel %vm1587_vm4, %v5476_v40, %v1539_v22  ;;  %v4101_v40 = vld [vmem:[%s7227_s2 + $0x28] sm:$0xff]  }
 0x378   : > { %v1634_v24 = vpack.c.bf16 %v1621_v34, %v1617_v36  ;;  %v1619_v47 = vmul.f32 0.01, %v1603_v43 }
 0x379   : > { %v1575_v53 = vsel %vm1574_vm5, %v1572_v21, %v1569_v18 }
 0x37a   : > { %1655 = vmatprep.subr.bf16.mxu0 %v1634_v24  ;;  %v1607_v54 = vsel %vm1591_vm6, %v5538_v39, %v1575_v53 }
 0x37b   : > { %v1623_v12 = vmul.f32 0.01, %v1607_v54  ;;  %1656 = vmatpush1.bf16.msra.mxu0 %v1633_v58 }
 0x37d   : > { %v1636_v48 = vpack.c.bf16 %v1623_v12, %v1619_v47 }
 0x37e   : > { %3997 = vmatmul.mubr.msk.bf16.vlgmr.msra.gmra.mrb[32].mxu0 %vm782_vm2, %v4100_v10 }
 0x37f   : > { %1708 = vmatprep.subr.bf16.mxu1 %v1636_v48  ;;  %1695 = vmatprep.mubr.bf16.mxu0 %v4630_v0 }
 0x380   : > { %1709 = vmatpush1.bf16.msra.mxu1 %v1635_v19 }
 0x383   : > { %3999 = vmatmul.mubr.msk.bf16.vlgmr.msra.gmra.mrb[32].mxu1 %vm782_vm2, %v4100_v10 }
 0x384   : > { %1748 = vmatprep.mubr.bf16.mxu1 %v4630_v0 }
 0x386   : > { %3998 = vmatmul.mubr.msk.bf16.gmra.mrb[36].mxu0 %vm782_vm2, %v4101_v40 }
 0x387   : > { %2117 = vmatprep.mubr.bf16.mxu0 %v4630_v0 }
 0x38b   : > { %4000 = vmatmul.mubr.msk.bf16.gmra.mrb[36].mxu1 %vm782_vm2, %v4101_v40 }
 0x38c   : > { %2170 = vmatprep.mubr.bf16.mxu1 %v4630_v0 }
 0x451   : > { %v1687_v39 = vpop.f32.mrb[32].mxu0 }
 0x452   : > { %v1764_v46 = vmul.f32 100.0, %v1687_v39  ;;  %v1689_v42 = vpop.f32.mrb[33].mxu0 }
 0x453   : > { %v1691_v63 = vpop.f32.mrb[34].mxu0  ;;  %v1765_v6 = vmul.f32 100.0, %v1689_v42 }
 0x454   : > { %v5741_v29 = vadd.f32 %v1783_v50, %v1764_v46  ;;  %v1768_v41 = vmul.f32 100.0, %v1691_v63  ;;  %v1693_v61 = vpop.f32.mrb[35].mxu0 }
 0x455   : > { %v1769_v13 = vmul.f32 100.0, %v1693_v61  ;;  %v5746_v52 = vadd.f32 %v1783_v50, %v1765_v6 }
 0x456   : > { %v1816_v2 = vmin.f32 %v5741_v29, 20.0  ;;  %v1740_v59 = vpop.f32.mrb[32].mxu1  ;;  %v5744_v51 = vadd.f32 %v1788_v9, %v1768_v41  ;;  %v1798_v41 = vpop.permute.xlu1 %1797  ;;  %vm2008_vm8 = vcmp.gt.f32.partialorder %v5741_v29, 20.0 }
 0x457   : > { %v1766_v15 = vmul.f32 100.0, %v1740_v59  ;;  %v1742_v3 = vpop.f32.mrb[33].mxu1  ;;  %v5751_v30 = vadd.f32 %v1788_v9, %v1769_v13  ;;  %v1817_v5 = vmin.f32 %v5746_v52, 20.0 }
 0x458   : > { %v1832_v11 = vmul.f32 1.442695, %v1816_v2  ;;  %v1820_v38 = vmin.f32 %v5744_v51, 20.0  ;;  %v1744_v32 = vpop.f32.mrb[34].mxu1  ;;  %v1767_v60 = vmul.f32 100.0, %v1742_v3  ;;  %vm2012_vm10 = vcmp.gt.f32.partialorder %v5744_v51, 20.0 }
 0x459   : > { %v5749_v31 = vadd.f32 %v1783_v50, %v1766_v15  ;;  %v1770_v55 = vmul.f32 100.0, %v1744_v32  ;;  %v1746_v14 = vpop.f32.mrb[35].mxu1  ;;  %v1697_v58 = vpop.f32.mrb[36].mxu0  ;;  %v1821_v17 = vmin.f32 %v5751_v30, 20.0  ;;  %v1834_v57 = vmul.f32 1.442695, %v1817_v5 }
 0x45a   : > { %4302 = vpow2.f32 %v1832_v11  ;;  %v1840_v19 = vmul.f32 1.442695, %v1820_v38  ;;  %v1699_v16 = vpop.f32.mrb[37].mxu0  ;;  %v1771_v25 = vmul.f32 100.0, %v1746_v14  ;;  %v1772_v56 = vmul.f32 100.0, %v1697_v58 }
 0x45b   : > { %v1818_v27 = vmin.f32 %v5749_v31, 20.0  ;;  %v5754_v28 = vadd.f32 %v1788_v9, %v1770_v55  ;;  %v1701_v20 = vpop.f32.mrb[38].mxu0  ;;  %v5761_v49 = vadd.f32 %v1783_v50, %v1767_v60  ;;  %v1773_v7 = vmul.f32 100.0, %v1699_v16 }
 0x45c   : > { %4304 = vpow2.f32 %v1840_v19  ;;  %v5757_v37 = vpop.f32.mrb[39].mxu0  ;;  %v5763_v26 = vadd.f32 %v1793_v62, %v1772_v56  ;;  %v1842_v23 = vmul.f32 1.442695, %v1821_v17  ;;  %v5765_v36 = vadd.f32 %v1788_v9, %v1771_v25 }
 0x45d   : > { %v1836_v33 = vmul.f32 1.442695, %v1818_v27  ;;  %v1822_v44 = vmin.f32 %v5754_v28, 20.0  ;;  %v1819_v24 = vmin.f32 %v5761_v49, 20.0  ;;  %v5772_v10 = vadd.f32 %v1793_v62, %v1773_v7 }
 0x45e   : > { %v1750_v35 = vpop.f32.mrb[36].mxu1  ;;  %v1824_v18 = vmin.f32 %v5763_v26, 20.0  ;;  %v1823_v12 = vmin.f32 %v5765_v36, 20.0  ;;  %v1776_v48 = vmul.f32 100.0, %v1701_v20  ;;  %v1777_v56 = vmul.f32 100.0, %v5757_v37 }
 0x45f   : > { %4306 = vpow2.f32 %v1836_v33  ;;  %v1844_v45 = vmul.f32 1.442695, %v1822_v44  ;;  %v1774_v1 = vmul.f32 100.0, %v1750_v35  ;;  %v1752_v4 = vpop.f32.mrb[37].mxu1  ;;  %v1838_v63 = vmul.f32 1.442695, %v1819_v24 }
 0x460   : > { %v1754_v8 = vpop.f32.mrb[38].mxu1  ;;  %v1775_v21 = vmul.f32 100.0, %v1752_v4  ;;  %v1848_v54 = vmul.f32 1.442695, %v1824_v18  ;;  %v1825_v61 = vmin.f32 %v5772_v10, 20.0  ;;  %v5783_v2 = vadd.f32 %v1798_v41, %v1776_v48 }
 0x461   : > { %4308 = vpow2.f32 %v1844_v45  ;;  %v5767_v34 = vadd.f32 %v1793_v62, %v1774_v1  ;;  %v1756_v22 = vpop.f32.mrb[39].mxu1  ;;  %v1778_v42 = vmul.f32 100.0, %v1754_v8  ;;  %v1846_v15 = vmul.f32 1.442695, %v1823_v12 }
 0x462   : > { %4310 = vpow2.f32 %v1834_v57  ;;  %v5777_v46 = vadd.f32 %v1793_v62, %v1775_v21  ;;  %v1828_v55 = vmin.f32 %v5783_v2, 20.0  ;;  %v1850_v14 = vmul.f32 1.442695, %v1825_v61 }
 0x463   : > { %v1826_v43 = vmin.f32 %v5767_v34, 20.0  ;;  %4312 = vpow2.f32 %v1842_v23  ;;  %v5787_v11 = vadd.f32 %v1798_v41, %v1778_v42  ;;  %v1779_v8 = vmul.f32 100.0, %v1756_v22 }
 0x464   : > { %v4303_v53 = vpop.eup %4302  ;;  %4314 = vpow2.f32 %v1848_v54  ;;  %v1827_v3 = vmin.f32 %v5777_v46, 20.0  ;;  %v1856_v5 = vmul.f32 1.442695, %v1828_v55  ;;  %v5811_v24 = vadd.f32 %v1798_v41, %v1777_v56 }
 0x465   : > { %v1864_v47 = vadd.f32 1.0, %v4303_v53  ;;  %v1852_v39 = vmul.f32 1.442695, %v1826_v43  ;;  %v1867_v50 = vmul.f32 -0.5, %v4303_v53  ;;  %v1870_v13 = vand.u32 2147483647, %v4303_v53 }
 0x466   : > { %v5775_v40 = vpop.eup %4304  ;;  %v1854_v20 = vmul.f32 1.442695, %v1827_v3  ;;  %v1830_v33 = vmin.f32 %v5787_v11, 20.0  ;;  %vm2010_vm11 = vcmp.gt.f32.partialorder %v5749_v31, 20.0  ;;  %vm2014_vm13 = vcmp.gt.f32.partialorder %v5754_v28, 20.0 }
 0x467   : > { %4316 = vlog2.f32 %v1864_v47  ;;  %v1900_v6 = vadd.f32 1.0, %v5775_v40  ;;  %v1868_v32 = vadd.f32 1.0, %v1867_v50  ;;  %vm5792_vm7 = vcmp.lt.f32.partialorder %v1870_v13, 0.0004427343 }
 0x468   : > { %4318 = vpow2.f32 %v1852_v39  ;;  %v1903_v19 = vmul.f32 -0.5, %v5775_v40  ;;  %v1906_v16 = vand.u32 2147483647, %v5775_v40  ;;  %v1860_v1 = vmul.f32 1.442695, %v1830_v33 }
 0x469   : > { %v5781_v9 = vpop.eup %4306  ;;  %4320 = vlog2.f32 %v1900_v6  ;;  %v1869_v17 = vmul.f32 %v4303_v53, %v1868_v32  ;;  %v1829_v50 = vmin.f32 %v5811_v24, 20.0  ;;  %vm2016_vm0 = vcmp.gt.f32.partialorder %v5763_v26, 20.0 }
 0x46a   : > { %v1882_v59 = vadd.f32 1.0, %v5781_v9  ;;  %4322 = vpow2.f32 %v1838_v63  ;;  %v1885_v25 = vmul.f32 -0.5, %v5781_v9  ;;  %v1888_v62 = vand.u32 2147483647, %v5781_v9 }
 0x46b   : > { %v5789_v38 = vpop.eup %4308  ;;  %v1904_v57 = vadd.f32 1.0, %v1903_v19  ;;  %vm5813_vm9 = vcmp.lt.f32.partialorder %v1906_v16, 0.0004427343  ;;  %v5826_v63 = vadd.f32 %v1798_v41, %v1779_v8  ;;  %v1858_v19 = vmul.f32 1.442695, %v1829_v50 }
 0x46c   : > { %4324 = vlog2.f32 %v1882_v59  ;;  %v1918_v27 = vadd.f32 1.0, %v5789_v38  ;;  %v5799_v60 = vpop.eup %4310  ;;  %v1921_v45 = vmul.f32 -0.5, %v5789_v38  ;;  %v1886_v43 = vadd.f32 1.0, %v1885_v25 }
 0x46d   : > { %4326 = vpow2.f32 %v1846_v15  ;;  %v5803_v44 = vpop.eup %4312  ;;  %v1924_v12 = vand.u32 2147483647, %v5789_v38  ;;  %vm5828_vm12 = vcmp.lt.f32.partialorder %v1888_v62, 0.0004427343  ;;  %v1905_v13 = vmul.f32 %v5775_v40, %v1904_v57 }
 0x46e   : > { %4328 = vlog2.f32 %v1918_v27  ;;  %v4315_v35 = vpop.eup %4314  ;;  %v1922_v47 = vadd.f32 1.0, %v1921_v45  ;;  %v1873_v15 = vadd.f32 1.0, %v5799_v60  ;;  %vm2018_vm3 = vcmp.gt.f32.partialorder %v5767_v34, 20.0 }
 0x46f   : > { %4330 = vpow2.f32 %v1856_v5  ;;  %v1936_v7 = vadd.f32 1.0, %v4315_v35  ;;  %v1939_v21 = vmul.f32 -0.5, %v4315_v35  ;;  %v1942_v48 = vand.u32 2147483647, %v4315_v35 }
 0x470   : > { %4332 = vpow2.f32 %v1850_v14  ;;  %v1887_v14 = vmul.f32 %v5781_v9, %v1886_v43  ;;  %vm5842_vm14 = vcmp.lt.f32.partialorder %v1924_v12, 0.0004427343  ;;  %vm2020_vm5 = vcmp.gt.f32.partialorder %v5783_v2, 20.0 }
 0x471   : > { %v4317_v4 = vpop.eup %4316  ;;  %4334 = vpow2.f32 %v1860_v1  ;;  %v1940_v59 = vadd.f32 1.0, %v1939_v21  ;;  %vm5850_vm15 = vcmp.lt.f32.partialorder %v1942_v48, 0.0004427343  ;;  %v1876_v21 = vmul.f32 -0.5, %v5799_v60 }
 0x472   : > { %v5809_v23 = vpop.eup %4318  ;;  %v1866_v18 = vmul.f32 0.6931472, %v4317_v4  ;;  %4336 = vlog2.f32 %v1936_v7 }
 0x473   : > { %v4321_v37 = vpop.eup %4320  ;;  %v1954_v54 = vadd.f32 1.0, %v5809_v23  ;;  %v1957_v41 = vmul.f32 -0.5, %v5809_v23  ;;  %v1960_v40 = vand.u32 2147483647, %v5809_v23  ;;  %v1941_v25 = vmul.f32 %v4315_v35, %v1940_v59 }
 0x474   : > { %v1872_v22 = vsel %vm5792_vm7, %v1869_v17, %v1866_v18  ;;  %v5822_v39 = vpop.eup %4322  ;;  %v1902_v42 = vmul.f32 0.6931472, %v4321_v37  ;;  %v1879_v37 = vand.u32 2147483647, %v5799_v60  ;;  %vm2009_vm7 = vcmp.gt.f32.partialorder %v5746_v52, 20.0 }
 0x475   : > { %4338 = vlog2.f32 %v1954_v54  ;;  %v2024_v3 = vsel %vm2008_vm8, %v5741_v29, %v1872_v22  ;;  %v1923_v29 = vmul.f32 %v5789_v38, %v1922_v47  ;;  %v1958_v38 = vadd.f32 1.0, %v1957_v41 }
 0x476   : > { %v4325_v6 = vpop.eup %4324  ;;  %4340 = vpow2.f32 %v1854_v20  ;;  %v1908_v27 = vsel %vm5813_vm9, %v1905_v13, %v1902_v42  ;;  %v1831_v20 = vmin.f32 %v5826_v63, 20.0  ;;  %v5855_v33 = vmul.f32 0.01, %v2024_v3 }
 0x477   : > { %v1884_v32 = vmul.f32 0.6931472, %v4325_v6  ;;  %v5839_v55 = vpop.eup %4326  ;;  %4342 = vlog2.f32 %v1873_v15  ;;  %v2028_v57 = vsel %vm2012_vm10, %v5744_v51, %v1908_v27  ;;  %vm5867_vm1 = vcmp.lt.f32.partialorder %v1960_v40, 0.0004427343 }
 0x478   : > { %v4329_v16 = vpop.eup %4328  ;;  %4344 = vpow2.f32 %v1858_v19  ;;  %v1862_v18 = vmul.f32 1.442695, %v1831_v20  ;;  %v5877_v47 = vmul.f32 0.01, %v2028_v57  ;;  %v1909_v42 = vadd.f32 1.0, %v5803_v44 }
 0x479   : > { %v4331_v9 = vpop.eup %4330  ;;  %v1920_v17 = vmul.f32 0.6931472, %v4329_v16  ;;  %v1890_v62 = vsel %vm5828_vm12, %v1887_v14, %v1884_v32  ;;  %v1959_v59 = vmul.f32 %v5809_v23, %v1958_v38  ;;  %vm5895_vm6 = vcmp.lt.f32.partialorder %v1879_v37, 0.0004427343 }
 0x47a   : > { %v5858_v56 = vpop.eup %4332  ;;  %v1972_v45 = vadd.f32 1.0, %v4331_v9  ;;  %v1975_v1 = vmul.f32 -0.5, %v4331_v9  ;;  %v2026_v43 = vsel %vm2010_vm11, %v5749_v31, %v1890_v62  ;;  %v1978_v53 = vand.u32 2147483647, %v4331_v9 }
 0x47b   : > { %v4335_v4 = vpop.eup %4334  ;;  %v1926_v7 = vsel %vm5842_vm14, %v1923_v29, %v1920_v17  ;;  %v5887_v13 = vmul.f32 0.01, %v2026_v43  ;;  %v1912_v14 = vmul.f32 -0.5, %v5803_v44  ;;  %v1891_v58 = vadd.f32 1.0, %v5822_v39 }
 0x47c   : > { %v4337_v8 = vpop.eup %4336  ;;  %4346 = vlog2.f32 %v1972_v45  ;;  %v1990_v54 = vadd.f32 1.0, %v4335_v4  ;;  %v2030_v12 = vsel %vm2014_vm13, %v5754_v28, %v1926_v7  ;;  %v1976_v48 = vadd.f32 1.0, %v1975_v1 }
 0x47d   : > { %v1938_v51 = vmul.f32 0.6931472, %v4337_v8  ;;  %v1993_v31 = vmul.f32 -0.5, %v4335_v4  ;;  %v1996_v15 = vand.u32 2147483647, %v4335_v4  ;;  %v1877_v28 = vadd.f32 1.0, %v1876_v21 }
 0x47e   : > { %4348 = vlog2.f32 %v1990_v54  ;;  %vm5890_vm4 = vcmp.lt.f32.partialorder %v1978_v53, 0.0004427343  ;;  %v5900_v41 = vmul.f32 0.01, %v2030_v12  ;;  %v1977_v16 = vmul.f32 %v4331_v9, %v1976_v48 }
 0x47f   : > { %v4339_v22 = vpop.eup %4338  ;;  %v1944_v50 = vsel %vm5850_vm15, %v1941_v25, %v1938_v51  ;;  %4350 = vlog2.f32 %v1909_v42  ;;  %v1994_v27 = vadd.f32 1.0, %v1993_v31  ;;  %v2061_v29 = vpack.c.bf16 %v5877_v47, %v5855_v33 }
 0x480   : > { %v1956_v6 = vmul.f32 0.6931472, %v4339_v22  ;;  %v5885_v61 = vpop.eup %4340  ;;  %4352 = vpow2.f32 %v1862_v18  ;;  %v2032_v23 = vsel %vm2016_vm0, %v5763_v26, %v1944_v50  ;;  %vm5911_vm8 = vcmp.lt.f32.partialorder %v1996_v15, 0.0004427343 }
 0x481   : > { %v4343_v40 = vpop.eup %4342  ;;  %vm2022_vm9 = vcmp.gt.f32.partialorder %v5787_v11, 20.0  ;;  %4354 = vlog2.f32 %v1891_v58  ;;  %v1894_v20 = vmul.f32 -0.5, %v5822_v39  ;;  %vm2013_vm10 = vcmp.gt.f32.partialorder %v5751_v30, 20.0 }
 0x482   : > { %v1962_v19 = vsel %vm5867_vm1, %v1959_v59, %v1956_v6  ;;  %v1875_v26 = vmul.f32 0.6931472, %v4343_v40  ;;  %v5917_v17 = vpop.eup %4344  ;;  %v5920_v25 = vmul.f32 0.01, %v2032_v23  ;;  %v1878_v9 = vmul.f32 %v5799_v60, %v1877_v28 }
 0x483   : > { %v1915_v62 = vand.u32 2147483647, %v5803_v44  ;;  %v1927_v38 = vadd.f32 1.0, %v5839_v55  ;;  %v2034_v1 = vsel %vm2018_vm3, %v5767_v34, %v1962_v19  ;;  %v1913_v57 = vadd.f32 1.0, %v1912_v14 }
 0x484   : > { %v2063_v7 = vpack.c.bf16 %v5900_v41, %v5887_v13  ;;  %v1945_v35 = vadd.f32 1.0, %v5858_v56  ;;  %v1995_v18 = vmul.f32 %v4335_v4, %v1994_v27  ;;  %v1897_v21 = vand.u32 2147483647, %v5822_v39 }
 0x485   : > { %4356 = vlog2.f32 %v1927_v38  ;;  %v1881_v60 = vsel %vm5895_vm6, %v1878_v9, %v1875_v26  ;;  %v1895_v37 = vadd.f32 1.0, %v1894_v20  ;;  %v1930_v43 = vmul.f32 -0.5, %v5839_v55 }
 0x486   : > { %v4347_v45 = vpop.eup %4346  ;;  %4358 = vlog2.f32 %v1945_v35  ;;  %v5935_v34 = vmul.f32 0.01, %v2034_v1  ;;  %vm5939_vm11 = vcmp.lt.f32.partialorder %v1915_v62, 0.0004427343  ;;  %v1981_v4 = vadd.f32 1.0, %v5917_v17 }
 0x487   : > { %v1974_v8 = vmul.f32 0.6931472, %v4347_v45  ;;  %vm2011_vm12 = vcmp.gt.f32.partialorder %v5761_v49, 20.0  ;;  %v1914_v42 = vmul.f32 %v5803_v44, %v1913_v57  ;;  %v1948_v50 = vmul.f32 -0.5, %v5858_v56 }
 0x488   : > { %v4349_v51 = vpop.eup %4348  ;;  %v2025_v59 = vsel %vm2009_vm7, %v5746_v52, %v1881_v60  ;;  %vm5955_vm13 = vcmp.lt.f32.partialorder %v1897_v21, 0.0004427343  ;;  %4360 = vlog2.f32 %v1981_v4  ;;  %v1896_v3 = vmul.f32 %v5822_v39, %v1895_v37 }
 0x489   : > { %v1980_v53 = vsel %vm5890_vm4, %v1977_v16, %v1974_v8  ;;  %v4351_v22 = vpop.eup %4350  ;;  %v1992_v48 = vmul.f32 0.6931472, %v4349_v51  ;;  %v1931_v44 = vadd.f32 1.0, %v1930_v43  ;;  %v1933_v28 = vand.u32 2147483647, %v5839_v55 }
 0x48a   : > { %v2036_v12 = vsel %vm2020_vm5, %v5783_v2, %v1980_v53  ;;  %v5950_v6 = vpop.eup %4352  ;;  %v1911_v31 = vmul.f32 0.6931472, %v4351_v22  ;;  %v1963_v14 = vadd.f32 1.0, %v5885_v61  ;;  %v2041_v39 = vmul.f32 0.01, %v2025_v59 }
 0x48b   : > { %v1998_v2 = vsel %vm5911_vm8, %v1995_v18, %v1992_v48  ;;  %v5963_v32 = vmul.f32 0.01, %v2036_v12  ;;  %v4355_v58 = vpop.eup %4354  ;;  %v1949_v19 = vadd.f32 1.0, %v1948_v50  ;;  %v1984_v16 = vmul.f32 -0.5, %v5917_v17 }
 0x48c   : > { %v2038_v23 = vsel %vm2022_vm9, %v5787_v11, %v1998_v2  ;;  %v1917_v52 = vsel %vm5939_vm11, %v1914_v42, %v1911_v31  ;;  %v1893_v26 = vmul.f32 0.6931472, %v4355_v58  ;;  %4362 = vlog2.f32 %v1963_v14  ;;  %v2215_v58 = vpop.permute.xlu0 %2214 }
 0x48d   : > { %v2029_v40 = vsel %vm2013_vm10, %v5751_v30, %v1917_v52  ;;  %v5975_v27 = vmul.f32 0.01, %v2038_v23  ;;  %v1932_v11 = vmul.f32 %v5839_v55, %v1931_v44  ;;  %vm5978_vm14 = vcmp.lt.f32.partialorder %v1933_v28, 0.0004427343 }
 0x48e   : > { %v2045_v5 = vmul.f32 0.01, %v2029_v40  ;;  %v1951_v9 = vand.u32 2147483647, %v5858_v56  ;;  %v1999_v62 = vadd.f32 1.0, %v5950_v6  ;;  %v1899_v45 = vsel %vm5955_vm13, %v1896_v3, %v1893_v26 }
 0x48f   : > { %v4357_v30 = vpop.eup %4356  ;;  %v1966_v1 = vmul.f32 -0.5, %v5885_v61  ;;  %v2065_v57 = vpack.c.bf16 %v5963_v32, %v5920_v25  ;;  %v1950_v8 = vmul.f32 %v5858_v56, %v1949_v19  ;;  %v1985_v18 = vadd.f32 1.0, %v1984_v16 }
 0x490   : > { %v2062_v38 = vpack.c.bf16 %v2045_v5, %v2041_v39  ;;  %v4359_v35 = vpop.eup %4358  ;;  %v1929_v55 = vmul.f32 0.6931472, %v4357_v30  ;;  %4364 = vlog2.f32 %v1999_v62  ;;  %v2027_v21 = vsel %vm2011_vm12, %v5761_v49, %v1899_v45 }
 0x491   : > { %v1947_v60 = vmul.f32 0.6931472, %v4359_v35  ;;  %v1987_v37 = vand.u32 2147483647, %v5917_v17  ;;  %v2067_v43 = vpack.c.bf16 %v5975_v27, %v5935_v34  ;;  %vm2015_vm15 = vcmp.gt.f32.partialorder %v5765_v36, 20.0  ;;  %v2220_v27 = vpop.permute.xlu1 %2219 }
 0x492   : > { %2085 = vmatprep.subr.bf16.mxu0 %v2062_v38  ;;  %vm2017_vm0 = vcmp.gt.f32.partialorder %v5772_v10, 20.0  ;;  %v1935_v56 = vsel %vm5978_vm14, %v1932_v11, %v1929_v55  ;;  %vm1952_vm1 = vcmp.lt.f32.partialorder %v1951_v9, 0.0004427343  ;;  %v4361_v25 = vpop.eup %4360  ;;  %v1967_v53 = vadd.f32 1.0, %v1966_v1 }
 0x493   : > { %2086 = vmatpush1.bf16.msra.mxu0 %v2061_v29  ;;  %v2031_v49 = vsel %vm2015_vm15, %v5765_v36, %v1935_v56  ;;  %v1953_v51 = vsel %vm1952_vm1, %v1950_v8, %v1947_v60  ;;  %v2002_v54 = vmul.f32 -0.5, %v5950_v6  ;;  %v2043_v34 = vmul.f32 0.01, %v2027_v21 }
 0x494   : > { %v2047_v4 = vmul.f32 0.01, %v2031_v49  ;;  %v1983_v22 = vmul.f32 0.6931472, %v4361_v25  ;;  %v1986_v12 = vmul.f32 %v5917_v17, %v1985_v18  ;;  %vm1988_vm3 = vcmp.lt.f32.partialorder %v1987_v37, 0.0004427343  ;;  %v2225_v25 = vpop.permute.xlu0 %2224 }
 0x495   : > { %v2033_v48 = vsel %vm2017_vm0, %v5772_v10, %v1953_v51  ;;  %v1969_v42 = vand.u32 2147483647, %v5885_v61  ;;  %vm2021_vm4 = vcmp.gt.f32.partialorder %v5811_v24, 20.0  ;;  %v2003_v50 = vadd.f32 1.0, %v2002_v54 }
 0x496   : > { %v2064_v33 = vpack.c.bf16 %v2047_v4, %v2043_v34  ;;  %v1989_v47 = vsel %vm1988_vm3, %v1986_v12, %v1983_v22  ;;  %v4363_v29 = vpop.eup %4362  ;;  %v2005_v31 = vand.u32 2147483647, %v5950_v6  ;;  %v2049_v59 = vmul.f32 0.01, %v2033_v48 }
 0x497   : > { %v2037_v36 = vsel %vm2021_vm4, %v5811_v24, %v1989_v47  ;;  %v1965_v2 = vmul.f32 0.6931472, %v4363_v29  ;;  %v1968_v17 = vmul.f32 %v5885_v61, %v1967_v53  ;;  %vm1970_vm5 = vcmp.lt.f32.partialorder %v1969_v42, 0.0004427343  ;;  %v4102_v61 = vld [vmem:[%s7227_s2 + $0x30] sm:$0xff]  }
 0x498   : > { %2138 = vmatprep.subr.bf16.mxu1 %v2064_v33  ;;  %v2053_v15 = vmul.f32 0.01, %v2037_v36  ;;  %vm2019_vm6 = vcmp.gt.f32.partialorder %v5777_v46, 20.0  ;;  %v2004_v28 = vmul.f32 %v5950_v6, %v2003_v50  ;;  %vm2006_vm7 = vcmp.lt.f32.partialorder %v2005_v31, 0.0004427343 }
 0x499   : > { %2139 = vmatpush1.bf16.msra.mxu1 %v2063_v7  ;;  %v1971_v44 = vsel %vm1970_vm5, %v1968_v17, %v1965_v2  ;;  %vm2023_vm8 = vcmp.gt.f32.partialorder %v5826_v63, 20.0 }
 0x49a   : > { %v4365_v10 = vpop.eup %4364  ;;  %v2066_v3 = vpack.c.bf16 %v2053_v15, %v2049_v59  ;;  %v2035_v32 = vsel %vm2019_vm6, %v5777_v46, %v1971_v44  ;;  %v4103_v46 = vld [vmem:[%s7227_s2 + $0x38] sm:$0xff]  }
 0x49b   : > { %v2001_v24 = vmul.f32 0.6931472, %v4365_v10  ;;  %v2051_v7 = vmul.f32 0.01, %v2035_v32 }
 0x49c   : > { %2087 = vmatprep.subr.bf16.mxu0 %v2066_v3 }
 0x49d   : > { %v2007_v13 = vsel %vm2006_vm7, %v2004_v28, %v2001_v24  ;;  %2088 = vmatpush1.bf16.msra.mxu0 %v2065_v57 }
 0x49e   : > { %v2039_v41 = vsel %vm2023_vm8, %v5826_v63, %v2007_v13 }
 0x49f   : > { %v2055_v23 = vmul.f32 0.01, %v2039_v41 }
 0x4a0   : > { %4011 = vmatmul.mubr.msk.bf16.vlgmr.msra.gmra.mrb[8].mxu0 %vm782_vm2, %v4102_v61 }
 0x4a1   : > { %v2068_v52 = vpack.c.bf16 %v2055_v23, %v2051_v7  ;;  %2127 = vmatprep.mubr.bf16.mxu0 %v4630_v0 }
 0x4a3   : > { %2140 = vmatprep.subr.bf16.mxu1 %v2068_v52 }
 0x4a4   : > { %2141 = vmatpush1.bf16.msra.mxu1 %v2067_v43 }
 0x4a7   : > { %4013 = vmatmul.mubr.msk.bf16.vlgmr.msra.gmra.mrb[8].mxu1 %vm782_vm2, %v4102_v61 }
 0x4a8   : > { %2180 = vmatprep.mubr.bf16.mxu1 %v4630_v0  ;;  %4012 = vmatmul.mubr.msk.bf16.gmra.mrb[12].mxu0 %vm782_vm2, %v4103_v46 }
 0x4a9   : > { %2549 = vmatprep.mubr.bf16.mxu0 %v4630_v0 }
 0x4af   : > { %4014 = vmatmul.mubr.msk.bf16.gmra.mrb[12].mxu1 %vm782_vm2, %v4103_v46 }
 0x4b0   : > { %2602 = vmatprep.mubr.bf16.mxu1 %v4630_v0 }
 0x573   : > { %v2119_v63 = vpop.f32.mrb[8].mxu0 }
 0x574   : > { %v2196_v6 = vmul.f32 100.0, %v2119_v63  ;;  %v2121_v14 = vpop.f32.mrb[9].mxu0 }
 0x575   : > { %v2123_v40 = vpop.f32.mrb[10].mxu0  ;;  %v2197_v9 = vmul.f32 100.0, %v2121_v14 }
 0x576   : > { %v6034_v39 = vadd.f32 %v2215_v58, %v2196_v6  ;;  %v2200_v19 = vmul.f32 100.0, %v2123_v40  ;;  %v2125_v16 = vpop.f32.mrb[11].mxu0 }
 0x577   : > { %v2201_v57 = vmul.f32 100.0, %v2125_v16  ;;  %v6042_v60 = vadd.f32 %v2215_v58, %v2197_v9  ;;  %v6074_v16 = vpop.permute.xlu1 %2229 }
 0x578   : > { %v2248_v5 = vmin.f32 %v6034_v39, 20.0  ;;  %v6037_v26 = vadd.f32 %v2220_v27, %v2200_v19  ;;  %vm2440_vm10 = vcmp.gt.f32.partialorder %v6034_v39, 20.0 }
 0x579   : > { %v6049_v34 = vadd.f32 %v2220_v27, %v2201_v57  ;;  %v2249_v42 = vmin.f32 %v6042_v60, 20.0  ;;  %vm2441_vm6 = vcmp.gt.f32.partialorder %v6042_v60, 20.0 }
 0x57a   : > { %v2264_v11 = vmul.f32 1.442695, %v2248_v5  ;;  %v2172_v20 = vpop.f32.mrb[8].mxu1  ;;  %v2252_v62 = vmin.f32 %v6037_v26, 20.0  ;;  %vm2444_vm12 = vcmp.gt.f32.partialorder %v6037_v26, 20.0 }
 0x57b   : > { %v2198_v30 = vmul.f32 100.0, %v2172_v20  ;;  %v2174_v38 = vpop.f32.mrb[9].mxu1  ;;  %v2129_v35 = vpop.f32.mrb[12].mxu0  ;;  %v2253_v15 = vmin.f32 %v6049_v34, 20.0  ;;  %v2266_v28 = vmul.f32 1.442695, %v2249_v42 }
 0x57c   : > { %4366 = vpow2.f32 %v2264_v11  ;;  %v2272_v45 = vmul.f32 1.442695, %v2252_v62  ;;  %v2176_v1 = vpop.f32.mrb[10].mxu1  ;;  %v2131_v21 = vpop.f32.mrb[13].mxu0  ;;  %v2199_v37 = vmul.f32 100.0, %v2174_v38  ;;  %v2204_v43 = vmul.f32 100.0, %v2129_v35 }
 0x57d   : > { %v6040_v55 = vadd.f32 %v2215_v58, %v2198_v30  ;;  %v2202_v8 = vmul.f32 100.0, %v2176_v1  ;;  %v2178_v18 = vpop.f32.mrb[11].mxu1  ;;  %v2133_v56 = vpop.f32.mrb[14].mxu0  ;;  %v2205_v48 = vmul.f32 100.0, %v2131_v21  ;;  %v2274_v23 = vmul.f32 1.442695, %v2253_v15 }
 0x57e   : > { %4368 = vpow2.f32 %v2272_v45  ;;  %v2203_v53 = vmul.f32 100.0, %v2178_v18  ;;  %v6047_v54 = vpop.f32.mrb[15].mxu0  ;;  %v6051_v4 = vadd.f32 %v2225_v25, %v2204_v43  ;;  %v6055_v33 = vadd.f32 %v2215_v58, %v2199_v37 }
 0x57f   : > { %v2250_v49 = vmin.f32 %v6040_v55, 20.0  ;;  %v6045_v51 = vadd.f32 %v2220_v27, %v2202_v8  ;;  %v6063_v3 = vadd.f32 %v2225_v25, %v2205_v48  ;;  %v2208_v46 = vmul.f32 100.0, %v2133_v56 }
 0x580   : > { %v2256_v47 = vmin.f32 %v6051_v4, 20.0  ;;  %v6058_v50 = vadd.f32 %v2220_v27, %v2203_v53  ;;  %v2251_v32 = vmin.f32 %v6055_v33, 20.0  ;;  %vm2442_vm13 = vcmp.gt.f32.partialorder %v6040_v55, 20.0 }
 0x581   : > { %v2268_v22 = vmul.f32 1.442695, %v2250_v49  ;;  %v2254_v12 = vmin.f32 %v6045_v51, 20.0  ;;  %v2257_v6 = vmin.f32 %v6063_v3, 20.0  ;;  %v6079_v20 = vadd.f32 %v6074_v16, %v2208_v46 }
 0x582   : > { %v2182_v29 = vpop.f32.mrb[12].mxu1  ;;  %v2280_v2 = vmul.f32 1.442695, %v2256_v47  ;;  %v2255_v13 = vmin.f32 %v6058_v50, 20.0  ;;  %v2270_v40 = vmul.f32 1.442695, %v2251_v32 }
 0x583   : > { %4370 = vpow2.f32 %v2268_v22  ;;  %v2276_v36 = vmul.f32 1.442695, %v2254_v12  ;;  %v2206_v31 = vmul.f32 100.0, %v2182_v29  ;;  %v2184_v59 = vpop.f32.mrb[13].mxu1  ;;  %v2282_v62 = vmul.f32 1.442695, %v2257_v6 }
 0x584   : > { %v2186_v17 = vpop.f32.mrb[14].mxu1  ;;  %v2207_v41 = vmul.f32 100.0, %v2184_v59  ;;  %v2278_v27 = vmul.f32 1.442695, %v2255_v13  ;;  %v2260_v8 = vmin.f32 %v6079_v20, 20.0  ;;  %v2209_v49 = vmul.f32 100.0, %v6047_v54 }
 0x585   : > { %4372 = vpow2.f32 %v2276_v36  ;;  %v6061_v10 = vadd.f32 %v2225_v25, %v2206_v31  ;;  %v6065_v44 = vpop.f32.mrb[15].mxu1  ;;  %v2210_v14 = vmul.f32 100.0, %v2186_v17  ;;  %vm2446_vm0 = vcmp.gt.f32.partialorder %v6045_v51, 20.0 }
 0x586   : > { %v4367_v24 = vpop.eup %4366  ;;  %4374 = vpow2.f32 %v2280_v2  ;;  %v6076_v5 = vadd.f32 %v2225_v25, %v2207_v41  ;;  %v2288_v25 = vmul.f32 1.442695, %v2260_v8  ;;  %vm2448_vm1 = vcmp.gt.f32.partialorder %v6051_v4, 20.0 }
 0x587   : > { %v2296_v61 = vadd.f32 1.0, %v4367_v24  ;;  %v2258_v52 = vmin.f32 %v6061_v10, 20.0  ;;  %v2299_v58 = vmul.f32 -0.5, %v4367_v24  ;;  %v2302_v11 = vand.u32 2147483647, %v4367_v24 }
 0x588   : > { %v6069_v7 = vpop.eup %4368  ;;  %v6084_v30 = vadd.f32 %v6074_v16, %v2210_v14  ;;  %v2259_v35 = vmin.f32 %v6076_v5, 20.0  ;;  %vm2450_vm5 = vcmp.gt.f32.partialorder %v6061_v10, 20.0  ;;  %vm2452_vm8 = vcmp.gt.f32.partialorder %v6079_v20, 20.0 }
 0x589   : > { %4376 = vlog2.f32 %v2296_v61  ;;  %v2332_v63 = vadd.f32 1.0, %v6069_v7  ;;  %v2284_v19 = vmul.f32 1.442695, %v2258_v52  ;;  %v2300_v38 = vadd.f32 1.0, %v2299_v58 }
 0x58a   : > { %4378 = vpow2.f32 %v2266_v28  ;;  %v2335_v57 = vmul.f32 -0.5, %v6069_v7  ;;  %vm6092_vm9 = vcmp.lt.f32.partialorder %v2302_v11, 0.0004427343  ;;  %v2262_v37 = vmin.f32 %v6084_v30, 20.0 }
 0x58b   : > { %4380 = vlog2.f32 %v2332_v63  ;;  %v2338_v56 = vand.u32 2147483647, %v6069_v7  ;;  %v2301_v53 = vmul.f32 %v4367_v24, %v2300_v38  ;;  %v2286_v29 = vmul.f32 1.442695, %v2259_v35 }
 0x58c   : > { %4382 = vpow2.f32 %v2284_v19  ;;  %v2336_v42 = vadd.f32 1.0, %v2335_v57  ;;  %v2292_v15 = vmul.f32 1.442695, %v2262_v37  ;;  %v6112_v24 = vadd.f32 %v6074_v16, %v2209_v49 }
 0x58d   : > { %v6081_v9 = vpop.eup %4370  ;;  %4384 = vpow2.f32 %v2274_v23  ;;  %vm6106_vm11 = vcmp.lt.f32.partialorder %v2338_v56, 0.0004427343  ;;  %v2211_v28 = vmul.f32 100.0, %v6065_v44 }
 0x58e   : > { %v2314_v45 = vadd.f32 1.0, %v6081_v9  ;;  %4386 = vpow2.f32 %v2270_v40  ;;  %v2317_v22 = vmul.f32 -0.5, %v6081_v9  ;;  %v2320_v54 = vand.u32 2147483647, %v6081_v9 }
 0x58f   : > { %v6087_v1 = vpop.eup %4372  ;;  %4388 = vpow2.f32 %v2278_v27  ;;  %v2337_v46 = vmul.f32 %v6069_v7, %v2336_v42  ;;  %v2261_v40 = vmin.f32 %v6112_v24, 20.0  ;;  %v6138_v7 = vadd.f32 %v6074_v16, %v2211_v28 }
 0x590   : > { %4390 = vlog2.f32 %v2314_v45  ;;  %v2350_v21 = vadd.f32 1.0, %v6087_v1  ;;  %v4375_v43 = vpop.eup %4374  ;;  %v2353_v47 = vmul.f32 -0.5, %v6087_v1  ;;  %v2318_v13 = vadd.f32 1.0, %v2317_v22 }
 0x591   : > { %4392 = vpow2.f32 %v2282_v62  ;;  %v2368_v12 = vadd.f32 1.0, %v4375_v43  ;;  %v2371_v59 = vmul.f32 -0.5, %v4375_v43  ;;  %v2356_v41 = vand.u32 2147483647, %v6087_v1 }
 0x592   : > { %4394 = vlog2.f32 %v2350_v21  ;;  %v2354_v6 = vadd.f32 1.0, %v2353_v47  ;;  %v2374_v58 = vand.u32 2147483647, %v4375_v43  ;;  %vm6133_vm14 = vcmp.lt.f32.partialorder %v2320_v54, 0.0004427343 }
 0x593   : > { %v4377_v48 = vpop.eup %4376  ;;  %4396 = vpow2.f32 %v2288_v25  ;;  %v2372_v14 = vadd.f32 1.0, %v2371_v59  ;;  %v2319_v38 = vmul.f32 %v6081_v9, %v2318_v13  ;;  %vm6141_vm15 = vcmp.lt.f32.partialorder %v2356_v41, 0.0004427343 }
 0x594   : > { %v6103_v36 = vpop.eup %4378  ;;  %v2298_v31 = vmul.f32 0.6931472, %v4377_v48  ;;  %4398 = vlog2.f32 %v2368_v12  ;;  %v2290_v18 = vmul.f32 1.442695, %v2261_v40  ;;  %v2355_v56 = vmul.f32 %v6087_v1, %v2354_v6 }
 0x595   : > { %v4381_v2 = vpop.eup %4380  ;;  %4400 = vpow2.f32 %v2292_v15  ;;  %v2305_v9 = vadd.f32 1.0, %v6103_v36  ;;  %v2373_v25 = vmul.f32 %v4375_v43, %v2372_v14  ;;  %vm6157_vm3 = vcmp.lt.f32.partialorder %v2374_v58, 0.0004427343 }
 0x596   : > { %v6115_v32 = vpop.eup %4382  ;;  %v2304_v61 = vsel %vm6092_vm9, %v2301_v53, %v2298_v31  ;;  %v2334_v52 = vmul.f32 0.6931472, %v4381_v2  ;;  %4402 = vpow2.f32 %v2286_v29  ;;  %v2263_v48 = vmin.f32 %v6138_v7, 20.0 }
 0x597   : > { %v6120_v23 = vpop.eup %4384  ;;  %v2386_v63 = vadd.f32 1.0, %v6115_v32  ;;  %v2456_v27 = vsel %vm2440_vm10, %v6034_v39, %v2304_v61  ;;  %v2389_v57 = vmul.f32 -0.5, %v6115_v32  ;;  %v2392_v39 = vand.u32 2147483647, %v6115_v32 }
 0x598   : > { %v6125_v44 = vpop.eup %4386  ;;  %v2340_v16 = vsel %vm6106_vm11, %v2337_v46, %v2334_v52  ;;  %v6154_v37 = vmul.f32 0.01, %v2456_v27  ;;  %v2308_v15 = vmul.f32 -0.5, %v6103_v36  ;;  %v2294_v52 = vmul.f32 1.442695, %v2263_v48 }
 0x599   : > { %v6128_v19 = vpop.eup %4388  ;;  %4404 = vlog2.f32 %v2386_v63  ;;  %v2460_v47 = vsel %vm2444_vm12, %v6037_v26, %v2340_v16  ;;  %v2390_v29 = vadd.f32 1.0, %v2389_v57  ;;  %vm6167_vm4 = vcmp.lt.f32.partialorder %v2392_v39, 0.0004427343 }
 0x59a   : > { %v4391_v62 = vpop.eup %4390  ;;  %4406 = vlog2.f32 %v2305_v9  ;;  %v2341_v26 = vadd.f32 1.0, %v6120_v23  ;;  %v6183_v46 = vmul.f32 0.01, %v2460_v47  ;;  %v2311_v6 = vand.u32 2147483647, %v6103_v36 }
 0x59b   : > { %v6148_v35 = vpop.eup %4392  ;;  %v2316_v8 = vmul.f32 0.6931472, %v4391_v62  ;;  %4408 = vpow2.f32 %v2290_v18  ;;  %v2309_v27 = vadd.f32 1.0, %v2308_v15  ;;  %v2344_v45 = vmul.f32 -0.5, %v6120_v23 }
 0x59c   : > { %v4395_v21 = vpop.eup %4394  ;;  %vm2454_vm9 = vcmp.gt.f32.partialorder %v6084_v30, 20.0  ;;  %vm2445_vm10 = vcmp.gt.f32.partialorder %v6049_v34, 20.0  ;;  %vm6217_vm11 = vcmp.lt.f32.partialorder %v2311_v6, 0.0004427343  ;;  %vm2443_vm12 = vcmp.gt.f32.partialorder %v6055_v33, 20.0 }
 0x59d   : > { %v4397_v53 = vpop.eup %4396  ;;  %v2322_v22 = vsel %vm6133_vm14, %v2319_v38, %v2316_v8  ;;  %v2352_v12 = vmul.f32 0.6931472, %v4395_v21  ;;  %v2326_v21 = vmul.f32 -0.5, %v6125_v44  ;;  %v2310_v49 = vmul.f32 %v6103_v36, %v2309_v27 }
 0x59e   : > { %v4399_v42 = vpop.eup %4398  ;;  %v2404_v1 = vadd.f32 1.0, %v4397_v53  ;;  %v2407_v43 = vmul.f32 -0.5, %v4397_v53  ;;  %v2458_v54 = vsel %vm2442_vm13, %v6040_v55, %v2322_v22  ;;  %v2410_v13 = vand.u32 2147483647, %v4397_v53 }
 0x59f   : > { %v2370_v31 = vmul.f32 0.6931472, %v4399_v42  ;;  %v4401_v2 = vpop.eup %4400  ;;  %v2358_v17 = vsel %vm6141_vm15, %v2355_v56, %v2352_v12  ;;  %v2391_v55 = vmul.f32 %v6115_v32, %v2390_v29  ;;  %v6187_v58 = vmul.f32 0.01, %v2458_v54 }
 0x5a0   : > { %4410 = vlog2.f32 %v2404_v1  ;;  %v6178_v28 = vpop.eup %4402  ;;  %v2422_v41 = vadd.f32 1.0, %v4401_v2  ;;  %v2408_v63 = vadd.f32 1.0, %v2407_v43  ;;  %v2462_v40 = vsel %vm2446_vm0, %v6045_v51, %v2358_v17 }
 0x5a1   : > { %v2376_v61 = vsel %vm6157_vm3, %v2373_v25, %v2370_v31  ;;  %v2425_v38 = vmul.f32 -0.5, %v4401_v2  ;;  %vm6196_vm7 = vcmp.lt.f32.partialorder %v2410_v13, 0.0004427343  ;;  %v2323_v51 = vadd.f32 1.0, %v6125_v44 }
 0x5a2   : > { %4412 = vlog2.f32 %v2422_v41  ;;  %v2464_v11 = vsel %vm2448_vm1, %v6051_v4, %v2376_v61  ;;  %v6202_v57 = vmul.f32 0.01, %v2462_v40  ;;  %v2409_v39 = vmul.f32 %v4397_v53, %v2408_v63 }
 0x5a3   : > { %v4405_v14 = vpop.eup %4404  ;;  %4414 = vlog2.f32 %v2341_v26  ;;  %v2428_v8 = vand.u32 2147483647, %v4401_v2  ;;  %v2359_v4 = vadd.f32 1.0, %v6128_v19  ;;  %v6205_v18 = vmul.f32 0.01, %v2464_v11 }
 0x5a4   : > { %v2388_v62 = vmul.f32 0.6931472, %v4405_v14  ;;  %4416 = vpow2.f32 %v2294_v52  ;;  %v4407_v16 = vpop.eup %4406  ;;  %v2426_v56 = vadd.f32 1.0, %v2425_v38  ;;  %v2347_v53 = vand.u32 2147483647, %v6120_v23 }
 0x5a5   : > { %4418 = vlog2.f32 %v2323_v51  ;;  %v2307_v25 = vmul.f32 0.6931472, %v4407_v16  ;;  %v6214_v22 = vpop.eup %4408  ;;  %v2345_v48 = vadd.f32 1.0, %v2344_v45  ;;  %v2329_v42 = vand.u32 2147483647, %v6125_v44 }
 0x5a6   : > { %v2394_v9 = vsel %vm6167_vm4, %v2391_v55, %v2388_v62  ;;  %4420 = vlog2.f32 %v2359_v4  ;;  %v2493_v36 = vpack.c.bf16 %v6183_v46, %v6154_v37  ;;  %v2495_v1 = vpack.c.bf16 %v6202_v57, %v6187_v58  ;;  %v4104_v57 = vld [vmem:[%s7227_s2 + $0x40] sm:$0xff]  }
 0x5a7   : > { %v2466_v29 = vsel %vm2450_vm5, %v6061_v10, %v2394_v9  ;;  %v2377_v43 = vadd.f32 1.0, %v6148_v35  ;;  %v2313_v59 = vsel %vm6217_vm11, %v2310_v49, %v2307_v25  ;;  %v2327_v15 = vadd.f32 1.0, %v2326_v21 }
 0x5a8   : > { %v2362_v54 = vmul.f32 -0.5, %v6128_v19  ;;  %v2427_v17 = vmul.f32 %v4401_v2, %v2426_v56  ;;  %vm6234_vm13 = vcmp.lt.f32.partialorder %v2428_v8, 0.0004427343  ;;  %vm6238_vm14 = vcmp.lt.f32.partialorder %v2347_v53, 0.0004427343 }
 0x5a9   : > { %4422 = vlog2.f32 %v2377_v43  ;;  %v6242_v13 = vmul.f32 0.01, %v2466_v29  ;;  %v2346_v52 = vmul.f32 %v6120_v23, %v2345_v48  ;;  %v2413_v55 = vadd.f32 1.0, %v6214_v22 }
 0x5aa   : > { %v4411_v47 = vpop.eup %4410  ;;  %vm2447_vm15 = vcmp.gt.f32.partialorder %v6058_v50, 20.0  ;;  %v2457_v6 = vsel %vm2441_vm6, %v6042_v60, %v2313_v59  ;;  %vm6252_vm0 = vcmp.lt.f32.partialorder %v2329_v42, 0.0004427343  ;;  %v2380_v40 = vmul.f32 -0.5, %v6148_v35 }
 0x5ab   : > { %v2406_v31 = vmul.f32 0.6931472, %v4411_v47  ;;  %v2328_v23 = vmul.f32 %v6125_v44, %v2327_v15  ;;  %v2363_v62 = vadd.f32 1.0, %v2362_v54  ;;  %4424 = vlog2.f32 %v2413_v55 }
 0x5ac   : > { %v4413_v61 = vpop.eup %4412  ;;  %v2365_v32 = vand.u32 2147483647, %v6128_v19  ;;  %v2395_v45 = vadd.f32 1.0, %v6178_v28  ;;  %v2473_v8 = vmul.f32 0.01, %v2457_v6  ;;  %v2416_v4 = vmul.f32 -0.5, %v6214_v22 }
 0x5ad   : > { %v2412_v41 = vsel %vm6196_vm7, %v2409_v39, %v2406_v31  ;;  %v4415_v2 = vpop.eup %4414  ;;  %v2424_v63 = vmul.f32 0.6931472, %v4413_v61  ;;  %v2381_v9 = vadd.f32 1.0, %v2380_v40  ;;  %v2383_v21 = vand.u32 2147483647, %v6148_v35 }
 0x5ae   : > { %v6257_v27 = vpop.eup %4416  ;;  %v2343_v11 = vmul.f32 0.6931472, %v4415_v2  ;;  %v2468_v38 = vsel %vm2452_vm8, %v6079_v20, %v2412_v41  ;;  %4426 = vlog2.f32 %v2395_v45  ;;  %vm2366_vm1 = vcmp.lt.f32.partialorder %v2365_v32, 0.0004427343 }
 0x5af   : > { %v2430_v60 = vsel %vm6234_vm13, %v2427_v17, %v2424_v63  ;;  %v4419_v51 = vpop.eup %4418  ;;  %v6277_v25 = vmul.f32 0.01, %v2468_v38  ;;  %v2431_v42 = vadd.f32 1.0, %v6257_v27  ;;  %v2417_v29 = vadd.f32 1.0, %v2416_v4 }
 0x5b0   : > { %v2470_v39 = vsel %vm2454_vm9, %v6084_v30, %v2430_v60  ;;  %v2349_v44 = vsel %vm6238_vm14, %v2346_v52, %v2343_v11  ;;  %v2325_v16 = vmul.f32 0.6931472, %v4419_v51  ;;  %v4421_v56 = vpop.eup %4420  ;;  %v2364_v30 = vmul.f32 %v6128_v19, %v2363_v62 }
 0x5b1   : > { %v2461_v20 = vsel %vm2445_vm10, %v6049_v34, %v2349_v44  ;;  %v6280_v53 = vmul.f32 0.01, %v2470_v39  ;;  %v2361_v48 = vmul.f32 0.6931472, %v4421_v56  ;;  %v2382_v19 = vmul.f32 %v6148_v35, %v2381_v9  ;;  %v2647_v44 = vpop.permute.xlu0 %2646  ;;  %v2652_v9 = vpop.permute.xlu1 %2651 }
 0x5b2   : > { %v2477_v49 = vmul.f32 0.01, %v2461_v20  ;;  %v2331_v12 = vsel %vm6252_vm0, %v2328_v23, %v2325_v16  ;;  %v2398_v59 = vmul.f32 -0.5, %v6178_v28  ;;  %4428 = vlog2.f32 %v2431_v42 }
 0x5b3   : > { %v2459_v47 = vsel %vm2443_vm12, %v6055_v33, %v2331_v12  ;;  %v4423_v43 = vpop.eup %4422  ;;  %v2367_v31 = vsel %vm2366_vm1, %v2364_v30, %v2361_v48  ;;  %v2419_v17 = vand.u32 2147483647, %v6214_v22  ;;  %v2497_v10 = vpack.c.bf16 %v6277_v25, %v6205_v18 }
 0x5b4   : > { %v2494_v34 = vpack.c.bf16 %v2477_v49, %v2473_v8  ;;  %v2463_v15 = vsel %vm2447_vm15, %v6058_v50, %v2367_v31  ;;  %v2379_v54 = vmul.f32 0.6931472, %v4423_v43  ;;  %v2475_v33 = vmul.f32 0.01, %v2459_v47 }
 0x5b5   : > { %v2479_v26 = vmul.f32 0.01, %v2463_v15  ;;  %vm2384_vm3 = vcmp.lt.f32.partialorder %v2383_v21, 0.0004427343  ;;  %v2499_v35 = vpack.c.bf16 %v6280_v53, %v6242_v13  ;;  %v4425_v61 = vpop.eup %4424  ;;  %vm2449_vm4 = vcmp.gt.f32.partialorder %v6063_v3, 20.0 }
 0x5b6   : > { %2517 = vmatprep.subr.bf16.mxu0 %v2494_v34  ;;  %v2385_v50 = vsel %vm2384_vm3, %v2382_v19, %v2379_v54  ;;  %v2434_v41 = vmul.f32 -0.5, %v6257_v27  ;;  %v2415_v55 = vmul.f32 0.6931472, %v4425_v61  ;;  %v2418_v18 = vmul.f32 %v6214_v22, %v2417_v29 }
 0x5b7   : > { %2518 = vmatpush1.bf16.msra.mxu0 %v2493_v36  ;;  %v2496_v52 = vpack.c.bf16 %v2479_v26, %v2475_v33  ;;  %v2399_v2 = vadd.f32 1.0, %v2398_v59  ;;  %vm2420_vm5 = vcmp.lt.f32.partialorder %v2419_v17, 0.0004427343  ;;  %v2465_v63 = vsel %vm2449_vm4, %v6063_v3, %v2385_v50  ;;  %v2657_v33 = vpop.permute.xlu0 %2656 }
 0x5b8   : > { %v2401_v37 = vand.u32 2147483647, %v6178_v28  ;;  %vm2453_vm6 = vcmp.gt.f32.partialorder %v6112_v24, 20.0  ;;  %v2421_v46 = vsel %vm2420_vm5, %v2418_v18, %v2415_v55  ;;  %v4427_v36 = vpop.eup %4426  ;;  %v2435_v6 = vadd.f32 1.0, %v2434_v41 }
 0x5b9   : > { %2570 = vmatprep.subr.bf16.mxu1 %v2496_v52  ;;  %v2469_v13 = vsel %vm2453_vm6, %v6112_v24, %v2421_v46  ;;  %v2437_v22 = vand.u32 2147483647, %v6257_v27  ;;  %v2481_v14 = vmul.f32 0.01, %v2465_v63  ;;  %v2397_v11 = vmul.f32 0.6931472, %v4427_v36 }
 0x5ba   : > { %2571 = vmatpush1.bf16.msra.mxu1 %v2495_v1  ;;  %v2485_v40 = vmul.f32 0.01, %v2469_v13  ;;  %v2400_v3 = vmul.f32 %v6178_v28, %v2399_v2  ;;  %vm2402_vm7 = vcmp.lt.f32.partialorder %v2401_v37, 0.0004427343  ;;  %vm2451_vm8 = vcmp.gt.f32.partialorder %v6076_v5, 20.0 }
 0x5bb   : > { %v2436_v58 = vmul.f32 %v6257_v27, %v2435_v6  ;;  %vm2438_vm9 = vcmp.lt.f32.partialorder %v2437_v22, 0.0004427343  ;;  %vm2455_vm10 = vcmp.gt.f32.partialorder %v6138_v7, 20.0 }
 0x5bc   : > { %v4429_v23 = vpop.eup %4428  ;;  %v2498_v62 = vpack.c.bf16 %v2485_v40, %v2481_v14  ;;  %v2403_v38 = vsel %vm2402_vm7, %v2400_v3, %v2397_v11 }
 0x5bd   : > { %v2433_v60 = vmul.f32 0.6931472, %v4429_v23  ;;  %v2467_v24 = vsel %vm2451_vm8, %v6076_v5, %v2403_v38  ;;  %v4105_v5 = vld [vmem:[%s7227_s2 + $0x48] sm:$0xff]  }
 0x5be   : > { %2519 = vmatprep.subr.bf16.mxu0 %v2498_v62  ;;  %v2483_v32 = vmul.f32 0.01, %v2467_v24 }
 0x5bf   : > { %v2439_v28 = vsel %vm2438_vm9, %v2436_v58, %v2433_v60  ;;  %2520 = vmatpush1.bf16.msra.mxu0 %v2497_v10 }
 0x5c0   : > { %v2471_v1 = vsel %vm2455_vm10, %v6138_v7, %v2439_v28 }
 0x5c1   : > { %v2487_v45 = vmul.f32 0.01, %v2471_v1 }
 0x5c2   : > { %4025 = vmatmul.mubr.msk.bf16.vlgmr.msra.gmra.mrb[40].mxu0 %vm782_vm2, %v4104_v57 }
 0x5c3   : > { %v2500_v51 = vpack.c.bf16 %v2487_v45, %v2483_v32  ;;  %2559 = vmatprep.mubr.bf16.mxu0 %v4630_v0 }
 0x5c5   : > { %2572 = vmatprep.subr.bf16.mxu1 %v2500_v51 }
 0x5c6   : > { %2573 = vmatpush1.bf16.msra.mxu1 %v2499_v35 }
 0x5c9   : > { %4027 = vmatmul.mubr.msk.bf16.vlgmr.msra.gmra.mrb[40].mxu1 %vm782_vm2, %v4104_v57 }
 0x5ca   : > { %2612 = vmatprep.mubr.bf16.mxu1 %v4630_v0  ;;  %4026 = vmatmul.mubr.msk.bf16.gmra.mrb[44].mxu0 %vm782_vm2, %v4105_v5 }
 0x5cb   : > { %2981 = vmatprep.mubr.bf16.mxu0 %v4630_v0 }
 0x5d1   : > { %4028 = vmatmul.mubr.msk.bf16.gmra.mrb[44].mxu1 %vm782_vm2, %v4105_v5 }
 0x5d2   : > { %3034 = vmatprep.mubr.bf16.mxu1 %v4630_v0 }
 0x695   : > { %v2551_v7 = vpop.f32.mrb[40].mxu0 }
 0x696   : > { %v2628_v27 = vmul.f32 100.0, %v2551_v7  ;;  %v2553_v39 = vpop.f32.mrb[41].mxu0 }
 0x697   : > { %v2555_v8 = vpop.f32.mrb[42].mxu0  ;;  %v2629_v30 = vmul.f32 100.0, %v2553_v39 }
 0x698   : > { %v6332_v4 = vadd.f32 %v2647_v44, %v2628_v27  ;;  %v2632_v20 = vmul.f32 100.0, %v2555_v8  ;;  %v2557_v16 = vpop.f32.mrb[43].mxu0 }
 0x699   : > { %v2633_v47 = vmul.f32 100.0, %v2557_v16  ;;  %v6340_v15 = vadd.f32 %v2647_v44, %v2629_v30  ;;  %v6372_v16 = vpop.permute.xlu1 %2661 }
 0x69a   : > { %v2680_v21 = vmin.f32 %v6332_v4, 20.0  ;;  %v6335_v56 = vadd.f32 %v2652_v9, %v2632_v20  ;;  %vm2872_vm12 = vcmp.gt.f32.partialorder %v6332_v4, 20.0 }
 0x69b   : > { %v6347_v41 = vadd.f32 %v2652_v9, %v2633_v47  ;;  %v2681_v63 = vmin.f32 %v6340_v15, 20.0  ;;  %vm2873_vm8 = vcmp.gt.f32.partialorder %v6340_v15, 20.0 }
 0x69c   : > { %v2696_v25 = vmul.f32 1.442695, %v2680_v21  ;;  %v2604_v49 = vpop.f32.mrb[40].mxu1  ;;  %v2684_v53 = vmin.f32 %v6335_v56, 20.0  ;;  %vm2876_vm14 = vcmp.gt.f32.partialorder %v6335_v56, 20.0 }
 0x69d   : > { %v2630_v12 = vmul.f32 100.0, %v2604_v49  ;;  %v2606_v48 = vpop.f32.mrb[41].mxu1  ;;  %v2561_v29 = vpop.f32.mrb[44].mxu0  ;;  %v2685_v40 = vmin.f32 %v6347_v41, 20.0  ;;  %v2698_v58 = vmul.f32 1.442695, %v2681_v63 }
 0x69e   : > { %4430 = vpow2.f32 %v2696_v25  ;;  %v2704_v42 = vmul.f32 1.442695, %v2684_v53  ;;  %v2608_v34 = vpop.f32.mrb[42].mxu1  ;;  %v2563_v59 = vpop.f32.mrb[45].mxu0  ;;  %v2631_v54 = vmul.f32 100.0, %v2606_v48  ;;  %v2636_v17 = vmul.f32 100.0, %v2561_v29 }
 0x69f   : > { %v6338_v43 = vadd.f32 %v2647_v44, %v2630_v12  ;;  %v2634_v31 = vmul.f32 100.0, %v2608_v34  ;;  %v2610_v19 = vpop.f32.mrb[43].mxu1  ;;  %v2565_v10 = vpop.f32.mrb[46].mxu0  ;;  %v2637_v2 = vmul.f32 100.0, %v2563_v59  ;;  %v2706_v45 = vmul.f32 1.442695, %v2685_v40 }
 0x6a0   : > { %4432 = vpow2.f32 %v2704_v42  ;;  %v2635_v61 = vmul.f32 100.0, %v2610_v19  ;;  %v6345_v50 = vpop.f32.mrb[47].mxu0  ;;  %v6349_v52 = vadd.f32 %v2657_v33, %v2636_v17  ;;  %v6353_v37 = vadd.f32 %v2647_v44, %v2631_v54 }
 0x6a1   : > { %v2682_v26 = vmin.f32 %v6338_v43, 20.0  ;;  %v6343_v35 = vadd.f32 %v2652_v9, %v2634_v31  ;;  %v6361_v62 = vadd.f32 %v2657_v33, %v2637_v2  ;;  %v2640_v5 = vmul.f32 100.0, %v2565_v10 }
 0x6a2   : > { %v2688_v46 = vmin.f32 %v6349_v52, 20.0  ;;  %v6356_v6 = vadd.f32 %v2652_v9, %v2635_v61  ;;  %v2683_v24 = vmin.f32 %v6353_v37, 20.0  ;;  %vm2874_vm15 = vcmp.gt.f32.partialorder %v6338_v43, 20.0 }
 0x6a3   : > { %v2700_v55 = vmul.f32 1.442695, %v2682_v26  ;;  %v2686_v18 = vmin.f32 %v6343_v35, 20.0  ;;  %v2689_v27 = vmin.f32 %v6361_v62, 20.0  ;;  %v6377_v49 = vadd.f32 %v6372_v16, %v2640_v5 }
 0x6a4   : > { %v2614_v36 = vpop.f32.mrb[44].mxu1  ;;  %v2712_v11 = vmul.f32 1.442695, %v2688_v46  ;;  %v2687_v28 = vmin.f32 %v6356_v6, 20.0  ;;  %v2702_v8 = vmul.f32 1.442695, %v2683_v24 }
 0x6a5   : > { %4434 = vpow2.f32 %v2700_v55  ;;  %v2708_v13 = vmul.f32 1.442695, %v2686_v18  ;;  %v2638_v22 = vmul.f32 100.0, %v2614_v36  ;;  %v2616_v14 = vpop.f32.mrb[45].mxu1  ;;  %v2714_v53 = vmul.f32 1.442695, %v2689_v27 }
 0x6a6   : > { %v2618_v3 = vpop.f32.mrb[46].mxu1  ;;  %v2639_v1 = vmul.f32 100.0, %v2616_v14  ;;  %v2710_v9 = vmul.f32 1.442695, %v2687_v28  ;;  %v2692_v31 = vmin.f32 %v6377_v49, 20.0  ;;  %v2641_v26 = vmul.f32 100.0, %v6345_v50 }
 0x6a7   : > { %4436 = vpow2.f32 %v2708_v13  ;;  %v6359_v23 = vadd.f32 %v2657_v33, %v2638_v22  ;;  %v6363_v38 = vpop.f32.mrb[47].mxu1  ;;  %v2642_v39 = vmul.f32 100.0, %v2618_v3  ;;  %vm2878_vm3 = vcmp.gt.f32.partialorder %v6343_v35, 20.0 }
 0x6a8   : > { %v4431_v60 = vpop.eup %4430  ;;  %4438 = vpow2.f32 %v2712_v11  ;;  %v6374_v21 = vadd.f32 %v2657_v33, %v2639_v1  ;;  %v2720_v33 = vmul.f32 1.442695, %v2692_v31  ;;  %vm2880_vm4 = vcmp.gt.f32.partialorder %v6349_v52, 20.0 }
 0x6a9   : > { %v2728_v57 = vadd.f32 1.0, %v4431_v60  ;;  %v2690_v51 = vmin.f32 %v6359_v23, 20.0  ;;  %v2731_v44 = vmul.f32 -0.5, %v4431_v60  ;;  %v2734_v25 = vand.u32 2147483647, %v4431_v60 }
 0x6aa   : > { %v6367_v32 = vpop.eup %4432  ;;  %v6382_v12 = vadd.f32 %v6372_v16, %v2642_v39  ;;  %v2691_v29 = vmin.f32 %v6374_v21, 20.0  ;;  %vm2882_vm7 = vcmp.gt.f32.partialorder %v6359_v23, 20.0  ;;  %vm2884_vm10 = vcmp.gt.f32.partialorder %v6377_v49, 20.0 }
 0x6ab   : > { %4440 = vlog2.f32 %v2728_v57  ;;  %v2764_v7 = vadd.f32 1.0, %v6367_v32  ;;  %v2716_v20 = vmul.f32 1.442695, %v2690_v51  ;;  %v2732_v48 = vadd.f32 1.0, %v2731_v44 }
 0x6ac   : > { %4442 = vpow2.f32 %v2698_v58  ;;  %v2767_v47 = vmul.f32 -0.5, %v6367_v32  ;;  %vm6390_vm11 = vcmp.lt.f32.partialorder %v2734_v25, 0.0004427343  ;;  %v2694_v54 = vmin.f32 %v6382_v12, 20.0 }
 0x6ad   : > { %4444 = vlog2.f32 %v2764_v7  ;;  %v2770_v10 = vand.u32 2147483647, %v6367_v32  ;;  %v2733_v61 = vmul.f32 %v4431_v60, %v2732_v48  ;;  %v2718_v36 = vmul.f32 1.442695, %v2691_v29 }
 0x6ae   : > { %4446 = vpow2.f32 %v2716_v20  ;;  %v2768_v63 = vadd.f32 1.0, %v2767_v47  ;;  %v2724_v40 = vmul.f32 1.442695, %v2694_v54  ;;  %v6410_v60 = vadd.f32 %v6372_v16, %v2641_v26 }
 0x6af   : > { %v6379_v30 = vpop.eup %4434  ;;  %4448 = vpow2.f32 %v2706_v45  ;;  %vm6404_vm13 = vcmp.lt.f32.partialorder %v2770_v10, 0.0004427343  ;;  %v2643_v58 = vmul.f32 100.0, %v6363_v38 }
 0x6b0   : > { %v2746_v42 = vadd.f32 1.0, %v6379_v30  ;;  %4450 = vpow2.f32 %v2702_v8  ;;  %v2749_v55 = vmul.f32 -0.5, %v6379_v30  ;;  %v2752_v50 = vand.u32 2147483647, %v6379_v30 }
 0x6b1   : > { %v6385_v34 = vpop.eup %4436  ;;  %4452 = vpow2.f32 %v2710_v9  ;;  %v2769_v5 = vmul.f32 %v6367_v32, %v2768_v63  ;;  %v2693_v8 = vmin.f32 %v6410_v60, 20.0  ;;  %v6436_v32 = vadd.f32 %v6372_v16, %v2643_v58 }
 0x6b2   : > { %4454 = vlog2.f32 %v2746_v42  ;;  %v2782_v59 = vadd.f32 1.0, %v6385_v34  ;;  %v4439_v17 = vpop.eup %4438  ;;  %v2785_v46 = vmul.f32 -0.5, %v6385_v34  ;;  %v2750_v28 = vadd.f32 1.0, %v2749_v55 }
 0x6b3   : > { %4456 = vpow2.f32 %v2714_v53  ;;  %v2800_v18 = vadd.f32 1.0, %v4439_v17  ;;  %v2803_v14 = vmul.f32 -0.5, %v4439_v17  ;;  %v2788_v1 = vand.u32 2147483647, %v6385_v34 }
 0x6b4   : > { %4458 = vlog2.f32 %v2782_v59  ;;  %v2786_v27 = vadd.f32 1.0, %v2785_v46  ;;  %v2806_v44 = vand.u32 2147483647, %v4439_v17  ;;  %vm6431_vm0 = vcmp.lt.f32.partialorder %v2752_v50, 0.0004427343 }
 0x6b5   : > { %v4441_v2 = vpop.eup %4440  ;;  %4460 = vpow2.f32 %v2720_v33  ;;  %v2804_v39 = vadd.f32 1.0, %v2803_v14  ;;  %v2751_v48 = vmul.f32 %v6379_v30, %v2750_v28  ;;  %vm6439_vm1 = vcmp.lt.f32.partialorder %v2788_v1, 0.0004427343 }
 0x6b6   : > { %v6401_v13 = vpop.eup %4442  ;;  %v2730_v22 = vmul.f32 0.6931472, %v4441_v2  ;;  %4462 = vlog2.f32 %v2800_v18  ;;  %v2722_v19 = vmul.f32 1.442695, %v2693_v8  ;;  %v2787_v10 = vmul.f32 %v6385_v34, %v2786_v27 }
 0x6b7   : > { %v4445_v11 = vpop.eup %4444  ;;  %4464 = vpow2.f32 %v2724_v40  ;;  %v2737_v30 = vadd.f32 1.0, %v6401_v13  ;;  %v2805_v33 = vmul.f32 %v4439_v17, %v2804_v39  ;;  %vm6455_vm5 = vcmp.lt.f32.partialorder %v2806_v44, 0.0004427343 }
 0x6b8   : > { %v6413_v24 = vpop.eup %4446  ;;  %v2736_v57 = vsel %vm6390_vm11, %v2733_v61, %v2730_v22  ;;  %v2766_v51 = vmul.f32 0.6931472, %v4445_v11  ;;  %4466 = vpow2.f32 %v2718_v36  ;;  %v2695_v2 = vmin.f32 %v6436_v32, 20.0 }
 0x6b9   : > { %v6418_v45 = vpop.eup %4448  ;;  %v2818_v7 = vadd.f32 1.0, %v6413_v24  ;;  %v2888_v9 = vsel %vm2872_vm12, %v6332_v4, %v2736_v57  ;;  %v2821_v47 = vmul.f32 -0.5, %v6413_v24  ;;  %v2824_v4 = vand.u32 2147483647, %v6413_v24 }
 0x6ba   : > { %v6423_v38 = vpop.eup %4450  ;;  %v2772_v16 = vsel %vm6404_vm13, %v2769_v5, %v2766_v51  ;;  %v6452_v54 = vmul.f32 0.01, %v2888_v9  ;;  %v2740_v40 = vmul.f32 -0.5, %v6401_v13  ;;  %v2726_v51 = vmul.f32 1.442695, %v2695_v2 }
 0x6bb   : > { %v6426_v20 = vpop.eup %4452  ;;  %4468 = vlog2.f32 %v2818_v7  ;;  %v2892_v46 = vsel %vm2876_vm14, %v6335_v56, %v2772_v16  ;;  %v2822_v36 = vadd.f32 1.0, %v2821_v47  ;;  %vm6465_vm6 = vcmp.lt.f32.partialorder %v2824_v4, 0.0004427343 }
 0x6bc   : > { %v4455_v53 = vpop.eup %4454  ;;  %4470 = vlog2.f32 %v2737_v30  ;;  %v2773_v56 = vadd.f32 1.0, %v6418_v45  ;;  %v6481_v5 = vmul.f32 0.01, %v2892_v46  ;;  %v2743_v27 = vand.u32 2147483647, %v6401_v13 }
 0x6bd   : > { %v6446_v29 = vpop.eup %4456  ;;  %v2748_v31 = vmul.f32 0.6931472, %v4455_v53  ;;  %4472 = vpow2.f32 %v2722_v19  ;;  %v2741_v9 = vadd.f32 1.0, %v2740_v40  ;;  %v2776_v42 = vmul.f32 -0.5, %v6418_v45 }
 0x6be   : > { %v4459_v59 = vpop.eup %4458  ;;  %vm2886_vm11 = vcmp.gt.f32.partialorder %v6382_v12, 20.0  ;;  %vm2877_vm12 = vcmp.gt.f32.partialorder %v6347_v41, 20.0  ;;  %vm6515_vm13 = vcmp.lt.f32.partialorder %v2743_v27, 0.0004427343  ;;  %vm2875_vm14 = vcmp.gt.f32.partialorder %v6353_v37, 20.0 }
 0x6bf   : > { %v4461_v61 = vpop.eup %4460  ;;  %v2754_v55 = vsel %vm6431_vm0, %v2751_v48, %v2748_v31  ;;  %v2784_v18 = vmul.f32 0.6931472, %v4459_v59  ;;  %v2758_v59 = vmul.f32 -0.5, %v6423_v38  ;;  %v2742_v26 = vmul.f32 %v6401_v13, %v2741_v9 }
 0x6c0   : > { %v4463_v63 = vpop.eup %4462  ;;  %v2836_v34 = vadd.f32 1.0, %v4461_v61  ;;  %v2839_v17 = vmul.f32 -0.5, %v4461_v61  ;;  %v2890_v50 = vsel %vm2874_vm15, %v6338_v43, %v2754_v55  ;;  %v2842_v28 = vand.u32 2147483647, %v4461_v61 }
 0x6c1   : > { %v2802_v22 = vmul.f32 0.6931472, %v4463_v63  ;;  %v4465_v11 = vpop.eup %4464  ;;  %v2790_v3 = vsel %vm6439_vm1, %v2787_v10, %v2784_v18  ;;  %v2823_v43 = vmul.f32 %v6413_v24, %v2822_v36  ;;  %v6485_v44 = vmul.f32 0.01, %v2890_v50 }
 0x6c2   : > { %4474 = vlog2.f32 %v2836_v34  ;;  %v6476_v58 = vpop.eup %4466  ;;  %v2854_v1 = vadd.f32 1.0, %v4465_v11  ;;  %v2840_v7 = vadd.f32 1.0, %v2839_v17  ;;  %v2894_v8 = vsel %vm2878_vm3, %v6343_v35, %v2790_v3 }
 0x6c3   : > { %v2808_v57 = vsel %vm6455_vm5, %v2805_v33, %v2802_v22  ;;  %v2857_v48 = vmul.f32 -0.5, %v4465_v11  ;;  %vm6494_vm9 = vcmp.lt.f32.partialorder %v2842_v28, 0.0004427343  ;;  %v2755_v35 = vadd.f32 1.0, %v6423_v38 }
 0x6c4   : > { %4476 = vlog2.f32 %v2854_v1  ;;  %v2896_v25 = vsel %vm2880_vm4, %v6349_v52, %v2808_v57  ;;  %v6500_v47 = vmul.f32 0.01, %v2894_v8  ;;  %v2841_v4 = vmul.f32 %v4461_v61, %v2840_v7 }
 0x6c5   : > { %v4469_v39 = vpop.eup %4468  ;;  %4478 = vlog2.f32 %v2773_v56  ;;  %v2860_v31 = vand.u32 2147483647, %v4465_v11  ;;  %v2791_v52 = vadd.f32 1.0, %v6426_v20  ;;  %v6503_v19 = vmul.f32 0.01, %v2896_v25 }
 0x6c6   : > { %v2820_v53 = vmul.f32 0.6931472, %v4469_v39  ;;  %4480 = vpow2.f32 %v2726_v51  ;;  %v4471_v16 = vpop.eup %4470  ;;  %v2858_v10 = vadd.f32 1.0, %v2857_v48  ;;  %v2779_v61 = vand.u32 2147483647, %v6418_v45 }
 0x6c7   : > { %4482 = vlog2.f32 %v2755_v35  ;;  %v2739_v33 = vmul.f32 0.6931472, %v4471_v16  ;;  %v6512_v55 = vpop.eup %4472  ;;  %v2777_v2 = vadd.f32 1.0, %v2776_v42  ;;  %v2761_v63 = vand.u32 2147483647, %v6423_v38 }
 0x6c8   : > { %v2826_v30 = vsel %vm6465_vm6, %v2823_v43, %v2820_v53  ;;  %4484 = vlog2.f32 %v2791_v52  ;;  %v2925_v13 = vpack.c.bf16 %v6481_v5, %v6452_v54  ;;  %v2927_v34 = vpack.c.bf16 %v6500_v47, %v6485_v44  ;;  %v4106_v47 = vld [vmem:[%s7227_s2 + $0x50] sm:$0xff]  }
 0x6c9   : > { %v2898_v36 = vsel %vm2882_vm7, %v6359_v23, %v2826_v30  ;;  %v2809_v17 = vadd.f32 1.0, %v6446_v29  ;;  %v2745_v14 = vsel %vm6515_vm13, %v2742_v26, %v2739_v33  ;;  %v2759_v40 = vadd.f32 1.0, %v2758_v59 }
 0x6ca   : > { %v2794_v50 = vmul.f32 -0.5, %v6426_v20  ;;  %v2859_v3 = vmul.f32 %v4465_v11, %v2858_v10  ;;  %vm6532_vm15 = vcmp.lt.f32.partialorder %v2860_v31, 0.0004427343  ;;  %vm6536_vm0 = vcmp.lt.f32.partialorder %v2779_v61, 0.0004427343 }
 0x6cb   : > { %4486 = vlog2.f32 %v2809_v17  ;;  %v6540_v28 = vmul.f32 0.01, %v2898_v36  ;;  %v2778_v51 = vmul.f32 %v6418_v45, %v2777_v2  ;;  %v2845_v43 = vadd.f32 1.0, %v6512_v55 }
 0x6cc   : > { %v4475_v46 = vpop.eup %4474  ;;  %vm2879_vm1 = vcmp.gt.f32.partialorder %v6356_v6, 20.0  ;;  %v2889_v27 = vsel %vm2873_vm8, %v6340_v15, %v2745_v14  ;;  %vm6550_vm3 = vcmp.lt.f32.partialorder %v2761_v63, 0.0004427343  ;;  %v2812_v8 = vmul.f32 -0.5, %v6446_v29 }
 0x6cd   : > { %v2838_v22 = vmul.f32 0.6931472, %v4475_v46  ;;  %v2760_v45 = vmul.f32 %v6423_v38, %v2759_v40  ;;  %v2795_v53 = vadd.f32 1.0, %v2794_v50  ;;  %4488 = vlog2.f32 %v2845_v43 }
 0x6ce   : > { %v4477_v57 = vpop.eup %4476  ;;  %v2797_v24 = vand.u32 2147483647, %v6426_v20  ;;  %v2827_v42 = vadd.f32 1.0, %v6476_v58  ;;  %v2905_v31 = vmul.f32 0.01, %v2889_v27  ;;  %v2848_v52 = vmul.f32 -0.5, %v6512_v55 }
 0x6cf   : > { %v2844_v1 = vsel %vm6494_vm9, %v2841_v4, %v2838_v22  ;;  %v4479_v11 = vpop.eup %4478  ;;  %v2856_v7 = vmul.f32 0.6931472, %v4477_v57  ;;  %v2813_v30 = vadd.f32 1.0, %v2812_v8  ;;  %v2815_v59 = vand.u32 2147483647, %v6446_v29 }
 0x6d0   : > { %v6555_v9 = vpop.eup %4480  ;;  %v2775_v25 = vmul.f32 0.6931472, %v4479_v11  ;;  %v2900_v48 = vsel %vm2884_vm10, %v6377_v49, %v2844_v1  ;;  %4490 = vlog2.f32 %v2827_v42  ;;  %vm2798_vm4 = vcmp.lt.f32.partialorder %v2797_v24, 0.0004427343 }
 0x6d1   : > { %v2862_v15 = vsel %vm6532_vm15, %v2859_v3, %v2856_v7  ;;  %v4483_v35 = vpop.eup %4482  ;;  %v6575_v33 = vmul.f32 0.01, %v2900_v48  ;;  %v2863_v63 = vadd.f32 1.0, %v6555_v9  ;;  %v2849_v36 = vadd.f32 1.0, %v2848_v52 }
 0x6d2   : > { %v2902_v4 = vsel %vm2886_vm11, %v6382_v12, %v2862_v15  ;;  %v2781_v38 = vsel %vm6536_vm0, %v2778_v51, %v2775_v25  ;;  %v2757_v16 = vmul.f32 0.6931472, %v4483_v35  ;;  %v4485_v10 = vpop.eup %4484  ;;  %v2796_v12 = vmul.f32 %v6426_v20, %v2795_v53 }
 0x6d3   : > { %v2893_v49 = vsel %vm2877_vm12, %v6347_v41, %v2781_v38  ;;  %v6578_v61 = vmul.f32 0.01, %v2902_v4  ;;  %v2793_v2 = vmul.f32 0.6931472, %v4485_v10  ;;  %v2814_v20 = vmul.f32 %v6446_v29, %v2813_v30  ;;  %v3079_v38 = vpop.permute.xlu0 %3078  ;;  %v3084_v30 = vpop.permute.xlu1 %3083 }
 0x6d4   : > { %v2909_v26 = vmul.f32 0.01, %v2893_v49  ;;  %v2763_v18 = vsel %vm6550_vm3, %v2760_v45, %v2757_v16  ;;  %v2830_v14 = vmul.f32 -0.5, %v6476_v58  ;;  %4492 = vlog2.f32 %v2863_v63 }
 0x6d5   : > { %v2891_v46 = vsel %vm2875_vm14, %v6353_v37, %v2763_v18  ;;  %v4487_v17 = vpop.eup %4486  ;;  %v2799_v22 = vsel %vm2798_vm4, %v2796_v12, %v2793_v2  ;;  %v2851_v3 = vand.u32 2147483647, %v6512_v55  ;;  %v2929_v23 = vpack.c.bf16 %v6575_v33, %v6503_v19 }
 0x6d6   : > { %v2926_v41 = vpack.c.bf16 %v2909_v26, %v2905_v31  ;;  %v2895_v40 = vsel %vm2879_vm1, %v6356_v6, %v2799_v22  ;;  %v2811_v50 = vmul.f32 0.6931472, %v4487_v17  ;;  %v2907_v37 = vmul.f32 0.01, %v2891_v46 }
 0x6d7   : > { %v2911_v56 = vmul.f32 0.01, %v2895_v40  ;;  %vm2816_vm5 = vcmp.lt.f32.partialorder %v2815_v59, 0.0004427343  ;;  %v2931_v29 = vpack.c.bf16 %v6578_v61, %v6540_v28  ;;  %v4489_v57 = vpop.eup %4488  ;;  %vm2881_vm6 = vcmp.gt.f32.partialorder %v6361_v62, 20.0 }
 0x6d8   : > { %2949 = vmatprep.subr.bf16.mxu0 %v2926_v41  ;;  %v2817_v6 = vsel %vm2816_vm5, %v2814_v20, %v2811_v50  ;;  %v2866_v1 = vmul.f32 -0.5, %v6555_v9  ;;  %v2847_v43 = vmul.f32 0.6931472, %v4489_v57  ;;  %v2850_v19 = vmul.f32 %v6512_v55, %v2849_v36 }
 0x6d9   : > { %2950 = vmatpush1.bf16.msra.mxu0 %v2925_v13  ;;  %v2928_v51 = vpack.c.bf16 %v2911_v56, %v2907_v37  ;;  %v2831_v11 = vadd.f32 1.0, %v2830_v14  ;;  %vm2852_vm7 = vcmp.lt.f32.partialorder %v2851_v3, 0.0004427343  ;;  %v2897_v7 = vsel %vm2881_vm6, %v6361_v62, %v2817_v6  ;;  %v3089_v37 = vpop.permute.xlu0 %3088 }
 0x6da   : > { %v2833_v54 = vand.u32 2147483647, %v6476_v58  ;;  %vm2885_vm8 = vcmp.gt.f32.partialorder %v6410_v60, 20.0  ;;  %v2853_v5 = vsel %vm2852_vm7, %v2850_v19, %v2847_v43  ;;  %v4491_v13 = vpop.eup %4490  ;;  %v2867_v27 = vadd.f32 1.0, %v2866_v1 }
 0x6db   : > { %3002 = vmatprep.subr.bf16.mxu1 %v2928_v51  ;;  %v2901_v28 = vsel %vm2885_vm8, %v6410_v60, %v2853_v5  ;;  %v2869_v55 = vand.u32 2147483647, %v6555_v9  ;;  %v2913_v39 = vmul.f32 0.01, %v2897_v7  ;;  %v2829_v25 = vmul.f32 0.6931472, %v4491_v13 }
 0x6dc   : > { %3003 = vmatpush1.bf16.msra.mxu1 %v2927_v34  ;;  %v2917_v8 = vmul.f32 0.01, %v2901_v28  ;;  %v2832_v62 = vmul.f32 %v6476_v58, %v2831_v11  ;;  %vm2834_vm9 = vcmp.lt.f32.partialorder %v2833_v54, 0.0004427343  ;;  %vm2883_vm10 = vcmp.gt.f32.partialorder %v6374_v21, 20.0 }
 0x6dd   : > { %v2868_v44 = vmul.f32 %v6555_v9, %v2867_v27  ;;  %vm2870_vm11 = vcmp.lt.f32.partialorder %v2869_v55, 0.0004427343  ;;  %vm2887_vm12 = vcmp.gt.f32.partialorder %v6436_v32, 20.0 }
 0x6de   : > { %v4493_v45 = vpop.eup %4492  ;;  %v2930_v53 = vpack.c.bf16 %v2917_v8, %v2913_v39  ;;  %v2835_v48 = vsel %vm2834_vm9, %v2832_v62, %v2829_v25 }
 0x6df   : > { %v2865_v15 = vmul.f32 0.6931472, %v4493_v45  ;;  %v2899_v60 = vsel %vm2883_vm10, %v6374_v21, %v2835_v48  ;;  %v4107_v21 = vld [vmem:[%s7227_s2 + $0x58] sm:$0xff]  }
 0x6e0   : > { %2951 = vmatprep.subr.bf16.mxu0 %v2930_v53  ;;  %v2915_v24 = vmul.f32 0.01, %v2899_v60 }
 0x6e1   : > { %v2871_v58 = vsel %vm2870_vm11, %v2868_v44, %v2865_v15  ;;  %2952 = vmatpush1.bf16.msra.mxu0 %v2929_v23 }
 0x6e2   : > { %v2903_v34 = vsel %vm2887_vm12, %v6436_v32, %v2871_v58 }
 0x6e3   : > { %v2919_v42 = vmul.f32 0.01, %v2903_v34 }
 0x6e4   : > { %4039 = vmatmul.mubr.msk.bf16.vlgmr.msra.gmra.mrb[48].mxu0 %vm782_vm2, %v4106_v47 }
 0x6e5   : > { %v2932_v35 = vpack.c.bf16 %v2919_v42, %v2915_v24  ;;  %2991 = vmatprep.mubr.bf16.mxu0 %v4630_v0 }
 0x6e7   : > { %3004 = vmatprep.subr.bf16.mxu1 %v2932_v35 }
 0x6e8   : > { %3005 = vmatpush1.bf16.msra.mxu1 %v2931_v29 }
 0x6eb   : > { %4041 = vmatmul.mubr.msk.bf16.vlgmr.msra.gmra.mrb[48].mxu1 %vm782_vm2, %v4106_v47 }
 0x6ec   : > { %3044 = vmatprep.mubr.bf16.mxu1 %v4630_v0  ;;  %4040 = vmatmul.mubr.msk.bf16.gmra.mrb[52].mxu0 %vm782_vm2, %v4107_v21 }
 0x6ed   : > { %3413 = vmatprep.mubr.bf16.mxu0 %v4630_v0 }
 0x6f3   : > { %4042 = vmatmul.mubr.msk.bf16.gmra.mrb[52].mxu1 %vm782_vm2, %v4107_v21 }
 0x6f4   : > { %3466 = vmatprep.mubr.bf16.mxu1 %v4630_v0 }
 0x7b7   : > { %v2983_v32 = vpop.f32.mrb[48].mxu0 }
 0x7b8   : > { %v3060_v9 = vmul.f32 100.0, %v2983_v32  ;;  %v2985_v4 = vpop.f32.mrb[49].mxu0 }
 0x7b9   : > { %v2987_v31 = vpop.f32.mrb[50].mxu0  ;;  %v3061_v12 = vmul.f32 100.0, %v2985_v4 }
 0x7ba   : > { %v6630_v52 = vadd.f32 %v3079_v38, %v3060_v9  ;;  %v3064_v49 = vmul.f32 100.0, %v2987_v31  ;;  %v2989_v16 = vpop.f32.mrb[51].mxu0 }
 0x7bb   : > { %v3065_v46 = vmul.f32 100.0, %v2989_v16  ;;  %v6638_v40 = vadd.f32 %v3079_v38, %v3061_v12  ;;  %v6670_v16 = vpop.permute.xlu1 %3093 }
 0x7bc   : > { %v3112_v59 = vmin.f32 %v6630_v52, 20.0  ;;  %v6633_v10 = vadd.f32 %v3084_v30, %v3064_v49  ;;  %vm3304_vm14 = vcmp.gt.f32.partialorder %v6630_v52, 20.0 }
 0x7bd   : > { %v6645_v1 = vadd.f32 %v3084_v30, %v3065_v46  ;;  %v3113_v7 = vmin.f32 %v6638_v40, 20.0  ;;  %vm3305_vm10 = vcmp.gt.f32.partialorder %v6638_v40, 20.0 }
 0x7be   : > { %v3128_v33 = vmul.f32 1.442695, %v3112_v59  ;;  %v3036_v26 = vpop.f32.mrb[48].mxu1  ;;  %v3116_v61 = vmin.f32 %v6633_v10, 20.0  ;;  %vm3308_vm0 = vcmp.gt.f32.partialorder %v6633_v10, 20.0 }
 0x7bf   : > { %v3062_v18 = vmul.f32 100.0, %v3036_v26  ;;  %v3038_v2 = vpop.f32.mrb[49].mxu1  ;;  %v2993_v36 = vpop.f32.mrb[52].mxu0  ;;  %v3117_v8 = vmin.f32 %v6645_v1, 20.0  ;;  %v3130_v44 = vmul.f32 1.442695, %v3113_v7 }
 0x7c0   : > { %4494 = vpow2.f32 %v3128_v33  ;;  %v3136_v63 = vmul.f32 1.442695, %v3116_v61  ;;  %v3040_v41 = vpop.f32.mrb[50].mxu1  ;;  %v2995_v14 = vpop.f32.mrb[53].mxu0  ;;  %v3063_v50 = vmul.f32 100.0, %v3038_v2  ;;  %v3068_v3 = vmul.f32 100.0, %v2993_v36 }
 0x7c1   : > { %v6636_v17 = vadd.f32 %v3079_v38, %v3062_v18  ;;  %v3066_v22 = vmul.f32 100.0, %v3040_v41  ;;  %v3042_v20 = vpop.f32.mrb[51].mxu1  ;;  %v2997_v23 = vpop.f32.mrb[54].mxu0  ;;  %v3069_v11 = vmul.f32 100.0, %v2995_v14  ;;  %v3138_v42 = vmul.f32 1.442695, %v3117_v8 }
 0x7c2   : > { %4496 = vpow2.f32 %v3136_v63  ;;  %v3067_v57 = vmul.f32 100.0, %v3042_v20  ;;  %v6643_v6 = vpop.f32.mrb[55].mxu0  ;;  %v6647_v51 = vadd.f32 %v3089_v37, %v3068_v3  ;;  %v6651_v54 = vadd.f32 %v3079_v38, %v3063_v50 }
 0x7c3   : > { %v3114_v56 = vmin.f32 %v6636_v17, 20.0  ;;  %v6641_v29 = vadd.f32 %v3084_v30, %v3066_v22  ;;  %v6659_v53 = vadd.f32 %v3089_v37, %v3069_v11  ;;  %v3072_v21 = vmul.f32 100.0, %v2997_v23 }
 0x7c4   : > { %v3120_v5 = vmin.f32 %v6647_v51, 20.0  ;;  %v6654_v27 = vadd.f32 %v3084_v30, %v3067_v57  ;;  %v3115_v60 = vmin.f32 %v6651_v54, 20.0  ;;  %vm3306_vm1 = vcmp.gt.f32.partialorder %v6636_v17, 20.0 }
 0x7c5   : > { %v3132_v43 = vmul.f32 1.442695, %v3114_v56  ;;  %v3118_v19 = vmin.f32 %v6641_v29, 20.0  ;;  %v3121_v9 = vmin.f32 %v6659_v53, 20.0  ;;  %v6675_v26 = vadd.f32 %v6670_v16, %v3072_v21 }
 0x7c6   : > { %v3046_v13 = vpop.f32.mrb[52].mxu1  ;;  %v3144_v25 = vmul.f32 1.442695, %v3120_v5  ;;  %v3119_v58 = vmin.f32 %v6654_v27, 20.0  ;;  %v3134_v31 = vmul.f32 1.442695, %v3115_v60 }
 0x7c7   : > { %4498 = vpow2.f32 %v3132_v43  ;;  %v3140_v28 = vmul.f32 1.442695, %v3118_v19  ;;  %v3070_v55 = vmul.f32 100.0, %v3046_v13  ;;  %v3048_v39 = vpop.f32.mrb[53].mxu1  ;;  %v3146_v61 = vmul.f32 1.442695, %v3121_v9 }
 0x7c8   : > { %v3050_v62 = vpop.f32.mrb[54].mxu1  ;;  %v3071_v34 = vmul.f32 100.0, %v3048_v39  ;;  %v3142_v30 = vmul.f32 1.442695, %v3119_v58  ;;  %v3124_v22 = vmin.f32 %v6675_v26, 20.0  ;;  %v3073_v56 = vmul.f32 100.0, %v6643_v6 }
 0x7c9   : > { %4500 = vpow2.f32 %v3140_v28  ;;  %v6657_v45 = vadd.f32 %v3089_v37, %v3070_v55  ;;  %v6661_v48 = vpop.f32.mrb[55].mxu1  ;;  %v3074_v4 = vmul.f32 100.0, %v3050_v62  ;;  %vm3310_vm5 = vcmp.gt.f32.partialorder %v6641_v29, 20.0 }
 0x7ca   : > { %v4495_v15 = vpop.eup %4494  ;;  %4502 = vpow2.f32 %v3144_v25  ;;  %v6672_v59 = vadd.f32 %v3089_v37, %v3071_v34  ;;  %v3152_v37 = vmul.f32 1.442695, %v3124_v22  ;;  %vm3312_vm6 = vcmp.gt.f32.partialorder %v6647_v51, 20.0 }
 0x7cb   : > { %v3160_v47 = vadd.f32 1.0, %v4495_v15  ;;  %v3122_v35 = vmin.f32 %v6657_v45, 20.0  ;;  %v3163_v38 = vmul.f32 -0.5, %v4495_v15  ;;  %v3166_v33 = vand.u32 2147483647, %v4495_v15 }
 0x7cc   : > { %v6665_v24 = vpop.eup %4496  ;;  %v6680_v18 = vadd.f32 %v6670_v16, %v3074_v4  ;;  %v3123_v36 = vmin.f32 %v6672_v59, 20.0  ;;  %vm3314_vm9 = vcmp.gt.f32.partialorder %v6657_v45, 20.0  ;;  %vm3316_vm12 = vcmp.gt.f32.partialorder %v6675_v26, 20.0 }
 0x7cd   : > { %4504 = vlog2.f32 %v3160_v47  ;;  %v3196_v32 = vadd.f32 1.0, %v6665_v24  ;;  %v3148_v49 = vmul.f32 1.442695, %v3122_v35  ;;  %v3164_v2 = vadd.f32 1.0, %v3163_v38 }
 0x7ce   : > { %4506 = vpow2.f32 %v3130_v44  ;;  %v3199_v46 = vmul.f32 -0.5, %v6665_v24  ;;  %vm6688_vm13 = vcmp.lt.f32.partialorder %v3166_v33, 0.0004427343  ;;  %v3126_v50 = vmin.f32 %v6680_v18, 20.0 }
 0x7cf   : > { %4508 = vlog2.f32 %v3196_v32  ;;  %v3202_v23 = vand.u32 2147483647, %v6665_v24  ;;  %v3165_v57 = vmul.f32 %v4495_v15, %v3164_v2  ;;  %v3150_v13 = vmul.f32 1.442695, %v3123_v36 }
 0x7d0   : > { %4510 = vpow2.f32 %v3148_v49  ;;  %v3200_v7 = vadd.f32 1.0, %v3199_v46  ;;  %v3156_v8 = vmul.f32 1.442695, %v3126_v50  ;;  %v6708_v15 = vadd.f32 %v6670_v16, %v3073_v56 }
 0x7d1   : > { %v6677_v12 = vpop.eup %4498  ;;  %4512 = vpow2.f32 %v3138_v42  ;;  %vm6702_vm15 = vcmp.lt.f32.partialorder %v3202_v23, 0.0004427343  ;;  %v3075_v44 = vmul.f32 100.0, %v6661_v48 }
 0x7d2   : > { %v3178_v63 = vadd.f32 1.0, %v6677_v12  ;;  %4514 = vpow2.f32 %v3134_v31  ;;  %v3181_v43 = vmul.f32 -0.5, %v6677_v12  ;;  %v3184_v6 = vand.u32 2147483647, %v6677_v12 }
 0x7d3   : > { %v6683_v41 = vpop.eup %4500  ;;  %4516 = vpow2.f32 %v3142_v30  ;;  %v3201_v21 = vmul.f32 %v6665_v24, %v3200_v7  ;;  %v3125_v31 = vmin.f32 %v6708_v15, 20.0  ;;  %v6734_v24 = vadd.f32 %v6670_v16, %v3075_v44 }
 0x7d4   : > { %4518 = vlog2.f32 %v3178_v63  ;;  %v3214_v14 = vadd.f32 1.0, %v6683_v41  ;;  %v4503_v3 = vpop.eup %4502  ;;  %v3217_v5 = vmul.f32 -0.5, %v6683_v41  ;;  %v3182_v58 = vadd.f32 1.0, %v3181_v43 }
 0x7d5   : > { %4520 = vpow2.f32 %v3146_v61  ;;  %v3232_v19 = vadd.f32 1.0, %v4503_v3  ;;  %v3235_v39 = vmul.f32 -0.5, %v4503_v3  ;;  %v3220_v34 = vand.u32 2147483647, %v6683_v41 }
 0x7d6   : > { %4522 = vlog2.f32 %v3214_v14  ;;  %v3218_v9 = vadd.f32 1.0, %v3217_v5  ;;  %v3238_v38 = vand.u32 2147483647, %v4503_v3  ;;  %vm6729_vm3 = vcmp.lt.f32.partialorder %v3184_v6, 0.0004427343 }
 0x7d7   : > { %v4505_v11 = vpop.eup %4504  ;;  %4524 = vpow2.f32 %v3152_v37  ;;  %v3236_v4 = vadd.f32 1.0, %v3235_v39  ;;  %v3183_v2 = vmul.f32 %v6677_v12, %v3182_v58  ;;  %vm6737_vm4 = vcmp.lt.f32.partialorder %v3220_v34, 0.0004427343 }
 0x7d8   : > { %v6699_v28 = vpop.eup %4506  ;;  %v3162_v55 = vmul.f32 0.6931472, %v4505_v11  ;;  %4526 = vlog2.f32 %v3232_v19  ;;  %v3154_v20 = vmul.f32 1.442695, %v3125_v31  ;;  %v3219_v23 = vmul.f32 %v6683_v41, %v3218_v9 }
 0x7d9   : > { %v4509_v25 = vpop.eup %4508  ;;  %4528 = vpow2.f32 %v3156_v8  ;;  %v3169_v12 = vadd.f32 1.0, %v6699_v28  ;;  %v3237_v37 = vmul.f32 %v4503_v3, %v3236_v4  ;;  %vm6753_vm7 = vcmp.lt.f32.partialorder %v3238_v38, 0.0004427343 }
 0x7da   : > { %v6711_v60 = vpop.eup %4510  ;;  %v3168_v47 = vsel %vm6688_vm13, %v3165_v57, %v3162_v55  ;;  %v3198_v35 = vmul.f32 0.6931472, %v4509_v25  ;;  %4530 = vpow2.f32 %v3150_v13  ;;  %v3127_v11 = vmin.f32 %v6734_v24, 20.0 }
 0x7db   : > { %v6716_v42 = vpop.eup %4512  ;;  %v3250_v32 = vadd.f32 1.0, %v6711_v60  ;;  %v3320_v30 = vsel %vm3304_vm14, %v6630_v52, %v3168_v47  ;;  %v3253_v46 = vmul.f32 -0.5, %v6711_v60  ;;  %v3256_v52 = vand.u32 2147483647, %v6711_v60 }
 0x7dc   : > { %v6721_v48 = vpop.eup %4514  ;;  %v3204_v16 = vsel %vm6702_vm15, %v3201_v21, %v3198_v35  ;;  %v6750_v50 = vmul.f32 0.01, %v3320_v30  ;;  %v3172_v8 = vmul.f32 -0.5, %v6699_v28  ;;  %v3158_v35 = vmul.f32 1.442695, %v3127_v11 }
 0x7dd   : > { %v6724_v49 = vpop.eup %4516  ;;  %4532 = vlog2.f32 %v3250_v32  ;;  %v3324_v5 = vsel %vm3308_vm0, %v6633_v10, %v3204_v16  ;;  %v3254_v13 = vadd.f32 1.0, %v3253_v46  ;;  %vm6763_vm8 = vcmp.lt.f32.partialorder %v3256_v52, 0.0004427343 }
 0x7de   : > { %v4519_v61 = vpop.eup %4518  ;;  %4534 = vlog2.f32 %v3169_v12  ;;  %v3205_v10 = vadd.f32 1.0, %v6716_v42  ;;  %v6779_v21 = vmul.f32 0.01, %v3324_v5  ;;  %v3175_v9 = vand.u32 2147483647, %v6699_v28 }
 0x7df   : > { %v6744_v36 = vpop.eup %4520  ;;  %v3180_v22 = vmul.f32 0.6931472, %v4519_v61  ;;  %4536 = vpow2.f32 %v3154_v20  ;;  %v3173_v30 = vadd.f32 1.0, %v3172_v8  ;;  %v3208_v63 = vmul.f32 -0.5, %v6716_v42 }
 0x7e0   : > { %v4523_v14 = vpop.eup %4522  ;;  %vm3318_vm13 = vcmp.gt.f32.partialorder %v6680_v18, 20.0  ;;  %vm3309_vm14 = vcmp.gt.f32.partialorder %v6645_v1, 20.0  ;;  %vm6813_vm15 = vcmp.lt.f32.partialorder %v3175_v9, 0.0004427343  ;;  %vm3307_vm0 = vcmp.gt.f32.partialorder %v6651_v54, 20.0 }
 0x7e1   : > { %v4525_v57 = vpop.eup %4524  ;;  %v3186_v43 = vsel %vm6729_vm3, %v3183_v2, %v3180_v22  ;;  %v3216_v19 = vmul.f32 0.6931472, %v4523_v14  ;;  %v3190_v14 = vmul.f32 -0.5, %v6721_v48  ;;  %v3174_v56 = vmul.f32 %v6699_v28, %v3173_v30 }
 0x7e2   : > { %v4527_v7 = vpop.eup %4526  ;;  %v3268_v41 = vadd.f32 1.0, %v4525_v57  ;;  %v3271_v3 = vmul.f32 -0.5, %v4525_v57  ;;  %v3322_v6 = vsel %vm3306_vm1, %v6636_v17, %v3186_v43  ;;  %v3274_v58 = vand.u32 2147483647, %v4525_v57 }
 0x7e3   : > { %v3234_v55 = vmul.f32 0.6931472, %v4527_v7  ;;  %v4529_v25 = vpop.eup %4528  ;;  %v3222_v62 = vsel %vm6737_vm4, %v3219_v23, %v3216_v19  ;;  %v3255_v17 = vmul.f32 %v6711_v60, %v3254_v13  ;;  %v6783_v38 = vmul.f32 0.01, %v3322_v6 }
 0x7e4   : > { %4538 = vlog2.f32 %v3268_v41  ;;  %v6774_v44 = vpop.eup %4530  ;;  %v3286_v34 = vadd.f32 1.0, %v4529_v25  ;;  %v3272_v32 = vadd.f32 1.0, %v3271_v3  ;;  %v3326_v31 = vsel %vm3310_vm5, %v6641_v29, %v3222_v62 }
 0x7e5   : > { %v3240_v47 = vsel %vm6753_vm7, %v3237_v37, %v3234_v55  ;;  %v3289_v2 = vmul.f32 -0.5, %v4529_v25  ;;  %vm6792_vm11 = vcmp.lt.f32.partialorder %v3274_v58, 0.0004427343  ;;  %v3187_v29 = vadd.f32 1.0, %v6721_v48 }
 0x7e6   : > { %4540 = vlog2.f32 %v3286_v34  ;;  %v3328_v33 = vsel %vm3312_vm6, %v6647_v51, %v3240_v47  ;;  %v6798_v46 = vmul.f32 0.01, %v3326_v31  ;;  %v3273_v52 = vmul.f32 %v4525_v57, %v3272_v32 }
 0x7e7   : > { %v4533_v4 = vpop.eup %4532  ;;  %4542 = vlog2.f32 %v3205_v10  ;;  %v3292_v22 = vand.u32 2147483647, %v4529_v25  ;;  %v3223_v51 = vadd.f32 1.0, %v6724_v49  ;;  %v6801_v20 = vmul.f32 0.01, %v3328_v33 }
 0x7e8   : > { %v3252_v61 = vmul.f32 0.6931472, %v4533_v4  ;;  %4544 = vpow2.f32 %v3158_v35  ;;  %v4535_v16 = vpop.eup %4534  ;;  %v3290_v23 = vadd.f32 1.0, %v3289_v2  ;;  %v3211_v57 = vand.u32 2147483647, %v6716_v42 }
 0x7e9   : > { %4546 = vlog2.f32 %v3187_v29  ;;  %v3171_v37 = vmul.f32 0.6931472, %v4535_v16  ;;  %v6810_v43 = vpop.eup %4536  ;;  %v3209_v11 = vadd.f32 1.0, %v3208_v63  ;;  %v3193_v7 = vand.u32 2147483647, %v6721_v48 }
 0x7ea   : > { %v3258_v12 = vsel %vm6763_vm8, %v3255_v17, %v3252_v61  ;;  %4548 = vlog2.f32 %v3223_v51  ;;  %v3357_v28 = vpack.c.bf16 %v6779_v21, %v6750_v50  ;;  %v3359_v41 = vpack.c.bf16 %v6798_v46, %v6783_v38  ;;  %v4108_v46 = vld [vmem:[%s7227_s2 + $0x60] sm:$0xff]  }
 0x7eb   : > { %v3330_v13 = vsel %vm3314_vm9, %v6657_v45, %v3258_v12  ;;  %v3241_v3 = vadd.f32 1.0, %v6744_v36  ;;  %v3177_v39 = vsel %vm6813_vm15, %v3174_v56, %v3171_v37  ;;  %v3191_v8 = vadd.f32 1.0, %v3190_v14 }
 0x7ec   : > { %v3226_v6 = vmul.f32 -0.5, %v6724_v49  ;;  %v3291_v62 = vmul.f32 %v4529_v25, %v3290_v23  ;;  %vm6830_vm1 = vcmp.lt.f32.partialorder %v3292_v22, 0.0004427343  ;;  %vm6834_vm3 = vcmp.lt.f32.partialorder %v3211_v57, 0.0004427343 }
 0x7ed   : > { %4550 = vlog2.f32 %v3241_v3  ;;  %v6838_v58 = vmul.f32 0.01, %v3330_v13  ;;  %v3210_v35 = vmul.f32 %v6716_v42, %v3209_v11  ;;  %v3277_v17 = vadd.f32 1.0, %v6810_v43 }
 0x7ee   : > { %v4539_v5 = vpop.eup %4538  ;;  %vm3311_vm4 = vcmp.gt.f32.partialorder %v6654_v27, 20.0  ;;  %v3321_v9 = vsel %vm3305_vm10, %v6638_v40, %v3177_v39  ;;  %vm6848_vm5 = vcmp.lt.f32.partialorder %v3193_v7, 0.0004427343  ;;  %v3244_v31 = vmul.f32 -0.5, %v6744_v36 }
 0x7ef   : > { %v3270_v55 = vmul.f32 0.6931472, %v4539_v5  ;;  %v3192_v42 = vmul.f32 %v6721_v48, %v3191_v8  ;;  %v3227_v61 = vadd.f32 1.0, %v3226_v6  ;;  %4552 = vlog2.f32 %v3277_v17 }
 0x7f0   : > { %v4541_v47 = vpop.eup %4540  ;;  %v3229_v60 = vand.u32 2147483647, %v6724_v49  ;;  %v3259_v63 = vadd.f32 1.0, %v6774_v44  ;;  %v3337_v22 = vmul.f32 0.01, %v3321_v9  ;;  %v3280_v51 = vmul.f32 -0.5, %v6810_v43 }
 0x7f1   : > { %v3276_v34 = vsel %vm6792_vm11, %v3273_v52, %v3270_v55  ;;  %v4543_v25 = vpop.eup %4542  ;;  %v3288_v32 = vmul.f32 0.6931472, %v4541_v47  ;;  %v3245_v12 = vadd.f32 1.0, %v3244_v31  ;;  %v3247_v14 = vand.u32 2147483647, %v6744_v36 }
 0x7f2   : > { %v6853_v30 = vpop.eup %4544  ;;  %v3207_v33 = vmul.f32 0.6931472, %v4543_v25  ;;  %v3332_v2 = vsel %vm3316_vm12, %v6675_v26, %v3276_v34  ;;  %4554 = vlog2.f32 %v3259_v63  ;;  %vm3230_vm6 = vcmp.lt.f32.partialorder %v3229_v60, 0.0004427343 }
 0x7f3   : > { %v3294_v40 = vsel %vm6830_vm1, %v3291_v62, %v3288_v32  ;;  %v4547_v29 = vpop.eup %4546  ;;  %v6873_v37 = vmul.f32 0.01, %v3332_v2  ;;  %v3295_v7 = vadd.f32 1.0, %v6853_v30  ;;  %v3281_v13 = vadd.f32 1.0, %v3280_v51 }
 0x7f4   : > { %v3334_v52 = vsel %vm3318_vm13, %v6680_v18, %v3294_v40  ;;  %v3213_v48 = vsel %vm6834_vm3, %v3210_v35, %v3207_v33  ;;  %v3189_v16 = vmul.f32 0.6931472, %v4547_v29  ;;  %v4549_v23 = vpop.eup %4548  ;;  %v3228_v18 = vmul.f32 %v6724_v49, %v3227_v61 }
 0x7f5   : > { %v3325_v26 = vsel %vm3309_vm14, %v6645_v1, %v3213_v48  ;;  %v6876_v57 = vmul.f32 0.01, %v3334_v52  ;;  %v3225_v11 = vmul.f32 0.6931472, %v4549_v23  ;;  %v3246_v49 = vmul.f32 %v6744_v36, %v3245_v12  ;;  %v3511_v48 = vpop.permute.xlu0 %3510  ;;  %v3516_v12 = vpop.permute.xlu1 %3515 }
 0x7f6   : > { %v3341_v56 = vmul.f32 0.01, %v3325_v26  ;;  %v3195_v19 = vsel %vm6848_vm5, %v3192_v42, %v3189_v16  ;;  %v3262_v39 = vmul.f32 -0.5, %v6774_v44  ;;  %4556 = vlog2.f32 %v3295_v7 }
 0x7f7   : > { %v3323_v5 = vsel %vm3307_vm0, %v6651_v54, %v3195_v19  ;;  %v4551_v3 = vpop.eup %4550  ;;  %v3231_v55 = vsel %vm3230_vm6, %v3228_v18, %v3225_v11  ;;  %v3283_v62 = vand.u32 2147483647, %v6810_v43  ;;  %v3361_v45 = vpack.c.bf16 %v6873_v37, %v6801_v20 }
 0x7f8   : > { %v3358_v1 = vpack.c.bf16 %v3341_v56, %v3337_v22  ;;  %v3327_v8 = vsel %vm3311_vm4, %v6654_v27, %v3231_v55  ;;  %v3243_v6 = vmul.f32 0.6931472, %v4551_v3  ;;  %v3339_v54 = vmul.f32 0.01, %v3323_v5 }
 0x7f9   : > { %v3343_v10 = vmul.f32 0.01, %v3327_v8  ;;  %vm3248_vm7 = vcmp.lt.f32.partialorder %v3247_v14, 0.0004427343  ;;  %v3363_v36 = vpack.c.bf16 %v6876_v57, %v6838_v58  ;;  %v4553_v47 = vpop.eup %4552  ;;  %vm3313_vm8 = vcmp.gt.f32.partialorder %v6659_v53, 20.0 }
 0x7fa   : > { %3381 = vmatprep.subr.bf16.mxu0 %v3358_v1  ;;  %v3249_v27 = vsel %vm3248_vm7, %v3246_v49, %v3243_v6  ;;  %v3298_v34 = vmul.f32 -0.5, %v6853_v30  ;;  %v3279_v17 = vmul.f32 0.6931472, %v4553_v47  ;;  %v3282_v20 = vmul.f32 %v6810_v43, %v3281_v13 }
 0x7fb   : > { %3382 = vmatpush1.bf16.msra.mxu0 %v3357_v28  ;;  %v3360_v35 = vpack.c.bf16 %v3343_v10, %v3339_v54  ;;  %v3263_v25 = vadd.f32 1.0, %v3262_v39  ;;  %vm3284_vm9 = vcmp.lt.f32.partialorder %v3283_v62, 0.0004427343  ;;  %v3329_v32 = vsel %vm3313_vm8, %v6659_v53, %v3249_v27 }
 0x7fc   : > { %v3265_v50 = vand.u32 2147483647, %v6774_v44  ;;  %vm3317_vm10 = vcmp.gt.f32.partialorder %v6708_v15, 20.0  ;;  %v3285_v21 = vsel %vm3284_vm9, %v3282_v20, %v3279_v17  ;;  %v4555_v28 = vpop.eup %4554  ;;  %v3299_v9 = vadd.f32 1.0, %v3298_v34 }
 0x7fd   : > { %3434 = vmatprep.subr.bf16.mxu1 %v3360_v35  ;;  %v3333_v58 = vsel %vm3317_vm10, %v6708_v15, %v3285_v21  ;;  %v3301_v43 = vand.u32 2147483647, %v6853_v30  ;;  %v3345_v4 = vmul.f32 0.01, %v3329_v32  ;;  %v3261_v33 = vmul.f32 0.6931472, %v4555_v28 }
 0x7fe   : > { %3435 = vmatpush1.bf16.msra.mxu1 %v3359_v41  ;;  %v3349_v31 = vmul.f32 0.01, %v3333_v58  ;;  %v3264_v53 = vmul.f32 %v6774_v44, %v3263_v25  ;;  %vm3266_vm11 = vcmp.lt.f32.partialorder %v3265_v50, 0.0004427343  ;;  %vm3315_vm12 = vcmp.gt.f32.partialorder %v6672_v59, 20.0 }
 0x7ff   : > { %v3300_v38 = vmul.f32 %v6853_v30, %v3299_v9  ;;  %vm3302_vm13 = vcmp.lt.f32.partialorder %v3301_v43, 0.0004427343  ;;  %vm3319_vm14 = vcmp.gt.f32.partialorder %v6734_v24, 20.0 }
 0x800   : > { %v4557_v42 = vpop.eup %4556  ;;  %v3362_v61 = vpack.c.bf16 %v3349_v31, %v3345_v4  ;;  %v3267_v2 = vsel %vm3266_vm11, %v3264_v53, %v3261_v33 }
 0x801   : > { %v3297_v40 = vmul.f32 0.6931472, %v4557_v42  ;;  %v3331_v15 = vsel %vm3315_vm12, %v6672_v59, %v3267_v2  ;;  %v4109_v59 = vld [vmem:[%s7227_s2 + $0x68] sm:$0xff]  }
 0x802   : > { %3383 = vmatprep.subr.bf16.mxu0 %v3362_v61  ;;  %v3347_v60 = vmul.f32 0.01, %v3331_v15 }
 0x803   : > { %v3303_v44 = vsel %vm3302_vm13, %v3300_v38, %v3297_v40  ;;  %3384 = vmatpush1.bf16.msra.mxu0 %v3361_v45  ;;  %v3521_v45 = vpop.permute.xlu0 %3520 }
 0x804   : > { %v3335_v41 = vsel %vm3319_vm14, %v6734_v24, %v3303_v44 }
 0x805   : > { %v3351_v63 = vmul.f32 0.01, %v3335_v41 }
 0x806   : > { %4053 = vmatmul.mubr.msk.bf16.vlgmr.msra.gmra.mrb[56].mxu0 %vm782_vm2, %v4108_v46 }
 0x807   : > { %v3364_v29 = vpack.c.bf16 %v3351_v63, %v3347_v60  ;;  %3423 = vmatprep.mubr.bf16.mxu0 %v4630_v0 }
 0x809   : > { %3436 = vmatprep.subr.bf16.mxu1 %v3364_v29 }
 0x80a   : > { %3437 = vmatpush1.bf16.msra.mxu1 %v3363_v36 }
 0x80d   : > { %4055 = vmatmul.mubr.msk.bf16.vlgmr.msra.gmra.mrb[56].mxu1 %vm782_vm2, %v4108_v46 }
 0x80e   : > { %3476 = vmatprep.mubr.bf16.mxu1 %v4630_v0  ;;  %4054 = vmatmul.mubr.msk.bf16.gmra.mrb[60].mxu0 %vm782_vm2, %v4109_v59 }
 0x80f   : > { %3834 = vmatprep.mubr.bf16.mxu0 %v4630_v0 }
 0x815   : > { %4056 = vmatmul.mubr.msk.bf16.gmra.mrb[60].mxu1 %vm782_vm2, %v4109_v59 }
 0x816   : > { %3875 = vmatprep.mubr.bf16.mxu1 %v4630_v0 }
 0x8d9   : > { %v3415_v24 = vpop.f32.mrb[56].mxu0 }
 0x8da   : > { %v3492_v30 = vmul.f32 100.0, %v3415_v24  ;;  %v3417_v52 = vpop.f32.mrb[57].mxu0 }
 0x8db   : > { %v3419_v22 = vpop.f32.mrb[58].mxu0  ;;  %v3493_v18 = vmul.f32 100.0, %v3417_v52 }
 0x8dc   : > { %v6928_v51 = vadd.f32 %v3511_v48, %v3492_v30  ;;  %v3496_v26 = vmul.f32 100.0, %v3419_v22  ;;  %v3421_v16 = vpop.f32.mrb[59].mxu0 }
 0x8dd   : > { %v3497_v1 = vmul.f32 100.0, %v3421_v16  ;;  %v6936_v39 = vadd.f32 %v3511_v48, %v3493_v18 }
 0x8de   : > { %v3544_v14 = vmin.f32 %v6928_v51, 20.0  ;;  %v6931_v23 = vadd.f32 %v3516_v12, %v3496_v26  ;;  %v6968_v26 = vpop.permute.xlu1 %3525  ;;  %vm3736_vm0 = vcmp.gt.f32.partialorder %v6928_v51, 20.0 }
 0x8df   : > { %v6943_v27 = vadd.f32 %v3516_v12, %v3497_v1  ;;  %v3545_v25 = vmin.f32 %v6936_v39, 20.0  ;;  %vm3737_vm12 = vcmp.gt.f32.partialorder %v6936_v39, 20.0 }
 0x8e0   : > { %v3560_v37 = vmul.f32 1.442695, %v3544_v14  ;;  %v3468_v56 = vpop.f32.mrb[56].mxu1  ;;  %v3548_v57 = vmin.f32 %v6931_v23, 20.0  ;;  %vm3740_vm3 = vcmp.gt.f32.partialorder %v6931_v23, 20.0 }
 0x8e1   : > { %v3494_v0 = vmul.f32 100.0, %v3468_v56  ;;  %v3470_v19 = vpop.f32.mrb[57].mxu1  ;;  %v3425_v5 = vpop.f32.mrb[60].mxu0  ;;  %v3549_v4 = vmin.f32 %v6943_v27, 20.0  ;;  %v3562_v40 = vmul.f32 1.442695, %v3545_v25 }
 0x8e2   : > { %4558 = vpow2.f32 %v3560_v37  ;;  %v3568_v11 = vmul.f32 1.442695, %v3548_v57  ;;  %v3472_v7 = vpop.f32.mrb[58].mxu1  ;;  %v3427_v49 = vpop.f32.mrb[61].mxu0  ;;  %v3495_v8 = vmul.f32 100.0, %v3470_v19  ;;  %v3500_v6 = vmul.f32 100.0, %v3425_v5 }
 0x8e3   : > { %v6934_v13 = vadd.f32 %v3511_v48, %v3494_v0  ;;  %v3498_v3 = vmul.f32 100.0, %v3472_v7  ;;  %v3474_v55 = vpop.f32.mrb[59].mxu1  ;;  %v3429_v62 = vpop.f32.mrb[62].mxu0  ;;  %v3501_v20 = vmul.f32 100.0, %v3427_v49  ;;  %v3570_v60 = vmul.f32 1.442695, %v3549_v4 }
 0x8e4   : > { %4560 = vpow2.f32 %v3568_v11  ;;  %v3499_v36 = vmul.f32 100.0, %v3474_v55  ;;  %v6941_v47 = vpop.f32.mrb[63].mxu0  ;;  %v6945_v34 = vadd.f32 %v3521_v45, %v3500_v6  ;;  %v6949_v32 = vadd.f32 %v3511_v48, %v3495_v8 }
 0x8e5   : > { %v3546_v54 = vmin.f32 %v6934_v13, 20.0  ;;  %v6939_v10 = vadd.f32 %v3516_v12, %v3498_v3  ;;  %v6957_v42 = vadd.f32 %v3521_v45, %v3501_v20  ;;  %v3504_v29 = vmul.f32 100.0, %v3429_v62 }
 0x8e6   : > { %v3552_v50 = vmin.f32 %v6945_v34, 20.0  ;;  %v6952_v58 = vadd.f32 %v3516_v12, %v3499_v36  ;;  %v3547_v38 = vmin.f32 %v6949_v32, 20.0  ;;  %vm3738_vm4 = vcmp.gt.f32.partialorder %v6934_v13, 20.0 }
 0x8e7   : > { %v3564_v35 = vmul.f32 1.442695, %v3546_v54  ;;  %v3550_v17 = vmin.f32 %v6939_v10, 20.0  ;;  %v3553_v24 = vmin.f32 %v6957_v42, 20.0  ;;  %v6973_v37 = vadd.f32 %v6968_v26, %v3504_v29 }
 0x8e8   : > { %v3478_v21 = vpop.f32.mrb[60].mxu1  ;;  %v3576_v31 = vmul.f32 1.442695, %v3552_v50  ;;  %v3551_v46 = vmin.f32 %v6952_v58, 20.0  ;;  %v3566_v48 = vmul.f32 1.442695, %v3547_v38 }
 0x8e9   : > { %4562 = vpow2.f32 %v3564_v35  ;;  %v3572_v28 = vmul.f32 1.442695, %v3550_v17  ;;  %v3502_v9 = vmul.f32 100.0, %v3478_v21  ;;  %v3480_v43 = vpop.f32.mrb[61].mxu1  ;;  %v3578_v18 = vmul.f32 1.442695, %v3553_v24 }
 0x8ea   : > { %v3482_v33 = vpop.f32.mrb[62].mxu1  ;;  %v3503_v44 = vmul.f32 100.0, %v3480_v43  ;;  %v3574_v16 = vmul.f32 1.442695, %v3551_v46  ;;  %v3556_v5 = vmin.f32 %v6973_v37, 20.0  ;;  %vm3742_vm7 = vcmp.gt.f32.partialorder %v6939_v10, 20.0 }
 0x8eb   : > { %4564 = vpow2.f32 %v3572_v28  ;;  %v6955_v53 = vadd.f32 %v3521_v45, %v3502_v9  ;;  %v6959_v61 = vpop.f32.mrb[63].mxu1  ;;  %v3506_v30 = vmul.f32 100.0, %v3482_v33  ;;  %vm3744_vm8 = vcmp.gt.f32.partialorder %v6945_v34, 20.0 }
 0x8ec   : > { %v4559_v2 = vpop.eup %4558  ;;  %4566 = vpow2.f32 %v3576_v31  ;;  %v6970_v12 = vadd.f32 %v3521_v45, %v3503_v44  ;;  %v3584_v62 = vmul.f32 1.442695, %v3556_v5  ;;  %v3505_v45 = vmul.f32 100.0, %v6941_v47 }
 0x8ed   : > { %v3592_v15 = vadd.f32 1.0, %v4559_v2  ;;  %v3554_v63 = vmin.f32 %v6955_v53, 20.0  ;;  %v3595_v52 = vmul.f32 -0.5, %v4559_v2  ;;  %v3598_v14 = vand.u32 2147483647, %v4559_v2 }
 0x8ee   : > { %v6963_v41 = vpop.eup %4560  ;;  %v6978_v57 = vadd.f32 %v6968_v26, %v3506_v30  ;;  %v3555_v1 = vmin.f32 %v6970_v12, 20.0  ;;  %v7006_v33 = vadd.f32 %v6968_v26, %v3505_v45  ;;  %vm3746_vm11 = vcmp.gt.f32.partialorder %v6955_v53, 20.0 }
 0x8ef   : > { %4568 = vlog2.f32 %v3592_v15  ;;  %v3628_v59 = vadd.f32 1.0, %v6963_v41  ;;  %v3580_v22 = vmul.f32 1.442695, %v3554_v63  ;;  %v3596_v0 = vadd.f32 1.0, %v3595_v52 }
 0x8f0   : > { %4570 = vpow2.f32 %v3562_v40  ;;  %v3631_v7 = vmul.f32 -0.5, %v6963_v41  ;;  %vm6986_vm15 = vcmp.lt.f32.partialorder %v3598_v14, 0.0004427343  ;;  %v3558_v49 = vmin.f32 %v6978_v57, 20.0 }
 0x8f1   : > { %4572 = vlog2.f32 %v3628_v59  ;;  %v3634_v6 = vand.u32 2147483647, %v6963_v41  ;;  %v3597_v54 = vmul.f32 %v4559_v2, %v3596_v0  ;;  %v3582_v50 = vmul.f32 1.442695, %v3555_v1 }
 0x8f2   : > { %4574 = vpow2.f32 %v3580_v22  ;;  %v3632_v20 = vadd.f32 1.0, %v3631_v7  ;;  %v3588_v43 = vmul.f32 1.442695, %v3558_v49  ;;  %v3507_v2 = vmul.f32 100.0, %v6959_v61 }
 0x8f3   : > { %v6975_v56 = vpop.eup %4562  ;;  %4576 = vpow2.f32 %v3570_v60  ;;  %vm7000_vm1 = vcmp.lt.f32.partialorder %v3634_v6, 0.0004427343  ;;  %v3557_v52 = vmin.f32 %v7006_v33, 20.0  ;;  %vm3748_vm14 = vcmp.gt.f32.partialorder %v6973_v37, 20.0 }
 0x8f4   : > { %v3610_v19 = vadd.f32 1.0, %v6975_v56  ;;  %4578 = vpow2.f32 %v3566_v48  ;;  %v3613_v36 = vmul.f32 -0.5, %v6975_v56  ;;  %v3616_v47 = vand.u32 2147483647, %v6975_v56 }
 0x8f5   : > { %v6981_v11 = vpop.eup %4564  ;;  %4580 = vpow2.f32 %v3574_v16  ;;  %v3633_v63 = vmul.f32 %v6963_v41, %v3632_v20  ;;  %v7032_v41 = vadd.f32 %v6968_v26, %v3507_v2  ;;  %v3586_v5 = vmul.f32 1.442695, %v3557_v52 }
 0x8f6   : > { %4582 = vlog2.f32 %v3610_v19  ;;  %v3646_v55 = vadd.f32 1.0, %v6981_v11  ;;  %v4567_v8 = vpop.eup %4566  ;;  %v3649_v25 = vmul.f32 -0.5, %v6981_v11  ;;  %v3614_v15 = vadd.f32 1.0, %v3613_v36 }
 0x8f7   : > { %4584 = vpow2.f32 %v3578_v18  ;;  %v3664_v35 = vadd.f32 1.0, %v4567_v8  ;;  %v3667_v9 = vmul.f32 -0.5, %v4567_v8  ;;  %v3652_v46 = vand.u32 2147483647, %v6981_v11 }
 0x8f8   : > { %4586 = vlog2.f32 %v3646_v55  ;;  %v3650_v59 = vadd.f32 1.0, %v3649_v25  ;;  %v3670_v30 = vand.u32 2147483647, %v4567_v8  ;;  %vm7027_vm5 = vcmp.lt.f32.partialorder %v3616_v47, 0.0004427343 }
 0x8f9   : > { %v4569_v17 = vpop.eup %4568  ;;  %4588 = vpow2.f32 %v3584_v62  ;;  %v3668_v24 = vadd.f32 1.0, %v3667_v9  ;;  %v3615_v18 = vmul.f32 %v6975_v56, %v3614_v15  ;;  %vm7035_vm6 = vcmp.lt.f32.partialorder %v3652_v46, 0.0004427343 }
 0x8fa   : > { %v6997_v21 = vpop.eup %4570  ;;  %v3594_v28 = vmul.f32 0.6931472, %v4569_v17  ;;  %4590 = vlog2.f32 %v3664_v35  ;;  %v3651_v49 = vmul.f32 %v6981_v11, %v3650_v59  ;;  %vm7051_vm9 = vcmp.lt.f32.partialorder %v3670_v30, 0.0004427343 }
 0x8fb   : > { %v4573_v4 = vpop.eup %4572  ;;  %4592 = vpow2.f32 %v3588_v43  ;;  %v3601_v56 = vadd.f32 1.0, %v6997_v21  ;;  %v3669_v6 = vmul.f32 %v4567_v8, %v3668_v24  ;;  %v3559_v35 = vmin.f32 %v7032_v41, 20.0 }
 0x8fc   : > { %v7009_v40 = vpop.eup %4574  ;;  %v3600_v38 = vsel %vm6986_vm15, %v3597_v54, %v3594_v28  ;;  %v3630_v60 = vmul.f32 0.6931472, %v4573_v4  ;;  %4594 = vpow2.f32 %v3582_v50  ;;  %v3604_v9 = vmul.f32 -0.5, %v6997_v21 }
 0x8fd   : > { %v7014_v44 = vpop.eup %4576  ;;  %v3682_v29 = vadd.f32 1.0, %v7009_v40  ;;  %v3752_v22 = vsel %vm3736_vm0, %v6928_v51, %v3600_v38  ;;  %v3685_v19 = vmul.f32 -0.5, %v7009_v40  ;;  %v3688_v51 = vand.u32 2147483647, %v7009_v40 }
 0x8fe   : > { %v7019_v61 = vpop.eup %4578  ;;  %v3636_v26 = vsel %vm7000_vm1, %v3633_v63, %v3630_v60  ;;  %v7048_v55 = vmul.f32 0.01, %v3752_v22  ;;  %v3590_v46 = vmul.f32 1.442695, %v3559_v35  ;;  %v3605_v52 = vadd.f32 1.0, %v3604_v9 }
 0x8ff   : > { %v7022_v48 = vpop.eup %4580  ;;  %4596 = vlog2.f32 %v3682_v29  ;;  %v3756_v20 = vsel %vm3740_vm3, %v6931_v23, %v3636_v26  ;;  %v3686_v25 = vadd.f32 1.0, %v3685_v19  ;;  %vm7061_vm10 = vcmp.lt.f32.partialorder %v3688_v51, 0.0004427343 }
 0x900   : > { %v4583_v14 = vpop.eup %4582  ;;  %4598 = vlog2.f32 %v3601_v56  ;;  %v3637_v23 = vadd.f32 1.0, %v7014_v44  ;;  %v7077_v60 = vmul.f32 0.01, %v3756_v20  ;;  %v3607_v29 = vand.u32 2147483647, %v6997_v21 }
 0x901   : > { %v7042_v7 = vpop.eup %4584  ;;  %v3612_v1 = vmul.f32 0.6931472, %v4583_v14  ;;  %4600 = vpow2.f32 %v3586_v5  ;;  %v3622_v56 = vmul.f32 -0.5, %v7019_v61  ;;  %vm3750_vm15 = vcmp.gt.f32.partialorder %v6978_v57, 20.0 }
 0x902   : > { %v4587_v3 = vpop.eup %4586  ;;  %v3643_v62 = vand.u32 2147483647, %v7014_v44  ;;  %vm3741_vm0 = vcmp.gt.f32.partialorder %v6943_v27, 20.0  ;;  %vm7111_vm1 = vcmp.lt.f32.partialorder %v3607_v29, 0.0004427343  ;;  %v3658_v9 = vmul.f32 -0.5, %v7022_v48 }
 0x903   : > { %v4589_v45 = vpop.eup %4588  ;;  %v3618_v54 = vsel %vm7027_vm5, %v3615_v18, %v3612_v1  ;;  %v3648_v36 = vmul.f32 0.6931472, %v4587_v3  ;;  %v3640_v18 = vmul.f32 -0.5, %v7014_v44  ;;  %v3625_v35 = vand.u32 2147483647, %v7019_v61 }
 0x904   : > { %v4591_v17 = vpop.eup %4590  ;;  %v3700_v11 = vadd.f32 1.0, %v4589_v45  ;;  %v3703_v8 = vmul.f32 -0.5, %v4589_v45  ;;  %v3754_v4 = vsel %vm3738_vm4, %v6934_v13, %v3618_v54  ;;  %v3706_v38 = vand.u32 2147483647, %v4589_v45 }
 0x905   : > { %v3666_v50 = vmul.f32 0.6931472, %v4591_v17  ;;  %v4593_v43 = vpop.eup %4592  ;;  %v3654_v47 = vsel %vm7035_vm6, %v3651_v49, %v3648_v36  ;;  %v3687_v13 = vmul.f32 %v7009_v40, %v3686_v25  ;;  %v7081_v24 = vmul.f32 0.01, %v3754_v4 }
 0x906   : > { %4602 = vlog2.f32 %v3700_v11  ;;  %v7072_v31 = vpop.eup %4594  ;;  %v3718_v15 = vadd.f32 1.0, %v4593_v43  ;;  %v3704_v63 = vadd.f32 1.0, %v3703_v8  ;;  %v3758_v30 = vsel %vm3742_vm7, %v6939_v10, %v3654_v47 }
 0x907   : > { %v3672_v2 = vsel %vm7051_vm9, %v3669_v6, %v3666_v50  ;;  %v3721_v14 = vmul.f32 -0.5, %v4593_v43  ;;  %vm7090_vm13 = vcmp.lt.f32.partialorder %v3706_v38, 0.0004427343  ;;  %v3619_v10 = vadd.f32 1.0, %v7019_v61 }
 0x908   : > { %4604 = vlog2.f32 %v3718_v15  ;;  %v3760_v22 = vsel %vm3744_vm8, %v6945_v34, %v3672_v2  ;;  %v7096_v0 = vmul.f32 0.01, %v3758_v30  ;;  %v3705_v19 = vmul.f32 %v4589_v45, %v3704_v63 }
 0x909   : > { %v4597_v59 = vpop.eup %4596  ;;  %4606 = vlog2.f32 %v3637_v23  ;;  %v3724_v51 = vand.u32 2147483647, %v4593_v43  ;;  %v3655_v34 = vadd.f32 1.0, %v7022_v48  ;;  %v7099_v26 = vmul.f32 0.01, %v3760_v22 }
 0x90a   : > { %v3684_v16 = vmul.f32 0.6931472, %v4597_v59  ;;  %4608 = vpow2.f32 %v3590_v46  ;;  %v4599_v1 = vpop.eup %4598  ;;  %v3722_v3 = vadd.f32 1.0, %v3721_v14  ;;  %v3606_v6 = vmul.f32 %v6997_v21, %v3605_v52 }
 0x90b   : > { %4610 = vlog2.f32 %v3619_v10  ;;  %v3603_v49 = vmul.f32 0.6931472, %v4599_v1  ;;  %v7108_v45 = vpop.eup %4600  ;;  %v3641_v36 = vadd.f32 1.0, %v3640_v18  ;;  %v3785_v21 = vpack.c.bf16 %v7077_v60, %v7048_v55 }
 0x90c   : > { %v3690_v5 = vsel %vm7061_vm10, %v3687_v13, %v3684_v16  ;;  %4612 = vlog2.f32 %v3655_v34  ;;  %v3787_v25 = vpack.c.bf16 %v7096_v0, %v7081_v24  ;;  %v3673_v11 = vadd.f32 1.0, %v7042_v7 }
 0x90d   : > { %v3762_v20 = vsel %vm3746_vm11, %v6955_v53, %v3690_v5  ;;  %v3609_v50 = vsel %vm7111_vm1, %v3606_v6, %v3603_v49  ;;  %v3623_v28 = vadd.f32 1.0, %v3622_v56  ;;  %vm3739_vm3 = vcmp.gt.f32.partialorder %v6949_v32, 20.0 }
 0x90e   : > { %v3723_v4 = vmul.f32 %v4593_v43, %v3722_v3  ;;  %vm7128_vm4 = vcmp.lt.f32.partialorder %v3724_v51, 0.0004427343  ;;  %vm7132_vm5 = vcmp.lt.f32.partialorder %v3643_v62, 0.0004427343  ;;  %4614 = vlog2.f32 %v3673_v11 }
 0x90f   : > { %v7136_v2 = vmul.f32 0.01, %v3762_v20  ;;  %v3642_v15 = vmul.f32 %v7014_v44, %v3641_v36  ;;  %v3709_v46 = vadd.f32 1.0, %v7108_v45  ;;  %vm3743_vm6 = vcmp.gt.f32.partialorder %v6952_v58, 20.0 }
 0x910   : > { %v4603_v17 = vpop.eup %4602  ;;  %v3753_v63 = vsel %vm3737_vm12, %v6936_v39, %v3609_v50  ;;  %vm7146_vm7 = vcmp.lt.f32.partialorder %v3625_v35, 0.0004427343  ;;  %v3676_v59 = vmul.f32 -0.5, %v7042_v7  ;;  %v3624_v44 = vmul.f32 %v7019_v61, %v3623_v28 }
 0x911   : > { %v3702_v8 = vmul.f32 0.6931472, %v4603_v17  ;;  %v3659_v22 = vadd.f32 1.0, %v3658_v9  ;;  %4616 = vlog2.f32 %v3709_v46  ;;  %v3661_v14 = vand.u32 2147483647, %v7022_v48 }
 0x912   : > { %v4605_v23 = vpop.eup %4604  ;;  %v3691_v40 = vadd.f32 1.0, %v7072_v31  ;;  %v3712_v51 = vmul.f32 -0.5, %v7108_v45  ;;  %v3677_v1 = vadd.f32 1.0, %v3676_v59  ;;  %v3679_v5 = vand.u32 2147483647, %v7042_v7 }
 0x913   : > { %v3708_v38 = vsel %vm7090_vm13, %v3705_v19, %v3702_v8  ;;  %v4607_v43 = vpop.eup %4606  ;;  %v3720_v13 = vmul.f32 0.6931472, %v4605_v23  ;;  %v3769_v19 = vmul.f32 0.01, %v3753_v63  ;;  %vm3662_vm8 = vcmp.lt.f32.partialorder %v3661_v14, 0.0004427343 }
 0x914   : > { %v7151_v30 = vpop.eup %4608  ;;  %v3639_v52 = vmul.f32 0.6931472, %v4607_v43  ;;  %v3764_v16 = vsel %vm3748_vm14, %v6973_v37, %v3708_v38  ;;  %4618 = vlog2.f32 %v3691_v40  ;;  %v3713_v17 = vadd.f32 1.0, %v3712_v51 }
 0x915   : > { %v3726_v39 = vsel %vm7128_vm4, %v3723_v4, %v3720_v13  ;;  %v4611_v18 = vpop.eup %4610  ;;  %v7171_v3 = vmul.f32 0.01, %v3764_v16  ;;  %v3727_v36 = vadd.f32 1.0, %v7151_v30  ;;  %v3694_v8 = vmul.f32 -0.5, %v7072_v31 }
 0x916   : > { %v3766_v10 = vsel %vm3750_vm15, %v6978_v57, %v3726_v39  ;;  %v3645_v61 = vsel %vm7132_vm5, %v3642_v15, %v3639_v52  ;;  %v3621_v34 = vmul.f32 0.6931472, %v4611_v18  ;;  %v4613_v56 = vpop.eup %4612  ;;  %v3660_v57 = vmul.f32 %v7022_v48, %v3659_v22 }
 0x917   : > { %v3757_v37 = vsel %vm3741_vm0, %v6943_v27, %v3645_v61  ;;  %v7174_v6 = vmul.f32 0.01, %v3766_v10  ;;  %v3657_v54 = vmul.f32 0.6931472, %v4613_v56  ;;  %v3678_v48 = vmul.f32 %v7042_v7, %v3677_v1 }
 0x918   : > { %v3773_v49 = vmul.f32 0.01, %v3757_v37  ;;  %v3627_v62 = vsel %vm7146_vm7, %v3624_v44, %v3621_v34  ;;  %v4615_v20 = vpop.eup %4614  ;;  %4620 = vlog2.f32 %v3727_v36  ;;  %v3715_v9 = vand.u32 2147483647, %v7108_v45 }
 0x919   : > { %v3755_v35 = vsel %vm3739_vm3, %v6949_v32, %v3627_v62  ;;  %v3663_v11 = vsel %vm3662_vm8, %v3660_v57, %v3657_v54  ;;  %v3675_v28 = vmul.f32 0.6931472, %v4615_v20  ;;  %v3789_v4 = vpack.c.bf16 %v7171_v3, %v7099_v26 }
 0x91a   : > { %v3786_v27 = vpack.c.bf16 %v3773_v49, %v3769_v19  ;;  %v3759_v50 = vsel %vm3743_vm6, %v6952_v58, %v3663_v11  ;;  %v3771_v32 = vmul.f32 0.01, %v3755_v35  ;;  %vm3680_vm9 = vcmp.lt.f32.partialorder %v3679_v5, 0.0004427343 }
 0x91b   : > { %v3775_v53 = vmul.f32 0.01, %v3759_v50  ;;  %v3791_v7 = vpack.c.bf16 %v7174_v6, %v7136_v2  ;;  %v4617_v47 = vpop.eup %4616  ;;  %vm3745_vm10 = vcmp.gt.f32.partialorder %v6957_v42, 20.0  ;;  %v3681_v58 = vsel %vm3680_vm9, %v3678_v48, %v3675_v28 }
 0x91c   : > { %3802 = vmatprep.subr.bf16.mxu0 %v3786_v27  ;;  %v3730_v23 = vmul.f32 -0.5, %v7151_v30  ;;  %v3711_v15 = vmul.f32 0.6931472, %v4617_v47  ;;  %v3714_v26 = vmul.f32 %v7108_v45, %v3713_v17  ;;  %v3695_v46 = vadd.f32 1.0, %v3694_v8 }
 0x91d   : > { %3803 = vmatpush1.bf16.msra.mxu0 %v3785_v21  ;;  %v3788_v38 = vpack.c.bf16 %v3775_v53, %v3771_v32  ;;  %vm3716_vm11 = vcmp.lt.f32.partialorder %v3715_v9, 0.0004427343  ;;  %v3761_v43 = vsel %vm3745_vm10, %v6957_v42, %v3681_v58  ;;  %v3697_v55 = vand.u32 2147483647, %v7072_v31 }
 0x91e   : > { %vm3749_vm12 = vcmp.gt.f32.partialorder %v7006_v33, 20.0  ;;  %v3717_v60 = vsel %vm3716_vm11, %v3714_v26, %v3711_v15  ;;  %v4619_v21 = vpop.eup %4618  ;;  %v3731_v13 = vadd.f32 1.0, %v3730_v23  ;;  %v3733_v45 = vand.u32 2147483647, %v7151_v30 }
 0x91f   : > { %3843 = vmatprep.subr.bf16.mxu1 %v3788_v38  ;;  %v3765_v2 = vsel %vm3749_vm12, %v7006_v33, %v3717_v60  ;;  %v3777_v63 = vmul.f32 0.01, %v3761_v43  ;;  %v3693_v59 = vmul.f32 0.6931472, %v4619_v21  ;;  %v3696_v42 = vmul.f32 %v7072_v31, %v3695_v46  ;;  %v3784_v31 = vld [vmem:[%s7228_s3] sm:$0xf] }
 0x920   : > { %3844 = vmatpush1.bf16.msra.mxu1 %v3787_v25  ;;  %v3781_v29 = vmul.f32 0.01, %v3765_v2  ;;  %vm3698_vm13 = vcmp.lt.f32.partialorder %v3697_v55, 0.0004427343  ;;  %vm3747_vm14 = vcmp.gt.f32.partialorder %v6970_v12, 20.0  ;;  %v3732_v24 = vmul.f32 %v7151_v30, %v3731_v13 }
 0x921   : > { %v3699_v22 = vsel %vm3698_vm13, %v3696_v42, %v3693_v59  ;;  %vm3734_vm15 = vcmp.lt.f32.partialorder %v3733_v45, 0.0004427343  ;;  %vm3751_vm0 = vcmp.gt.f32.partialorder %v7032_v41, 20.0 }
 0x922   : > { %v4621_v52 = vpop.eup %4620  ;;  %v3790_v44 = vpack.c.bf16 %v3781_v29, %v3777_v63  ;;  %v3763_v33 = vsel %vm3747_vm14, %v6970_v12, %v3699_v22  ;;  %v3797_v12 = vpop.permute.xlu0 %3796 }
 0x923   : > { %v3729_v16 = vmul.f32 0.6931472, %v4621_v52  ;;  %v3779_v39 = vmul.f32 0.01, %v3763_v33 }
 0x924   : > { %3804 = vmatprep.subr.bf16.mxu0 %v3790_v44 }
 0x925   : > { %v3735_v0 = vsel %vm3734_vm15, %v3732_v24, %v3729_v16  ;;  %3805 = vmatpush1.bf16.msra.mxu0 %v3789_v4 }
 0x926   : > { %v3767_v25 = vsel %vm3751_vm0, %v7032_v41, %v3735_v0 }
 0x927   : > { %v3783_v14 = vmul.f32 0.01, %v3767_v25 }
 0x928   : > { %4061 = vmatmul.mubr.msk.bf16.vlgmr.msra.gmra.mrb[64].mxu0 %vm782_vm2, %v3784_v31 }
 0x929   : > { %v3792_v30 = vpack.c.bf16 %v3783_v14, %v3779_v39 }
 0x92b   : > { %3845 = vmatprep.subr.bf16.mxu1 %v3792_v30 }
 0x92c   : > { %3846 = vmatpush1.bf16.msra.mxu1 %v3791_v7 }
 0x92f   : > { %4062 = vmatmul.mubr.msk.bf16.vlgmr.msra.gmra.mrb[64].mxu1 %vm782_vm2, %v3784_v31 }
 0x9fb   : > { %v3836_v40 = vpop.f32.mrb[64].mxu0 }
 0x9fc   : > { %v3837_v18 = vadd.f32 %v3836_v40, %v3797_v12  ;;  %v3838_v10 = vpop.f32.mrb[65].mxu0 }
 0x9fd   : > { %v3839_v61 = vadd.f32 %v3838_v10, %v3797_v12  ;;  %v3840_v41 = vpop.f32.mrb[66].mxu0 }
 0x9fe   : > { %3884 = vst [vmem:[%s253_s28] sm:$0xff] %v3837_v18  ;;  %v3841_v19 = vpop.f32.mrb[67].mxu0 }
 0x9ff   : > { %3885 = vst [vmem:[%s253_s28 + $0x8] sm:$0xff] %v3839_v61 }
 0xa02   : > { %v3877_v51 = vpop.f32.mrb[64].mxu1 }
 0xa03   : > { %v3878_v37 = vadd.f32 %v3877_v51, %v3797_v12  ;;  %v3879_v34 = vpop.f32.mrb[65].mxu1 }
 0xa04   : > { %v3880_v1 = vadd.f32 %v3879_v34, %v3797_v12  ;;  %v3881_v5 = vpop.f32.mrb[66].mxu1 }
 0xa05   : > { %3886 = vst [vmem:[%s253_s28 + $0x10] sm:$0xff] %v3878_v37  ;;  %v3882_v56 = vpop.f32.mrb[67].mxu1 }
 0xa06   : > { %3887 = vst [vmem:[%s253_s28 + $0x18] sm:$0xff] %v3880_v1 }
 0xa07 PF: > { %s16_s21 = sadd.s32 1, %s4628_s21  }
 0xa08   : > { %p13_p4 = scmp.ge.s32.totalorder %s16_s21, 4  }
 0xa0a   :  { %15 = sbr.rel (!%p13_p4) target bundleno = 1 (0x1), region = 87 }

</bundles_post_ra>
